<compile_context>
chip_gen: v7x
topology: tpu7x:2x2x1
jax: 0.10.0
libtpu: 0.0.40
codegen_flags: <defaults>
</compile_context>

<pallas_src>
import functools

import jax
import jax.numpy as jnp
from jax.experimental import pallas as pl
from jax.experimental.pallas import tpu as pltpu


# ------------------------------ fused kernel ------------------------------- #
def _vae_fused_kernel(cols1_ref, w1_ref, b1_ref, w2_ref, b2_ref,
                      wfc_ref, bfc_ref, wmu_ref, bmu_ref,
                      out_ref,
                      g00, g01, g10, g11, flat_ref):
    """Per-sample fused forward: conv1 -> conv2 -> fc -> mu (all in VMEM)."""
    grids = (g00, g01, g10, g11)          # parity grids: index = pr * 2 + pc

    # Zero the padded de-interleaved h1 grids (scratch persists across samples).
    for g in grids:
        g[...] = jnp.zeros_like(g)

    # ---- conv1: im2col matmul (bf16 MXU, f32 acc) + bias + ReLU ------------ #
    h1 = jnp.dot(cols1_ref[...], w1_ref[...],
                 preferred_element_type=jnp.float32)          # (196, 32)
    h1 = jnp.maximum(h1 + b1_ref[...], 0.0)

    # Scatter conv1 output into the padded parity grids:
    #   grid[(pr,pc)][t + pr, u + pc] = h1[row 2t+pr, col 2u+pc]   (t,u in 0..6)
    # Grid flat index = tr * 8 + tc; everything else stays zero (the conv pad).
    for pr in (0, 1):
        for pc in (0, 1):
            gi = grids[pr * 2 + pc]
            base = (pr * 2 + pc) * 49
            for t in range(7):
                dst = (t + pr) * 8 + pc
                src = base + t * 7
                gi[dst:dst + 7, :] = h1[src:src + 7, :]

    # ---- conv2: sum of 16 shifted contiguous-slice matmuls ----------------- #
    # Output accumulator rows are flat spatial index oh*8 + ow (rows with
    # oh==7 or ow==7 are junk and are zero-weighted in the fc weight).
    acc2 = jnp.zeros((64, 64), jnp.float32)
    for i in range(4):
        pr, di = (i + 1) % 2, i // 2
        for j in range(4):
            pc, dj = (j + 1) % 2, j // 2
            gi = grids[pr * 2 + pc]
            shift = di * 8 + dj
            lhs = gi[shift:shift + 64, :].astype(jnp.bfloat16)          # (64,32)
            w = w2_ref[(i * 4 + j) * 32:(i * 4 + j + 1) * 32, :]        # (32,64)
            acc2 = acc2 + jnp.dot(lhs, w, preferred_element_type=jnp.float32)
    h2 = jnp.maximum(acc2 + b2_ref[...], 0.0)                  # (64, 64)

    # ---- flatten to a lane-major (1, 4096) vector -------------------------- #
    # flat[0, s*64 + c] = h2[s, c]; the fc weight was pre-arranged to match.
    for s in range(64):
        flat_ref[0:1, s * 64:(s + 1) * 64] = h2[s:s + 1, :]

    # ---- fc + ReLU ---------------------------------------------------------- #
    h = jnp.dot(flat_ref[...].astype(jnp.bfloat16), wfc_ref[...],
                preferred_element_type=jnp.float32)            # (1, 256)
    h = jnp.maximum(h + bfc_ref[...], 0.0)

    # ---- mu (output columns zero-padded to 128 -> lane-dense store) -------- #
    mu = jnp.dot(h.astype(jnp.bfloat16), wmu_ref[...],
                 preferred_element_type=jnp.float32) + bmu_ref[...]
    out_ref[...] = mu                                          # (1, 128)


# ------------------------------ host-side glue ----------------------------- #
def _build_conv1_cols(x_nchw):
    """Parity-group-ordered im2col for conv1 (4x4, stride 2, pad 1).

    Returns (B, 196, 16*Cin): rows grouped as (pr, pc, t, u) with the conv1
    output position (2t+pr, 2u+pc); columns ordered (kh, kw, cin).
    """
    x = jnp.transpose(x_nchw, (0, 2, 3, 1))                    # NHWC
    xp = jnp.pad(x, ((0, 0), (1, 1), (1, 1), (0, 0)))          # (B, 30, 30, C)
    b, cin = x.shape[0], x.shape[-1]
    groups = []
    for pr in (0, 1):
        for pc in (0, 1):
            pats = []
            for i in range(4):
                for j in range(4):
                    r0, c0 = 2 * pr + i, 2 * pc + j
                    pats.append(xp[:, r0:r0 + 25:4, c0:c0 + 25:4, :])  # (B,7,7,C)
            pat = jnp.stack(pats, axis=3)                      # (B,7,7,16,C)
            groups.append(pat.reshape(b, 49, 16 * cin))
    return jnp.concatenate(groups, axis=1)                     # (B,196,16*C)


def init_vae_params(key, in_features, z_dim, h_dim=256):
    """Synthetic PyTorch-layout parameters for the (assumed) Encoder28 + mu."""
    ks = jax.random.split(key, 8)
    s, sb = 0.05, 0.01
    return {
        "conv1_w": s * jax.random.normal(ks[0], (32, in_features, 4, 4), jnp.float32),
        "conv1_b": sb * jax.random.normal(ks[1], (32,), jnp.float32),
        "conv2_w": s * jax.random.normal(ks[2], (64, 32, 4, 4), jnp.float32),
        "conv2_b": sb * jax.random.normal(ks[3], (64,), jnp.float32),
        "fc_w": s * jax.random.normal(ks[4], (h_dim, 64 * 7 * 7), jnp.float32),
        "fc_b": sb * jax.random.normal(ks[5], (h_dim,), jnp.float32),
        "mu_w": s * jax.random.normal(ks[6], (z_dim, h_dim), jnp.float32),
        "mu_b": sb * jax.random.normal(ks[7], (z_dim,), jnp.float32),
    }


def prepare_kernel_params(p):
    """One-time re-layout of PyTorch-layout weights into kernel layout (bf16)."""
    z_dim, h_dim = p["mu_w"].shape
    # Conv weights: (Cout, Cin, kh, kw) -> (kh, kw, Cin, Cout) -> (K, Cout).
    w1 = jnp.transpose(p["conv1_w"], (2, 3, 1, 0)).reshape(-1, 32)
    w2 = jnp.transpose(p["conv2_w"], (2, 3, 1, 0)).reshape(-1, 64)
    # fc weight: torch (out, in) with in ordered (c, oh, ow).  Re-order rows to
    # the kernel's (oh*8 + ow)*64 + c layout; padding rows (oh==7 / ow==7) are 0.
    wfc = p["fc_w"].T.reshape(64, 7, 7, h_dim)
    wfc = jnp.pad(wfc, ((0, 0), (0, 1), (0, 1), (0, 0)))
    wfc = jnp.transpose(wfc, (1, 2, 0, 3)).reshape(64 * 64, h_dim)
    # mu: pad output columns to a lane-dense 128.
    wmu = jnp.pad(p["mu_w"].T, ((0, 0), (0, 128 - z_dim)))
    bmu = jnp.pad(p["mu_b"], (0, 128 - z_dim))
    bf = jnp.bfloat16
    return {
        "w1": w1.astype(bf), "b1": p["conv1_b"].reshape(1, 32).astype(jnp.float32),
        "w2": w2.astype(bf), "b2": p["conv2_b"].reshape(1, 64).astype(jnp.float32),
        "wfc": wfc.astype(bf), "bfc": p["fc_b"].reshape(1, h_dim).astype(jnp.float32),
        "mu_w": wmu.astype(bf), "mu_b": bmu.reshape(1, 128).astype(jnp.float32),
    }


@functools.partial(jax.jit, static_argnames=("z_dim",))
def vae_forward(kp, x_nchw, *, z_dim):
    """VAE.forward: h = encoder(x); return mu(h).  Input layout: NCHW."""
    assert x_nchw.shape[2:] == (28, 28), x_nchw.shape
    batch = x_nchw.shape[0]
    cols1 = _build_conv1_cols(x_nchw).astype(jnp.bfloat16)     # (B, 196, 16*C)

    def full_spec(arr):
        return pl.BlockSpec(arr.shape, lambda b, _nd=arr.ndim: (0,) * _nd)

    weight_names = ("w1", "b1", "w2", "b2", "wfc", "bfc", "mu_w", "mu_b")
    in_specs = [pl.BlockSpec((None,) + cols1.shape[1:], lambda b: (b, 0, 0))]
    in_specs += [full_spec(kp[k]) for k in weight_names]

    flops = 2 * batch * (196 * cols1.shape[-1] * 32 + 16 * 64 * 32 * 64
                         + 4096 * 256 + 256 * 128)
    bytes_accessed = int(cols1.size) * 2 + batch * 128 * 4
    bytes_accessed += sum(int(kp[k].size) * kp[k].dtype.itemsize
                          for k in weight_names)

    out = pl.pallas_call(
        _vae_fused_kernel,
        out_shape=jax.ShapeDtypeStruct((batch, 1, 128), jnp.float32),
        grid_spec=pltpu.PrefetchScalarGridSpec(
            num_scalar_prefetch=0,
            grid=(batch,),
            in_specs=in_specs,
            out_specs=pl.BlockSpec((None, 1, 128), lambda b: (b, 0, 0)),
            scratch_shapes=[
                pltpu.VMEM((80, 32), jnp.float32),   # parity grid (pr=0, pc=0)
                pltpu.VMEM((80, 32), jnp.float32),   # parity grid (pr=0, pc=1)
                pltpu.VMEM((80, 32), jnp.float32),   # parity grid (pr=1, pc=0)
                pltpu.VMEM((80, 32), jnp.float32),   # parity grid (pr=1, pc=1)
                pltpu.VMEM((1, 4096), jnp.float32),  # flattened fc input
            ],
        ),
        compiler_params=pltpu.CompilerParams(
            dimension_semantics=("parallel",)),
        cost_estimate=pl.CostEstimate(flops=flops, transcendentals=0,
                                      bytes_accessed=bytes_accessed),
    )(cols1, *[kp[k] for k in weight_names])
    return out[:, 0, :z_dim]


# ------------------------------ f32 reference ------------------------------ #
def vae_forward_reference(p, x):
    dn = ("NCHW", "OIHW", "NCHW")
    h = jax.lax.conv_general_dilated(x, p["conv1_w"], (2, 2), ((1, 1), (1, 1)),
                                     dimension_numbers=dn)
    h = jax.nn.relu(h + p["conv1_b"][None, :, None, None])
    h = jax.lax.conv_general_dilated(h, p["conv2_w"], (2, 2), ((1, 1), (1, 1)),
                                     dimension_numbers=dn)
    h = jax.nn.relu(h + p["conv2_b"][None, :, None, None])
    h = h.reshape(h.shape[0], -1)                       # PyTorch (C,H,W) flatten
    h = jax.nn.relu(h @ p["fc_w"].T + p["fc_b"])
    return h @ p["mu_w"].T + p["mu_b"]


if __name__ == "__main__":
    key = jax.random.PRNGKey(0)
    k_param, k_x = jax.random.split(key)

    batch, in_features, resolution, z_dim = 2, 1, 28, 32
    params = init_vae_params(k_param, in_features, z_dim, h_dim=256)
    kparams = prepare_kernel_params(params)             # one-time weight re-layout
    x = jax.random.uniform(k_x, (batch, in_features, resolution, resolution),
                           dtype=jnp.float32)

    mu = jax.block_until_ready(vae_forward(kparams, x, z_dim=z_dim))
    assert mu.shape == (batch, z_dim), mu.shape
    assert mu.dtype == jnp.float32

    # Numerical check against a plain f32 XLA reference (bf16 MXU tolerance).
    ref = jax.block_until_ready(vae_forward_reference(params, x))
    err = float(jnp.max(jnp.abs(mu - ref)))
    scale = float(jnp.max(jnp.abs(ref))) + 1e-6
    assert err <= 5e-2 * scale + 5e-3, f"mismatch: max_err={err}, scale={scale}"

    print("KERNEL_OK")
</pallas_src>

<mosaic_0001>
module attributes {stable_mosaic.version = 11 : i64} {
  func.func @_vae_fused_kernel(%arg0: i32, %arg1: memref<1x196x16xbf16, #tpu.memory_space<vmem>>, %arg2: memref<16x32xbf16, #tpu.memory_space<vmem>>, %arg3: memref<1x32xf32, #tpu.memory_space<vmem>>, %arg4: memref<512x64xbf16, #tpu.memory_space<vmem>>, %arg5: memref<1x64xf32, #tpu.memory_space<vmem>>, %arg6: memref<4096x256xbf16, #tpu.memory_space<vmem>>, %arg7: memref<1x256xf32, #tpu.memory_space<vmem>>, %arg8: memref<256x128xbf16, #tpu.memory_space<vmem>>, %arg9: memref<1x128xf32, #tpu.memory_space<vmem>>, %arg10: memref<1x1x128xf32, #tpu.memory_space<vmem>>, %arg11: memref<80x32xf32, #tpu.memory_space<vmem>>, %arg12: memref<80x32xf32, #tpu.memory_space<vmem>>, %arg13: memref<80x32xf32, #tpu.memory_space<vmem>>, %arg14: memref<80x32xf32, #tpu.memory_space<vmem>>, %arg15: memref<1x4096xf32, #tpu.memory_space<vmem>>) attributes {dimension_semantics = [#tpu.dimension_semantics<parallel>], iteration_bounds = array<i64: 2>, scalar_prefetch = 0 : i64, scratch_operands = 5 : i64, tpu.core_type = #tpu.core_type<tc>, window_params = [{transform_indices = @transform_0, window_bounds = array<i64: 1, 196, 16>}, {pipeline_mode = #tpu.pipeline_mode<synchronous>, transform_indices = @transform_1, window_bounds = array<i64: 16, 32>}, {pipeline_mode = #tpu.pipeline_mode<synchronous>, transform_indices = @transform_2, window_bounds = array<i64: 1, 32>}, {pipeline_mode = #tpu.pipeline_mode<synchronous>, transform_indices = @transform_3, window_bounds = array<i64: 512, 64>}, {pipeline_mode = #tpu.pipeline_mode<synchronous>, transform_indices = @transform_4, window_bounds = array<i64: 1, 64>}, {pipeline_mode = #tpu.pipeline_mode<synchronous>, transform_indices = @transform_5, window_bounds = array<i64: 4096, 256>}, {pipeline_mode = #tpu.pipeline_mode<synchronous>, transform_indices = @transform_6, window_bounds = array<i64: 1, 256>}, {pipeline_mode = #tpu.pipeline_mode<synchronous>, transform_indices = @transform_7, window_bounds = array<i64: 256, 128>}, {pipeline_mode = #tpu.pipeline_mode<synchronous>, transform_indices = @transform_8, window_bounds = array<i64: 1, 128>}, {transform_indices = @transform_9, window_bounds = array<i64: 1, 1, 128>}]} {
    %cst = arith.constant 0.000000e+00 : f32
    %0 = vector.broadcast %cst : f32 to vector<80x32xf32>
    %c0 = arith.constant 0 : index
    %c0_0 = arith.constant 0 : index
    %1 = vector.load %arg11[%c0, %c0_0] : memref<80x32xf32, #tpu.memory_space<vmem>>, vector<80x32xf32>
    tpu.vector_store %arg11[%c0, %c0_0], %0 {strides = array<i32>} : memref<80x32xf32, #tpu.memory_space<vmem>>, vector<80x32xf32>,
    %cst_1 = arith.constant 0.000000e+00 : f32
    %2 = vector.broadcast %cst_1 : f32 to vector<80x32xf32>
    %c0_2 = arith.constant 0 : index
    %c0_3 = arith.constant 0 : index
    %3 = vector.load %arg12[%c0_2, %c0_3] : memref<80x32xf32, #tpu.memory_space<vmem>>, vector<80x32xf32>
    tpu.vector_store %arg12[%c0_2, %c0_3], %2 {strides = array<i32>} : memref<80x32xf32, #tpu.memory_space<vmem>>, vector<80x32xf32>,
    %cst_4 = arith.constant 0.000000e+00 : f32
    %4 = vector.broadcast %cst_4 : f32 to vector<80x32xf32>
    %c0_5 = arith.constant 0 : index
    %c0_6 = arith.constant 0 : index
    %5 = vector.load %arg13[%c0_5, %c0_6] : memref<80x32xf32, #tpu.memory_space<vmem>>, vector<80x32xf32>
    tpu.vector_store %arg13[%c0_5, %c0_6], %4 {strides = array<i32>} : memref<80x32xf32, #tpu.memory_space<vmem>>, vector<80x32xf32>,
    %cst_7 = arith.constant 0.000000e+00 : f32
    %6 = vector.broadcast %cst_7 : f32 to vector<80x32xf32>
    %c0_8 = arith.constant 0 : index
    %c0_9 = arith.constant 0 : index
    %7 = vector.load %arg14[%c0_8, %c0_9] : memref<80x32xf32, #tpu.memory_space<vmem>>, vector<80x32xf32>
    tpu.vector_store %arg14[%c0_8, %c0_9], %6 {strides = array<i32>} : memref<80x32xf32, #tpu.memory_space<vmem>>, vector<80x32xf32>,
    %c0_10 = arith.constant 0 : index
    %c0_11 = arith.constant 0 : index
    %c0_12 = arith.constant 0 : index
    %8 = vector.load %arg1[%c0_10, %c0_11, %c0_12] : memref<1x196x16xbf16, #tpu.memory_space<vmem>>, vector<1x196x16xbf16>
    %9 = vector.shape_cast %8 : vector<1x196x16xbf16> to vector<196x16xbf16>
    %c0_13 = arith.constant 0 : index
    %c0_14 = arith.constant 0 : index
    %10 = vector.load %arg2[%c0_13, %c0_14] : memref<16x32xbf16, #tpu.memory_space<vmem>>, vector<16x32xbf16>
    %cst_15 = arith.constant dense<0.000000e+00> : vector<196x32xf32>
    %11 = tpu.matmul %9, %10, %cst_15 {dimension_numbers = #tpu.dot_dimension_numbers<[1], [0], [0], [1], [0, 0, 1, 1], [], []>} : vector<196x16xbf16>, vector<16x32xbf16>, vector<196x32xf32> -> vector<196x32xf32>
    %c0_16 = arith.constant 0 : index
    %c0_17 = arith.constant 0 : index
    %12 = vector.load %arg3[%c0_16, %c0_17] : memref<1x32xf32, #tpu.memory_space<vmem>>, vector<1x32xf32>
    %13 = vector.broadcast %12 : vector<1x32xf32> to vector<196x32xf32>
    %14 = arith.addf %11, %13 : vector<196x32xf32>
    %cst_18 = arith.constant 0.000000e+00 : f32
    %15 = vector.broadcast %cst_18 : f32 to vector<196x32xf32>
    %16 = arith.maximumf %14, %15 : vector<196x32xf32>
    %17 = vector.extract_strided_slice %16 {offsets = [0, 0], sizes = [7, 32], strides = [1, 1]} : vector<196x32xf32> to vector<7x32xf32>
    %c0_19 = arith.constant 0 : index
    %c0_20 = arith.constant 0 : index
    %18 = vector.load %arg11[%c0_19, %c0_20] : memref<80x32xf32, #tpu.memory_space<vmem>>, vector<7x32xf32>
    tpu.vector_store %arg11[%c0_19, %c0_20], %17 {strides = array<i32>} : memref<80x32xf32, #tpu.memory_space<vmem>>, vector<7x32xf32>,
    %19 = vector.extract_strided_slice %16 {offsets = [7, 0], sizes = [7, 32], strides = [1, 1]} : vector<196x32xf32> to vector<7x32xf32>
    %c8 = arith.constant 8 : index
    %c0_21 = arith.constant 0 : index
    %20 = vector.load %arg11[%c8, %c0_21] : memref<80x32xf32, #tpu.memory_space<vmem>>, vector<7x32xf32>
    tpu.vector_store %arg11[%c8, %c0_21], %19 {strides = array<i32>} : memref<80x32xf32, #tpu.memory_space<vmem>>, vector<7x32xf32>,
    %21 = vector.extract_strided_slice %16 {offsets = [14, 0], sizes = [7, 32], strides = [1, 1]} : vector<196x32xf32> to vector<7x32xf32>
    %c16 = arith.constant 16 : index
    %c0_22 = arith.constant 0 : index
    %22 = vector.load %arg11[%c16, %c0_22] : memref<80x32xf32, #tpu.memory_space<vmem>>, vector<7x32xf32>
    tpu.vector_store %arg11[%c16, %c0_22], %21 {strides = array<i32>} : memref<80x32xf32, #tpu.memory_space<vmem>>, vector<7x32xf32>,
    %23 = vector.extract_strided_slice %16 {offsets = [21, 0], sizes = [7, 32], strides = [1, 1]} : vector<196x32xf32> to vector<7x32xf32>
    %c24 = arith.constant 24 : index
    %c0_23 = arith.constant 0 : index
    %24 = vector.load %arg11[%c24, %c0_23] : memref<80x32xf32, #tpu.memory_space<vmem>>, vector<7x32xf32>
    tpu.vector_store %arg11[%c24, %c0_23], %23 {strides = array<i32>} : memref<80x32xf32, #tpu.memory_space<vmem>>, vector<7x32xf32>,
    %25 = vector.extract_strided_slice %16 {offsets = [28, 0], sizes = [7, 32], strides = [1, 1]} : vector<196x32xf32> to vector<7x32xf32>
    %c32 = arith.constant 32 : index
    %c0_24 = arith.constant 0 : index
    %26 = vector.load %arg11[%c32, %c0_24] : memref<80x32xf32, #tpu.memory_space<vmem>>, vector<7x32xf32>
    tpu.vector_store %arg11[%c32, %c0_24], %25 {strides = array<i32>} : memref<80x32xf32, #tpu.memory_space<vmem>>, vector<7x32xf32>,
    %27 = vector.extract_strided_slice %16 {offsets = [35, 0], sizes = [7, 32], strides = [1, 1]} : vector<196x32xf32> to vector<7x32xf32>
    %c40 = arith.constant 40 : index
    %c0_25 = arith.constant 0 : index
    %28 = vector.load %arg11[%c40, %c0_25] : memref<80x32xf32, #tpu.memory_space<vmem>>, vector<7x32xf32>
    tpu.vector_store %arg11[%c40, %c0_25], %27 {strides = array<i32>} : memref<80x32xf32, #tpu.memory_space<vmem>>, vector<7x32xf32>,
    %29 = vector.extract_strided_slice %16 {offsets = [42, 0], sizes = [7, 32], strides = [1, 1]} : vector<196x32xf32> to vector<7x32xf32>
    %c48 = arith.constant 48 : index
    %c0_26 = arith.constant 0 : index
    %30 = vector.load %arg11[%c48, %c0_26] : memref<80x32xf32, #tpu.memory_space<vmem>>, vector<7x32xf32>
    tpu.vector_store %arg11[%c48, %c0_26], %29 {strides = array<i32>} : memref<80x32xf32, #tpu.memory_space<vmem>>, vector<7x32xf32>,
    %31 = vector.extract_strided_slice %16 {offsets = [49, 0], sizes = [7, 32], strides = [1, 1]} : vector<196x32xf32> to vector<7x32xf32>
    %c1 = arith.constant 1 : index
    %c0_27 = arith.constant 0 : index
    %32 = vector.load %arg12[%c1, %c0_27] : memref<80x32xf32, #tpu.memory_space<vmem>>, vector<7x32xf32>
    tpu.vector_store %arg12[%c1, %c0_27], %31 {strides = array<i32>} : memref<80x32xf32, #tpu.memory_space<vmem>>, vector<7x32xf32>,
    %33 = vector.extract_strided_slice %16 {offsets = [56, 0], sizes = [7, 32], strides = [1, 1]} : vector<196x32xf32> to vector<7x32xf32>
    %c9 = arith.constant 9 : index
    %c0_28 = arith.constant 0 : index
    %34 = vector.load %arg12[%c9, %c0_28] : memref<80x32xf32, #tpu.memory_space<vmem>>, vector<7x32xf32>
    tpu.vector_store %arg12[%c9, %c0_28], %33 {strides = array<i32>} : memref<80x32xf32, #tpu.memory_space<vmem>>, vector<7x32xf32>,
    %35 = vector.extract_strided_slice %16 {offsets = [63, 0], sizes = [7, 32], strides = [1, 1]} : vector<196x32xf32> to vector<7x32xf32>
    %c17 = arith.constant 17 : index
    %c0_29 = arith.constant 0 : index
    %36 = vector.load %arg12[%c17, %c0_29] : memref<80x32xf32, #tpu.memory_space<vmem>>, vector<7x32xf32>
    tpu.vector_store %arg12[%c17, %c0_29], %35 {strides = array<i32>} : memref<80x32xf32, #tpu.memory_space<vmem>>, vector<7x32xf32>,
    %37 = vector.extract_strided_slice %16 {offsets = [70, 0], sizes = [7, 32], strides = [1, 1]} : vector<196x32xf32> to vector<7x32xf32>
    %c25 = arith.constant 25 : index
    %c0_30 = arith.constant 0 : index
    %38 = vector.load %arg12[%c25, %c0_30] : memref<80x32xf32, #tpu.memory_space<vmem>>, vector<7x32xf32>
    tpu.vector_store %arg12[%c25, %c0_30], %37 {strides = array<i32>} : memref<80x32xf32, #tpu.memory_space<vmem>>, vector<7x32xf32>,
    %39 = vector.extract_strided_slice %16 {offsets = [77, 0], sizes = [7, 32], strides = [1, 1]} : vector<196x32xf32> to vector<7x32xf32>
    %c33 = arith.constant 33 : index
    %c0_31 = arith.constant 0 : index
    %40 = vector.load %arg12[%c33, %c0_31] : memref<80x32xf32, #tpu.memory_space<vmem>>, vector<7x32xf32>
    tpu.vector_store %arg12[%c33, %c0_31], %39 {strides = array<i32>} : memref<80x32xf32, #tpu.memory_space<vmem>>, vector<7x32xf32>,
    %41 = vector.extract_strided_slice %16 {offsets = [84, 0], sizes = [7, 32], strides = [1, 1]} : vector<196x32xf32> to vector<7x32xf32>
    %c41 = arith.constant 41 : index
    %c0_32 = arith.constant 0 : index
    %42 = vector.load %arg12[%c41, %c0_32] : memref<80x32xf32, #tpu.memory_space<vmem>>, vector<7x32xf32>
    tpu.vector_store %arg12[%c41, %c0_32], %41 {strides = array<i32>} : memref<80x32xf32, #tpu.memory_space<vmem>>, vector<7x32xf32>,
    %43 = vector.extract_strided_slice %16 {offsets = [91, 0], sizes = [7, 32], strides = [1, 1]} : vector<196x32xf32> to vector<7x32xf32>
    %c49 = arith.constant 49 : index
    %c0_33 = arith.constant 0 : index
    %44 = vector.load %arg12[%c49, %c0_33] : memref<80x32xf32, #tpu.memory_space<vmem>>, vector<7x32xf32>
    tpu.vector_store %arg12[%c49, %c0_33], %43 {strides = array<i32>} : memref<80x32xf32, #tpu.memory_space<vmem>>, vector<7x32xf32>,
    %45 = vector.extract_strided_slice %16 {offsets = [98, 0], sizes = [7, 32], strides = [1, 1]} : vector<196x32xf32> to vector<7x32xf32>
    %c8_34 = arith.constant 8 : index
    %c0_35 = arith.constant 0 : index
    %46 = vector.load %arg13[%c8_34, %c0_35] : memref<80x32xf32, #tpu.memory_space<vmem>>, vector<7x32xf32>
    tpu.vector_store %arg13[%c8_34, %c0_35], %45 {strides = array<i32>} : memref<80x32xf32, #tpu.memory_space<vmem>>, vector<7x32xf32>,
    %47 = vector.extract_strided_slice %16 {offsets = [105, 0], sizes = [7, 32], strides = [1, 1]} : vector<196x32xf32> to vector<7x32xf32>
    %c16_36 = arith.constant 16 : index
    %c0_37 = arith.constant 0 : index
    %48 = vector.load %arg13[%c16_36, %c0_37] : memref<80x32xf32, #tpu.memory_space<vmem>>, vector<7x32xf32>
    tpu.vector_store %arg13[%c16_36, %c0_37], %47 {strides = array<i32>} : memref<80x32xf32, #tpu.memory_space<vmem>>, vector<7x32xf32>,
    %49 = vector.extract_strided_slice %16 {offsets = [112, 0], sizes = [7, 32], strides = [1, 1]} : vector<196x32xf32> to vector<7x32xf32>
    %c24_38 = arith.constant 24 : index
    %c0_39 = arith.constant 0 : index
    %50 = vector.load %arg13[%c24_38, %c0_39] : memref<80x32xf32, #tpu.memory_space<vmem>>, vector<7x32xf32>
    tpu.vector_store %arg13[%c24_38, %c0_39], %49 {strides = array<i32>} : memref<80x32xf32, #tpu.memory_space<vmem>>, vector<7x32xf32>,
    %51 = vector.extract_strided_slice %16 {offsets = [119, 0], sizes = [7, 32], strides = [1, 1]} : vector<196x32xf32> to vector<7x32xf32>
    %c32_40 = arith.constant 32 : index
    %c0_41 = arith.constant 0 : index
    %52 = vector.load %arg13[%c32_40, %c0_41] : memref<80x32xf32, #tpu.memory_space<vmem>>, vector<7x32xf32>
    tpu.vector_store %arg13[%c32_40, %c0_41], %51 {strides = array<i32>} : memref<80x32xf32, #tpu.memory_space<vmem>>, vector<7x32xf32>,
    %53 = vector.extract_strided_slice %16 {offsets = [126, 0], sizes = [7, 32], strides = [1, 1]} : vector<196x32xf32> to vector<7x32xf32>
    %c40_42 = arith.constant 40 : index
    %c0_43 = arith.constant 0 : index
    %54 = vector.load %arg13[%c40_42, %c0_43] : memref<80x32xf32, #tpu.memory_space<vmem>>, vector<7x32xf32>
    tpu.vector_store %arg13[%c40_42, %c0_43], %53 {strides = array<i32>} : memref<80x32xf32, #tpu.memory_space<vmem>>, vector<7x32xf32>,
    %55 = vector.extract_strided_slice %16 {offsets = [133, 0], sizes = [7, 32], strides = [1, 1]} : vector<196x32xf32> to vector<7x32xf32>
    %c48_44 = arith.constant 48 : index
    %c0_45 = arith.constant 0 : index
    %56 = vector.load %arg13[%c48_44, %c0_45] : memref<80x32xf32, #tpu.memory_space<vmem>>, vector<7x32xf32>
    tpu.vector_store %arg13[%c48_44, %c0_45], %55 {strides = array<i32>} : memref<80x32xf32, #tpu.memory_space<vmem>>, vector<7x32xf32>,
    %57 = vector.extract_strided_slice %16 {offsets = [140, 0], sizes = [7, 32], strides = [1, 1]} : vector<196x32xf32> to vector<7x32xf32>
    %c56 = arith.constant 56 : index
    %c0_46 = arith.constant 0 : index
    %58 = vector.load %arg13[%c56, %c0_46] : memref<80x32xf32, #tpu.memory_space<vmem>>, vector<7x32xf32>
    tpu.vector_store %arg13[%c56, %c0_46], %57 {strides = array<i32>} : memref<80x32xf32, #tpu.memory_space<vmem>>, vector<7x32xf32>,
    %59 = vector.extract_strided_slice %16 {offsets = [147, 0], sizes = [7, 32], strides = [1, 1]} : vector<196x32xf32> to vector<7x32xf32>
    %c9_47 = arith.constant 9 : index
    %c0_48 = arith.constant 0 : index
    %60 = vector.load %arg14[%c9_47, %c0_48] : memref<80x32xf32, #tpu.memory_space<vmem>>, vector<7x32xf32>
    tpu.vector_store %arg14[%c9_47, %c0_48], %59 {strides = array<i32>} : memref<80x32xf32, #tpu.memory_space<vmem>>, vector<7x32xf32>,
    %61 = vector.extract_strided_slice %16 {offsets = [154, 0], sizes = [7, 32], strides = [1, 1]} : vector<196x32xf32> to vector<7x32xf32>
    %c17_49 = arith.constant 17 : index
    %c0_50 = arith.constant 0 : index
    %62 = vector.load %arg14[%c17_49, %c0_50] : memref<80x32xf32, #tpu.memory_space<vmem>>, vector<7x32xf32>
    tpu.vector_store %arg14[%c17_49, %c0_50], %61 {strides = array<i32>} : memref<80x32xf32, #tpu.memory_space<vmem>>, vector<7x32xf32>,
    %63 = vector.extract_strided_slice %16 {offsets = [161, 0], sizes = [7, 32], strides = [1, 1]} : vector<196x32xf32> to vector<7x32xf32>
    %c25_51 = arith.constant 25 : index
    %c0_52 = arith.constant 0 : index
    %64 = vector.load %arg14[%c25_51, %c0_52] : memref<80x32xf32, #tpu.memory_space<vmem>>, vector<7x32xf32>
    tpu.vector_store %arg14[%c25_51, %c0_52], %63 {strides = array<i32>} : memref<80x32xf32, #tpu.memory_space<vmem>>, vector<7x32xf32>,
    %65 = vector.extract_strided_slice %16 {offsets = [168, 0], sizes = [7, 32], strides = [1, 1]} : vector<196x32xf32> to vector<7x32xf32>
    %c33_53 = arith.constant 33 : index
    %c0_54 = arith.constant 0 : index
    %66 = vector.load %arg14[%c33_53, %c0_54] : memref<80x32xf32, #tpu.memory_space<vmem>>, vector<7x32xf32>
    tpu.vector_store %arg14[%c33_53, %c0_54], %65 {strides = array<i32>} : memref<80x32xf32, #tpu.memory_space<vmem>>, vector<7x32xf32>,
    %67 = vector.extract_strided_slice %16 {offsets = [175, 0], sizes = [7, 32], strides = [1, 1]} : vector<196x32xf32> to vector<7x32xf32>
    %c41_55 = arith.constant 41 : index
    %c0_56 = arith.constant 0 : index
    %68 = vector.load %arg14[%c41_55, %c0_56] : memref<80x32xf32, #tpu.memory_space<vmem>>, vector<7x32xf32>
    tpu.vector_store %arg14[%c41_55, %c0_56], %67 {strides = array<i32>} : memref<80x32xf32, #tpu.memory_space<vmem>>, vector<7x32xf32>,
    %69 = vector.extract_strided_slice %16 {offsets = [182, 0], sizes = [7, 32], strides = [1, 1]} : vector<196x32xf32> to vector<7x32xf32>
    %c49_57 = arith.constant 49 : index
    %c0_58 = arith.constant 0 : index
    %70 = vector.load %arg14[%c49_57, %c0_58] : memref<80x32xf32, #tpu.memory_space<vmem>>, vector<7x32xf32>
    tpu.vector_store %arg14[%c49_57, %c0_58], %69 {strides = array<i32>} : memref<80x32xf32, #tpu.memory_space<vmem>>, vector<7x32xf32>,
    %71 = vector.extract_strided_slice %16 {offsets = [189, 0], sizes = [7, 32], strides = [1, 1]} : vector<196x32xf32> to vector<7x32xf32>
    %c57 = arith.constant 57 : index
    %c0_59 = arith.constant 0 : index
    %72 = vector.load %arg14[%c57, %c0_59] : memref<80x32xf32, #tpu.memory_space<vmem>>, vector<7x32xf32>
    tpu.vector_store %arg14[%c57, %c0_59], %71 {strides = array<i32>} : memref<80x32xf32, #tpu.memory_space<vmem>>, vector<7x32xf32>,
    %cst_60 = arith.constant 0.000000e+00 : f32
    %73 = vector.broadcast %cst_60 : f32 to vector<64x64xf32>
    %c0_61 = arith.constant 0 : index
    %c0_62 = arith.constant 0 : index
    %74 = vector.load %arg14[%c0_61, %c0_62] : memref<80x32xf32, #tpu.memory_space<vmem>>, vector<64x32xf32>
    %75 = arith.truncf %74 : vector<64x32xf32> to vector<64x32xbf16>
    %c0_63 = arith.constant 0 : index
    %c0_64 = arith.constant 0 : index
    %76 = vector.load %arg4[%c0_63, %c0_64] : memref<512x64xbf16, #tpu.memory_space<vmem>>, vector<32x64xbf16>
    %cst_65 = arith.constant dense<0.000000e+00> : vector<64x64xf32>
    %77 = tpu.matmul %75, %76, %cst_65 {dimension_numbers = #tpu.dot_dimension_numbers<[1], [0], [0], [1], [0, 0, 1, 1], [], []>} : vector<64x32xbf16>, vector<32x64xbf16>, vector<64x64xf32> -> vector<64x64xf32>
    %78 = arith.addf %73, %77 : vector<64x64xf32>
    %c0_66 = arith.constant 0 : index
    %c0_67 = arith.constant 0 : index
    %79 = vector.load %arg13[%c0_66, %c0_67] : memref<80x32xf32, #tpu.memory_space<vmem>>, vector<64x32xf32>
    %80 = arith.truncf %79 : vector<64x32xf32> to vector<64x32xbf16>
    %c32_68 = arith.constant 32 : index
    %c0_69 = arith.constant 0 : index
    %81 = vector.load %arg4[%c32_68, %c0_69] : memref<512x64xbf16, #tpu.memory_space<vmem>>, vector<32x64xbf16>
    %cst_70 = arith.constant dense<0.000000e+00> : vector<64x64xf32>
    %82 = tpu.matmul %80, %81, %cst_70 {dimension_numbers = #tpu.dot_dimension_numbers<[1], [0], [0], [1], [0, 0, 1, 1], [], []>} : vector<64x32xbf16>, vector<32x64xbf16>, vector<64x64xf32> -> vector<64x64xf32>
    %83 = arith.addf %78, %82 : vector<64x64xf32>
    %c1_71 = arith.constant 1 : index
    %c0_72 = arith.constant 0 : index
    %84 = vector.load %arg14[%c1_71, %c0_72] : memref<80x32xf32, #tpu.memory_space<vmem>>, vector<64x32xf32>
    %85 = arith.truncf %84 : vector<64x32xf32> to vector<64x32xbf16>
    %c64 = arith.constant 64 : index
    %c0_73 = arith.constant 0 : index
    %86 = vector.load %arg4[%c64, %c0_73] : memref<512x64xbf16, #tpu.memory_space<vmem>>, vector<32x64xbf16>
    %cst_74 = arith.constant dense<0.000000e+00> : vector<64x64xf32>
    %87 = tpu.matmul %85, %86, %cst_74 {dimension_numbers = #tpu.dot_dimension_numbers<[1], [0], [0], [1], [0, 0, 1, 1], [], []>} : vector<64x32xbf16>, vector<32x64xbf16>, vector<64x64xf32> -> vector<64x64xf32>
    %88 = arith.addf %83, %87 : vector<64x64xf32>
    %c1_75 = arith.constant 1 : index
    %c0_76 = arith.constant 0 : index
    %89 = vector.load %arg13[%c1_75, %c0_76] : memref<80x32xf32, #tpu.memory_space<vmem>>, vector<64x32xf32>
    %90 = arith.truncf %89 : vector<64x32xf32> to vector<64x32xbf16>
    %c96 = arith.constant 96 : index
    %c0_77 = arith.constant 0 : index
    %91 = vector.load %arg4[%c96, %c0_77] : memref<512x64xbf16, #tpu.memory_space<vmem>>, vector<32x64xbf16>
    %cst_78 = arith.constant dense<0.000000e+00> : vector<64x64xf32>
    %92 = tpu.matmul %90, %91, %cst_78 {dimension_numbers = #tpu.dot_dimension_numbers<[1], [0], [0], [1], [0, 0, 1, 1], [], []>} : vector<64x32xbf16>, vector<32x64xbf16>, vector<64x64xf32> -> vector<64x64xf32>
    %93 = arith.addf %88, %92 : vector<64x64xf32>
    %c0_79 = arith.constant 0 : index
    %c0_80 = arith.constant 0 : index
    %94 = vector.load %arg12[%c0_79, %c0_80] : memref<80x32xf32, #tpu.memory_space<vmem>>, vector<64x32xf32>
    %95 = arith.truncf %94 : vector<64x32xf32> to vector<64x32xbf16>
    %c128 = arith.constant 128 : index
    %c0_81 = arith.constant 0 : index
    %96 = vector.load %arg4[%c128, %c0_81] : memref<512x64xbf16, #tpu.memory_space<vmem>>, vector<32x64xbf16>
    %cst_82 = arith.constant dense<0.000000e+00> : vector<64x64xf32>
    %97 = tpu.matmul %95, %96, %cst_82 {dimension_numbers = #tpu.dot_dimension_numbers<[1], [0], [0], [1], [0, 0, 1, 1], [], []>} : vector<64x32xbf16>, vector<32x64xbf16>, vector<64x64xf32> -> vector<64x64xf32>
    %98 = arith.addf %93, %97 : vector<64x64xf32>
    %c0_83 = arith.constant 0 : index
    %c0_84 = arith.constant 0 : index
    %99 = vector.load %arg11[%c0_83, %c0_84] : memref<80x32xf32, #tpu.memory_space<vmem>>, vector<64x32xf32>
    %100 = arith.truncf %99 : vector<64x32xf32> to vector<64x32xbf16>
    %c160 = arith.constant 160 : index
    %c0_85 = arith.constant 0 : index
    %101 = vector.load %arg4[%c160, %c0_85] : memref<512x64xbf16, #tpu.memory_space<vmem>>, vector<32x64xbf16>
    %cst_86 = arith.constant dense<0.000000e+00> : vector<64x64xf32>
    %102 = tpu.matmul %100, %101, %cst_86 {dimension_numbers = #tpu.dot_dimension_numbers<[1], [0], [0], [1], [0, 0, 1, 1], [], []>} : vector<64x32xbf16>, vector<32x64xbf16>, vector<64x64xf32> -> vector<64x64xf32>
    %103 = arith.addf %98, %102 : vector<64x64xf32>
    %c1_87 = arith.constant 1 : index
    %c0_88 = arith.constant 0 : index
    %104 = vector.load %arg12[%c1_87, %c0_88] : memref<80x32xf32, #tpu.memory_space<vmem>>, vector<64x32xf32>
    %105 = arith.truncf %104 : vector<64x32xf32> to vector<64x32xbf16>
    %c192 = arith.constant 192 : index
    %c0_89 = arith.constant 0 : index
    %106 = vector.load %arg4[%c192, %c0_89] : memref<512x64xbf16, #tpu.memory_space<vmem>>, vector<32x64xbf16>
    %cst_90 = arith.constant dense<0.000000e+00> : vector<64x64xf32>
    %107 = tpu.matmul %105, %106, %cst_90 {dimension_numbers = #tpu.dot_dimension_numbers<[1], [0], [0], [1], [0, 0, 1, 1], [], []>} : vector<64x32xbf16>, vector<32x64xbf16>, vector<64x64xf32> -> vector<64x64xf32>
    %108 = arith.addf %103, %107 : vector<64x64xf32>
    %c1_91 = arith.constant 1 : index
    %c0_92 = arith.constant 0 : index
    %109 = vector.load %arg11[%c1_91, %c0_92] : memref<80x32xf32, #tpu.memory_space<vmem>>, vector<64x32xf32>
    %110 = arith.truncf %109 : vector<64x32xf32> to vector<64x32xbf16>
    %c224 = arith.constant 224 : index
    %c0_93 = arith.constant 0 : index
    %111 = vector.load %arg4[%c224, %c0_93] : memref<512x64xbf16, #tpu.memory_space<vmem>>, vector<32x64xbf16>
    %cst_94 = arith.constant dense<0.000000e+00> : vector<64x64xf32>
    %112 = tpu.matmul %110, %111, %cst_94 {dimension_numbers = #tpu.dot_dimension_numbers<[1], [0], [0], [1], [0, 0, 1, 1], [], []>} : vector<64x32xbf16>, vector<32x64xbf16>, vector<64x64xf32> -> vector<64x64xf32>
    %113 = arith.addf %108, %112 : vector<64x64xf32>
    %c8_95 = arith.constant 8 : index
    %c0_96 = arith.constant 0 : index
    %114 = vector.load %arg14[%c8_95, %c0_96] : memref<80x32xf32, #tpu.memory_space<vmem>>, vector<64x32xf32>
    %115 = arith.truncf %114 : vector<64x32xf32> to vector<64x32xbf16>
    %c256 = arith.constant 256 : index
    %c0_97 = arith.constant 0 : index
    %116 = vector.load %arg4[%c256, %c0_97] : memref<512x64xbf16, #tpu.memory_space<vmem>>, vector<32x64xbf16>
    %cst_98 = arith.constant dense<0.000000e+00> : vector<64x64xf32>
    %117 = tpu.matmul %115, %116, %cst_98 {dimension_numbers = #tpu.dot_dimension_numbers<[1], [0], [0], [1], [0, 0, 1, 1], [], []>} : vector<64x32xbf16>, vector<32x64xbf16>, vector<64x64xf32> -> vector<64x64xf32>
    %118 = arith.addf %113, %117 : vector<64x64xf32>
    %c8_99 = arith.constant 8 : index
    %c0_100 = arith.constant 0 : index
    %119 = vector.load %arg13[%c8_99, %c0_100] : memref<80x32xf32, #tpu.memory_space<vmem>>, vector<64x32xf32>
    %120 = arith.truncf %119 : vector<64x32xf32> to vector<64x32xbf16>
    %c288 = arith.constant 288 : index
    %c0_101 = arith.constant 0 : index
    %121 = vector.load %arg4[%c288, %c0_101] : memref<512x64xbf16, #tpu.memory_space<vmem>>, vector<32x64xbf16>
    %cst_102 = arith.constant dense<0.000000e+00> : vector<64x64xf32>
    %122 = tpu.matmul %120, %121, %cst_102 {dimension_numbers = #tpu.dot_dimension_numbers<[1], [0], [0], [1], [0, 0, 1, 1], [], []>} : vector<64x32xbf16>, vector<32x64xbf16>, vector<64x64xf32> -> vector<64x64xf32>
    %123 = arith.addf %118, %122 : vector<64x64xf32>
    %c9_103 = arith.constant 9 : index
    %c0_104 = arith.constant 0 : index
    %124 = vector.load %arg14[%c9_103, %c0_104] : memref<80x32xf32, #tpu.memory_space<vmem>>, vector<64x32xf32>
    %125 = arith.truncf %124 : vector<64x32xf32> to vector<64x32xbf16>
    %c320 = arith.constant 320 : index
    %c0_105 = arith.constant 0 : index
    %126 = vector.load %arg4[%c320, %c0_105] : memref<512x64xbf16, #tpu.memory_space<vmem>>, vector<32x64xbf16>
    %cst_106 = arith.constant dense<0.000000e+00> : vector<64x64xf32>
    %127 = tpu.matmul %125, %126, %cst_106 {dimension_numbers = #tpu.dot_dimension_numbers<[1], [0], [0], [1], [0, 0, 1, 1], [], []>} : vector<64x32xbf16>, vector<32x64xbf16>, vector<64x64xf32> -> vector<64x64xf32>
    %128 = arith.addf %123, %127 : vector<64x64xf32>
    %c9_107 = arith.constant 9 : index
    %c0_108 = arith.constant 0 : index
    %129 = vector.load %arg13[%c9_107, %c0_108] : memref<80x32xf32, #tpu.memory_space<vmem>>, vector<64x32xf32>
    %130 = arith.truncf %129 : vector<64x32xf32> to vector<64x32xbf16>
    %c352 = arith.constant 352 : index
    %c0_109 = arith.constant 0 : index
    %131 = vector.load %arg4[%c352, %c0_109] : memref<512x64xbf16, #tpu.memory_space<vmem>>, vector<32x64xbf16>
    %cst_110 = arith.constant dense<0.000000e+00> : vector<64x64xf32>
    %132 = tpu.matmul %130, %131, %cst_110 {dimension_numbers = #tpu.dot_dimension_numbers<[1], [0], [0], [1], [0, 0, 1, 1], [], []>} : vector<64x32xbf16>, vector<32x64xbf16>, vector<64x64xf32> -> vector<64x64xf32>
    %133 = arith.addf %128, %132 : vector<64x64xf32>
    %c8_111 = arith.constant 8 : index
    %c0_112 = arith.constant 0 : index
    %134 = vector.load %arg12[%c8_111, %c0_112] : memref<80x32xf32, #tpu.memory_space<vmem>>, vector<64x32xf32>
    %135 = arith.truncf %134 : vector<64x32xf32> to vector<64x32xbf16>
    %c384 = arith.constant 384 : index
    %c0_113 = arith.constant 0 : index
    %136 = vector.load %arg4[%c384, %c0_113] : memref<512x64xbf16, #tpu.memory_space<vmem>>, vector<32x64xbf16>
    %cst_114 = arith.constant dense<0.000000e+00> : vector<64x64xf32>
    %137 = tpu.matmul %135, %136, %cst_114 {dimension_numbers = #tpu.dot_dimension_numbers<[1], [0], [0], [1], [0, 0, 1, 1], [], []>} : vector<64x32xbf16>, vector<32x64xbf16>, vector<64x64xf32> -> vector<64x64xf32>
    %138 = arith.addf %133, %137 : vector<64x64xf32>
    %c8_115 = arith.constant 8 : index
    %c0_116 = arith.constant 0 : index
    %139 = vector.load %arg11[%c8_115, %c0_116] : memref<80x32xf32, #tpu.memory_space<vmem>>, vector<64x32xf32>
    %140 = arith.truncf %139 : vector<64x32xf32> to vector<64x32xbf16>
    %c416 = arith.constant 416 : index
    %c0_117 = arith.constant 0 : index
    %141 = vector.load %arg4[%c416, %c0_117] : memref<512x64xbf16, #tpu.memory_space<vmem>>, vector<32x64xbf16>
    %cst_118 = arith.constant dense<0.000000e+00> : vector<64x64xf32>
    %142 = tpu.matmul %140, %141, %cst_118 {dimension_numbers = #tpu.dot_dimension_numbers<[1], [0], [0], [1], [0, 0, 1, 1], [], []>} : vector<64x32xbf16>, vector<32x64xbf16>, vector<64x64xf32> -> vector<64x64xf32>
    %143 = arith.addf %138, %142 : vector<64x64xf32>
    %c9_119 = arith.constant 9 : index
    %c0_120 = arith.constant 0 : index
    %144 = vector.load %arg12[%c9_119, %c0_120] : memref<80x32xf32, #tpu.memory_space<vmem>>, vector<64x32xf32>
    %145 = arith.truncf %144 : vector<64x32xf32> to vector<64x32xbf16>
    %c448 = arith.constant 448 : index
    %c0_121 = arith.constant 0 : index
    %146 = vector.load %arg4[%c448, %c0_121] : memref<512x64xbf16, #tpu.memory_space<vmem>>, vector<32x64xbf16>
    %cst_122 = arith.constant dense<0.000000e+00> : vector<64x64xf32>
    %147 = tpu.matmul %145, %146, %cst_122 {dimension_numbers = #tpu.dot_dimension_numbers<[1], [0], [0], [1], [0, 0, 1, 1], [], []>} : vector<64x32xbf16>, vector<32x64xbf16>, vector<64x64xf32> -> vector<64x64xf32>
    %148 = arith.addf %143, %147 : vector<64x64xf32>
    %c9_123 = arith.constant 9 : index
    %c0_124 = arith.constant 0 : index
    %149 = vector.load %arg11[%c9_123, %c0_124] : memref<80x32xf32, #tpu.memory_space<vmem>>, vector<64x32xf32>
    %150 = arith.truncf %149 : vector<64x32xf32> to vector<64x32xbf16>
    %c480 = arith.constant 480 : index
    %c0_125 = arith.constant 0 : index
    %151 = vector.load %arg4[%c480, %c0_125] : memref<512x64xbf16, #tpu.memory_space<vmem>>, vector<32x64xbf16>
    %cst_126 = arith.constant dense<0.000000e+00> : vector<64x64xf32>
    %152 = tpu.matmul %150, %151, %cst_126 {dimension_numbers = #tpu.dot_dimension_numbers<[1], [0], [0], [1], [0, 0, 1, 1], [], []>} : vector<64x32xbf16>, vector<32x64xbf16>, vector<64x64xf32> -> vector<64x64xf32>
    %153 = arith.addf %148, %152 : vector<64x64xf32>
    %c0_127 = arith.constant 0 : index
    %c0_128 = arith.constant 0 : index
    %154 = vector.load %arg5[%c0_127, %c0_128] : memref<1x64xf32, #tpu.memory_space<vmem>>, vector<1x64xf32>
    %155 = vector.broadcast %154 : vector<1x64xf32> to vector<64x64xf32>
    %156 = arith.addf %153, %155 : vector<64x64xf32>
    %cst_129 = arith.constant 0.000000e+00 : f32
    %157 = vector.broadcast %cst_129 : f32 to vector<64x64xf32>
    %158 = arith.maximumf %156, %157 : vector<64x64xf32>
    %159 = vector.extract_strided_slice %158 {offsets = [0, 0], sizes = [1, 64], strides = [1, 1]} : vector<64x64xf32> to vector<1x64xf32>
    %c0_130 = arith.constant 0 : index
    %c0_131 = arith.constant 0 : index
    %160 = vector.load %arg15[%c0_130, %c0_131] : memref<1x4096xf32, #tpu.memory_space<vmem>>, vector<1x64xf32>
    tpu.vector_store %arg15[%c0_130, %c0_131], %159 {strides = array<i32>} : memref<1x4096xf32, #tpu.memory_space<vmem>>, vector<1x64xf32>,
    %161 = vector.extract_strided_slice %158 {offsets = [1, 0], sizes = [1, 64], strides = [1, 1]} : vector<64x64xf32> to vector<1x64xf32>
    %c0_132 = arith.constant 0 : index
    %c64_133 = arith.constant 64 : index
    %162 = vector.load %arg15[%c0_132, %c64_133] : memref<1x4096xf32, #tpu.memory_space<vmem>>, vector<1x64xf32>
    tpu.vector_store %arg15[%c0_132, %c64_133], %161 {strides = array<i32>} : memref<1x4096xf32, #tpu.memory_space<vmem>>, vector<1x64xf32>,
    %163 = vector.extract_strided_slice %158 {offsets = [2, 0], sizes = [1, 64], strides = [1, 1]} : vector<64x64xf32> to vector<1x64xf32>
    %c0_134 = arith.constant 0 : index
    %c128_135 = arith.constant 128 : index
    %164 = vector.load %arg15[%c0_134, %c128_135] : memref<1x4096xf32, #tpu.memory_space<vmem>>, vector<1x64xf32>
    tpu.vector_store %arg15[%c0_134, %c128_135], %163 {strides = array<i32>} : memref<1x4096xf32, #tpu.memory_space<vmem>>, vector<1x64xf32>,
    %165 = vector.extract_strided_slice %158 {offsets = [3, 0], sizes = [1, 64], strides = [1, 1]} : vector<64x64xf32> to vector<1x64xf32>
    %c0_136 = arith.constant 0 : index
    %c192_137 = arith.constant 192 : index
    %166 = vector.load %arg15[%c0_136, %c192_137] : memref<1x4096xf32, #tpu.memory_space<vmem>>, vector<1x64xf32>
    tpu.vector_store %arg15[%c0_136, %c192_137], %165 {strides = array<i32>} : memref<1x4096xf32, #tpu.memory_space<vmem>>, vector<1x64xf32>,
    %167 = vector.extract_strided_slice %158 {offsets = [4, 0], sizes = [1, 64], strides = [1, 1]} : vector<64x64xf32> to vector<1x64xf32>
    %c0_138 = arith.constant 0 : index
    %c256_139 = arith.constant 256 : index
    %168 = vector.load %arg15[%c0_138, %c256_139] : memref<1x4096xf32, #tpu.memory_space<vmem>>, vector<1x64xf32>
    tpu.vector_store %arg15[%c0_138, %c256_139], %167 {strides = array<i32>} : memref<1x4096xf32, #tpu.memory_space<vmem>>, vector<1x64xf32>,
    %169 = vector.extract_strided_slice %158 {offsets = [5, 0], sizes = [1, 64], strides = [1, 1]} : vector<64x64xf32> to vector<1x64xf32>
    %c0_140 = arith.constant 0 : index
    %c320_141 = arith.constant 320 : index
    %170 = vector.load %arg15[%c0_140, %c320_141] : memref<1x4096xf32, #tpu.memory_space<vmem>>, vector<1x64xf32>
    tpu.vector_store %arg15[%c0_140, %c320_141], %169 {strides = array<i32>} : memref<1x4096xf32, #tpu.memory_space<vmem>>, vector<1x64xf32>,
    %171 = vector.extract_strided_slice %158 {offsets = [6, 0], sizes = [1, 64], strides = [1, 1]} : vector<64x64xf32> to vector<1x64xf32>
    %c0_142 = arith.constant 0 : index
    %c384_143 = arith.constant 384 : index
    %172 = vector.load %arg15[%c0_142, %c384_143] : memref<1x4096xf32, #tpu.memory_space<vmem>>, vector<1x64xf32>
    tpu.vector_store %arg15[%c0_142, %c384_143], %171 {strides = array<i32>} : memref<1x4096xf32, #tpu.memory_space<vmem>>, vector<1x64xf32>,
    %173 = vector.extract_strided_slice %158 {offsets = [7, 0], sizes = [1, 64], strides = [1, 1]} : vector<64x64xf32> to vector<1x64xf32>
    %c0_144 = arith.constant 0 : index
    %c448_145 = arith.constant 448 : index
    %174 = vector.load %arg15[%c0_144, %c448_145] : memref<1x4096xf32, #tpu.memory_space<vmem>>, vector<1x64xf32>
    tpu.vector_store %arg15[%c0_144, %c448_145], %173 {strides = array<i32>} : memref<1x4096xf32, #tpu.memory_space<vmem>>, vector<1x64xf32>,
    %175 = vector.extract_strided_slice %158 {offsets = [8, 0], sizes = [1, 64], strides = [1, 1]} : vector<64x64xf32> to vector<1x64xf32>
    %c0_146 = arith.constant 0 : index
    %c512 = arith.constant 512 : index
    %176 = vector.load %arg15[%c0_146, %c512] : memref<1x4096xf32, #tpu.memory_space<vmem>>, vector<1x64xf32>
    tpu.vector_store %arg15[%c0_146, %c512], %175 {strides = array<i32>} : memref<1x4096xf32, #tpu.memory_space<vmem>>, vector<1x64xf32>,
    %177 = vector.extract_strided_slice %158 {offsets = [9, 0], sizes = [1, 64], strides = [1, 1]} : vector<64x64xf32> to vector<1x64xf32>
    %c0_147 = arith.constant 0 : index
    %c576 = arith.constant 576 : index
    %178 = vector.load %arg15[%c0_147, %c576] : memref<1x4096xf32, #tpu.memory_space<vmem>>, vector<1x64xf32>
    tpu.vector_store %arg15[%c0_147, %c576], %177 {strides = array<i32>} : memref<1x4096xf32, #tpu.memory_space<vmem>>, vector<1x64xf32>,
    %179 = vector.extract_strided_slice %158 {offsets = [10, 0], sizes = [1, 64], strides = [1, 1]} : vector<64x64xf32> to vector<1x64xf32>
    %c0_148 = arith.constant 0 : index
    %c640 = arith.constant 640 : index
    %180 = vector.load %arg15[%c0_148, %c640] : memref<1x4096xf32, #tpu.memory_space<vmem>>, vector<1x64xf32>
    tpu.vector_store %arg15[%c0_148, %c640], %179 {strides = array<i32>} : memref<1x4096xf32, #tpu.memory_space<vmem>>, vector<1x64xf32>,
    %181 = vector.extract_strided_slice %158 {offsets = [11, 0], sizes = [1, 64], strides = [1, 1]} : vector<64x64xf32> to vector<1x64xf32>
    %c0_149 = arith.constant 0 : index
    %c704 = arith.constant 704 : index
    %182 = vector.load %arg15[%c0_149, %c704] : memref<1x4096xf32, #tpu.memory_space<vmem>>, vector<1x64xf32>
    tpu.vector_store %arg15[%c0_149, %c704], %181 {strides = array<i32>} : memref<1x4096xf32, #tpu.memory_space<vmem>>, vector<1x64xf32>,
    %183 = vector.extract_strided_slice %158 {offsets = [12, 0], sizes = [1, 64], strides = [1, 1]} : vector<64x64xf32> to vector<1x64xf32>
    %c0_150 = arith.constant 0 : index
    %c768 = arith.constant 768 : index
    %184 = vector.load %arg15[%c0_150, %c768] : memref<1x4096xf32, #tpu.memory_space<vmem>>, vector<1x64xf32>
    tpu.vector_store %arg15[%c0_150, %c768], %183 {strides = array<i32>} : memref<1x4096xf32, #tpu.memory_space<vmem>>, vector<1x64xf32>,
    %185 = vector.extract_strided_slice %158 {offsets = [13, 0], sizes = [1, 64], strides = [1, 1]} : vector<64x64xf32> to vector<1x64xf32>
    %c0_151 = arith.constant 0 : index
    %c832 = arith.constant 832 : index
    %186 = vector.load %arg15[%c0_151, %c832] : memref<1x4096xf32, #tpu.memory_space<vmem>>, vector<1x64xf32>
    tpu.vector_store %arg15[%c0_151, %c832], %185 {strides = array<i32>} : memref<1x4096xf32, #tpu.memory_space<vmem>>, vector<1x64xf32>,
    %187 = vector.extract_strided_slice %158 {offsets = [14, 0], sizes = [1, 64], strides = [1, 1]} : vector<64x64xf32> to vector<1x64xf32>
    %c0_152 = arith.constant 0 : index
    %c896 = arith.constant 896 : index
    %188 = vector.load %arg15[%c0_152, %c896] : memref<1x4096xf32, #tpu.memory_space<vmem>>, vector<1x64xf32>
    tpu.vector_store %arg15[%c0_152, %c896], %187 {strides = array<i32>} : memref<1x4096xf32, #tpu.memory_space<vmem>>, vector<1x64xf32>,
    %189 = vector.extract_strided_slice %158 {offsets = [15, 0], sizes = [1, 64], strides = [1, 1]} : vector<64x64xf32> to vector<1x64xf32>
    %c0_153 = arith.constant 0 : index
    %c960 = arith.constant 960 : index
    %190 = vector.load %arg15[%c0_153, %c960] : memref<1x4096xf32, #tpu.memory_space<vmem>>, vector<1x64xf32>
    tpu.vector_store %arg15[%c0_153, %c960], %189 {strides = array<i32>} : memref<1x4096xf32, #tpu.memory_space<vmem>>, vector<1x64xf32>,
    %191 = vector.extract_strided_slice %158 {offsets = [16, 0], sizes = [1, 64], strides = [1, 1]} : vector<64x64xf32> to vector<1x64xf32>
    %c0_154 = arith.constant 0 : index
    %c1024 = arith.constant 1024 : index
    %192 = vector.load %arg15[%c0_154, %c1024] : memref<1x4096xf32, #tpu.memory_space<vmem>>, vector<1x64xf32>
    tpu.vector_store %arg15[%c0_154, %c1024], %191 {strides = array<i32>} : memref<1x4096xf32, #tpu.memory_space<vmem>>, vector<1x64xf32>,
    %193 = vector.extract_strided_slice %158 {offsets = [17, 0], sizes = [1, 64], strides = [1, 1]} : vector<64x64xf32> to vector<1x64xf32>
    %c0_155 = arith.constant 0 : index
    %c1088 = arith.constant 1088 : index
    %194 = vector.load %arg15[%c0_155, %c1088] : memref<1x4096xf32, #tpu.memory_space<vmem>>, vector<1x64xf32>
    tpu.vector_store %arg15[%c0_155, %c1088], %193 {strides = array<i32>} : memref<1x4096xf32, #tpu.memory_space<vmem>>, vector<1x64xf32>,
    %195 = vector.extract_strided_slice %158 {offsets = [18, 0], sizes = [1, 64], strides = [1, 1]} : vector<64x64xf32> to vector<1x64xf32>
    %c0_156 = arith.constant 0 : index
    %c1152 = arith.constant 1152 : index
    %196 = vector.load %arg15[%c0_156, %c1152] : memref<1x4096xf32, #tpu.memory_space<vmem>>, vector<1x64xf32>
    tpu.vector_store %arg15[%c0_156, %c1152], %195 {strides = array<i32>} : memref<1x4096xf32, #tpu.memory_space<vmem>>, vector<1x64xf32>,
    %197 = vector.extract_strided_slice %158 {offsets = [19, 0], sizes = [1, 64], strides = [1, 1]} : vector<64x64xf32> to vector<1x64xf32>
    %c0_157 = arith.constant 0 : index
    %c1216 = arith.constant 1216 : index
    %198 = vector.load %arg15[%c0_157, %c1216] : memref<1x4096xf32, #tpu.memory_space<vmem>>, vector<1x64xf32>
    tpu.vector_store %arg15[%c0_157, %c1216], %197 {strides = array<i32>} : memref<1x4096xf32, #tpu.memory_space<vmem>>, vector<1x64xf32>,
    %199 = vector.extract_strided_slice %158 {offsets = [20, 0], sizes = [1, 64], strides = [1, 1]} : vector<64x64xf32> to vector<1x64xf32>
    %c0_158 = arith.constant 0 : index
    %c1280 = arith.constant 1280 : index
    %200 = vector.load %arg15[%c0_158, %c1280] : memref<1x4096xf32, #tpu.memory_space<vmem>>, vector<1x64xf32>
    tpu.vector_store %arg15[%c0_158, %c1280], %199 {strides = array<i32>} : memref<1x4096xf32, #tpu.memory_space<vmem>>, vector<1x64xf32>,
    %201 = vector.extract_strided_slice %158 {offsets = [21, 0], sizes = [1, 64], strides = [1, 1]} : vector<64x64xf32> to vector<1x64xf32>
    %c0_159 = arith.constant 0 : index
    %c1344 = arith.constant 1344 : index
    %202 = vector.load %arg15[%c0_159, %c1344] : memref<1x4096xf32, #tpu.memory_space<vmem>>, vector<1x64xf32>
    tpu.vector_store %arg15[%c0_159, %c1344], %201 {strides = array<i32>} : memref<1x4096xf32, #tpu.memory_space<vmem>>, vector<1x64xf32>,
    %203 = vector.extract_strided_slice %158 {offsets = [22, 0], sizes = [1, 64], strides = [1, 1]} : vector<64x64xf32> to vector<1x64xf32>
    %c0_160 = arith.constant 0 : index
    %c1408 = arith.constant 1408 : index
    %204 = vector.load %arg15[%c0_160, %c1408] : memref<1x4096xf32, #tpu.memory_space<vmem>>, vector<1x64xf32>
    tpu.vector_store %arg15[%c0_160, %c1408], %203 {strides = array<i32>} : memref<1x4096xf32, #tpu.memory_space<vmem>>, vector<1x64xf32>,
    %205 = vector.extract_strided_slice %158 {offsets = [23, 0], sizes = [1, 64], strides = [1, 1]} : vector<64x64xf32> to vector<1x64xf32>
    %c0_161 = arith.constant 0 : index
    %c1472 = arith.constant 1472 : index
    %206 = vector.load %arg15[%c0_161, %c1472] : memref<1x4096xf32, #tpu.memory_space<vmem>>, vector<1x64xf32>
    tpu.vector_store %arg15[%c0_161, %c1472], %205 {strides = array<i32>} : memref<1x4096xf32, #tpu.memory_space<vmem>>, vector<1x64xf32>,
    %207 = vector.extract_strided_slice %158 {offsets = [24, 0], sizes = [1, 64], strides = [1, 1]} : vector<64x64xf32> to vector<1x64xf32>
    %c0_162 = arith.constant 0 : index
    %c1536 = arith.constant 1536 : index
    %208 = vector.load %arg15[%c0_162, %c1536] : memref<1x4096xf32, #tpu.memory_space<vmem>>, vector<1x64xf32>
    tpu.vector_store %arg15[%c0_162, %c1536], %207 {strides = array<i32>} : memref<1x4096xf32, #tpu.memory_space<vmem>>, vector<1x64xf32>,
    %209 = vector.extract_strided_slice %158 {offsets = [25, 0], sizes = [1, 64], strides = [1, 1]} : vector<64x64xf32> to vector<1x64xf32>
    %c0_163 = arith.constant 0 : index
    %c1600 = arith.constant 1600 : index
    %210 = vector.load %arg15[%c0_163, %c1600] : memref<1x4096xf32, #tpu.memory_space<vmem>>, vector<1x64xf32>
    tpu.vector_store %arg15[%c0_163, %c1600], %209 {strides = array<i32>} : memref<1x4096xf32, #tpu.memory_space<vmem>>, vector<1x64xf32>,
    %211 = vector.extract_strided_slice %158 {offsets = [26, 0], sizes = [1, 64], strides = [1, 1]} : vector<64x64xf32> to vector<1x64xf32>
    %c0_164 = arith.constant 0 : index
    %c1664 = arith.constant 1664 : index
    %212 = vector.load %arg15[%c0_164, %c1664] : memref<1x4096xf32, #tpu.memory_space<vmem>>, vector<1x64xf32>
    tpu.vector_store %arg15[%c0_164, %c1664], %211 {strides = array<i32>} : memref<1x4096xf32, #tpu.memory_space<vmem>>, vector<1x64xf32>,
    %213 = vector.extract_strided_slice %158 {offsets = [27, 0], sizes = [1, 64], strides = [1, 1]} : vector<64x64xf32> to vector<1x64xf32>
    %c0_165 = arith.constant 0 : index
    %c1728 = arith.constant 1728 : index
    %214 = vector.load %arg15[%c0_165, %c1728] : memref<1x4096xf32, #tpu.memory_space<vmem>>, vector<1x64xf32>
    tpu.vector_store %arg15[%c0_165, %c1728], %213 {strides = array<i32>} : memref<1x4096xf32, #tpu.memory_space<vmem>>, vector<1x64xf32>,
    %215 = vector.extract_strided_slice %158 {offsets = [28, 0], sizes = [1, 64], strides = [1, 1]} : vector<64x64xf32> to vector<1x64xf32>
    %c0_166 = arith.constant 0 : index
    %c1792 = arith.constant 1792 : index
    %216 = vector.load %arg15[%c0_166, %c1792] : memref<1x4096xf32, #tpu.memory_space<vmem>>, vector<1x64xf32>
    tpu.vector_store %arg15[%c0_166, %c1792], %215 {strides = array<i32>} : memref<1x4096xf32, #tpu.memory_space<vmem>>, vector<1x64xf32>,
    %217 = vector.extract_strided_slice %158 {offsets = [29, 0], sizes = [1, 64], strides = [1, 1]} : vector<64x64xf32> to vector<1x64xf32>
    %c0_167 = arith.constant 0 : index
    %c1856 = arith.constant 1856 : index
    %218 = vector.load %arg15[%c0_167, %c1856] : memref<1x4096xf32, #tpu.memory_space<vmem>>, vector<1x64xf32>
    tpu.vector_store %arg15[%c0_167, %c1856], %217 {strides = array<i32>} : memref<1x4096xf32, #tpu.memory_space<vmem>>, vector<1x64xf32>,
    %219 = vector.extract_strided_slice %158 {offsets = [30, 0], sizes = [1, 64], strides = [1, 1]} : vector<64x64xf32> to vector<1x64xf32>
    %c0_168 = arith.constant 0 : index
    %c1920 = arith.constant 1920 : index
    %220 = vector.load %arg15[%c0_168, %c1920] : memref<1x4096xf32, #tpu.memory_space<vmem>>, vector<1x64xf32>
    tpu.vector_store %arg15[%c0_168, %c1920], %219 {strides = array<i32>} : memref<1x4096xf32, #tpu.memory_space<vmem>>, vector<1x64xf32>,
    %221 = vector.extract_strided_slice %158 {offsets = [31, 0], sizes = [1, 64], strides = [1, 1]} : vector<64x64xf32> to vector<1x64xf32>
    %c0_169 = arith.constant 0 : index
    %c1984 = arith.constant 1984 : index
    %222 = vector.load %arg15[%c0_169, %c1984] : memref<1x4096xf32, #tpu.memory_space<vmem>>, vector<1x64xf32>
    tpu.vector_store %arg15[%c0_169, %c1984], %221 {strides = array<i32>} : memref<1x4096xf32, #tpu.memory_space<vmem>>, vector<1x64xf32>,
    %223 = vector.extract_strided_slice %158 {offsets = [32, 0], sizes = [1, 64], strides = [1, 1]} : vector<64x64xf32> to vector<1x64xf32>
    %c0_170 = arith.constant 0 : index
    %c2048 = arith.constant 2048 : index
    %224 = vector.load %arg15[%c0_170, %c2048] : memref<1x4096xf32, #tpu.memory_space<vmem>>, vector<1x64xf32>
    tpu.vector_store %arg15[%c0_170, %c2048], %223 {strides = array<i32>} : memref<1x4096xf32, #tpu.memory_space<vmem>>, vector<1x64xf32>,
    %225 = vector.extract_strided_slice %158 {offsets = [33, 0], sizes = [1, 64], strides = [1, 1]} : vector<64x64xf32> to vector<1x64xf32>
    %c0_171 = arith.constant 0 : index
    %c2112 = arith.constant 2112 : index
    %226 = vector.load %arg15[%c0_171, %c2112] : memref<1x4096xf32, #tpu.memory_space<vmem>>, vector<1x64xf32>
    tpu.vector_store %arg15[%c0_171, %c2112], %225 {strides = array<i32>} : memref<1x4096xf32, #tpu.memory_space<vmem>>, vector<1x64xf32>,
    %227 = vector.extract_strided_slice %158 {offsets = [34, 0], sizes = [1, 64], strides = [1, 1]} : vector<64x64xf32> to vector<1x64xf32>
    %c0_172 = arith.constant 0 : index
    %c2176 = arith.constant 2176 : index
    %228 = vector.load %arg15[%c0_172, %c2176] : memref<1x4096xf32, #tpu.memory_space<vmem>>, vector<1x64xf32>
    tpu.vector_store %arg15[%c0_172, %c2176], %227 {strides = array<i32>} : memref<1x4096xf32, #tpu.memory_space<vmem>>, vector<1x64xf32>,
    %229 = vector.extract_strided_slice %158 {offsets = [35, 0], sizes = [1, 64], strides = [1, 1]} : vector<64x64xf32> to vector<1x64xf32>
    %c0_173 = arith.constant 0 : index
    %c2240 = arith.constant 2240 : index
    %230 = vector.load %arg15[%c0_173, %c2240] : memref<1x4096xf32, #tpu.memory_space<vmem>>, vector<1x64xf32>
    tpu.vector_store %arg15[%c0_173, %c2240], %229 {strides = array<i32>} : memref<1x4096xf32, #tpu.memory_space<vmem>>, vector<1x64xf32>,
    %231 = vector.extract_strided_slice %158 {offsets = [36, 0], sizes = [1, 64], strides = [1, 1]} : vector<64x64xf32> to vector<1x64xf32>
    %c0_174 = arith.constant 0 : index
    %c2304 = arith.constant 2304 : index
    %232 = vector.load %arg15[%c0_174, %c2304] : memref<1x4096xf32, #tpu.memory_space<vmem>>, vector<1x64xf32>
    tpu.vector_store %arg15[%c0_174, %c2304], %231 {strides = array<i32>} : memref<1x4096xf32, #tpu.memory_space<vmem>>, vector<1x64xf32>,
    %233 = vector.extract_strided_slice %158 {offsets = [37, 0], sizes = [1, 64], strides = [1, 1]} : vector<64x64xf32> to vector<1x64xf32>
    %c0_175 = arith.constant 0 : index
    %c2368 = arith.constant 2368 : index
    %234 = vector.load %arg15[%c0_175, %c2368] : memref<1x4096xf32, #tpu.memory_space<vmem>>, vector<1x64xf32>
    tpu.vector_store %arg15[%c0_175, %c2368], %233 {strides = array<i32>} : memref<1x4096xf32, #tpu.memory_space<vmem>>, vector<1x64xf32>,
    %235 = vector.extract_strided_slice %158 {offsets = [38, 0], sizes = [1, 64], strides = [1, 1]} : vector<64x64xf32> to vector<1x64xf32>
    %c0_176 = arith.constant 0 : index
    %c2432 = arith.constant 2432 : index
    %236 = vector.load %arg15[%c0_176, %c2432] : memref<1x4096xf32, #tpu.memory_space<vmem>>, vector<1x64xf32>
    tpu.vector_store %arg15[%c0_176, %c2432], %235 {strides = array<i32>} : memref<1x4096xf32, #tpu.memory_space<vmem>>, vector<1x64xf32>,
    %237 = vector.extract_strided_slice %158 {offsets = [39, 0], sizes = [1, 64], strides = [1, 1]} : vector<64x64xf32> to vector<1x64xf32>
    %c0_177 = arith.constant 0 : index
    %c2496 = arith.constant 2496 : index
    %238 = vector.load %arg15[%c0_177, %c2496] : memref<1x4096xf32, #tpu.memory_space<vmem>>, vector<1x64xf32>
    tpu.vector_store %arg15[%c0_177, %c2496], %237 {strides = array<i32>} : memref<1x4096xf32, #tpu.memory_space<vmem>>, vector<1x64xf32>,
    %239 = vector.extract_strided_slice %158 {offsets = [40, 0], sizes = [1, 64], strides = [1, 1]} : vector<64x64xf32> to vector<1x64xf32>
    %c0_178 = arith.constant 0 : index
    %c2560 = arith.constant 2560 : index
    %240 = vector.load %arg15[%c0_178, %c2560] : memref<1x4096xf32, #tpu.memory_space<vmem>>, vector<1x64xf32>
    tpu.vector_store %arg15[%c0_178, %c2560], %239 {strides = array<i32>} : memref<1x4096xf32, #tpu.memory_space<vmem>>, vector<1x64xf32>,
    %241 = vector.extract_strided_slice %158 {offsets = [41, 0], sizes = [1, 64], strides = [1, 1]} : vector<64x64xf32> to vector<1x64xf32>
    %c0_179 = arith.constant 0 : index
    %c2624 = arith.constant 2624 : index
    %242 = vector.load %arg15[%c0_179, %c2624] : memref<1x4096xf32, #tpu.memory_space<vmem>>, vector<1x64xf32>
    tpu.vector_store %arg15[%c0_179, %c2624], %241 {strides = array<i32>} : memref<1x4096xf32, #tpu.memory_space<vmem>>, vector<1x64xf32>,
    %243 = vector.extract_strided_slice %158 {offsets = [42, 0], sizes = [1, 64], strides = [1, 1]} : vector<64x64xf32> to vector<1x64xf32>
    %c0_180 = arith.constant 0 : index
    %c2688 = arith.constant 2688 : index
    %244 = vector.load %arg15[%c0_180, %c2688] : memref<1x4096xf32, #tpu.memory_space<vmem>>, vector<1x64xf32>
    tpu.vector_store %arg15[%c0_180, %c2688], %243 {strides = array<i32>} : memref<1x4096xf32, #tpu.memory_space<vmem>>, vector<1x64xf32>,
    %245 = vector.extract_strided_slice %158 {offsets = [43, 0], sizes = [1, 64], strides = [1, 1]} : vector<64x64xf32> to vector<1x64xf32>
    %c0_181 = arith.constant 0 : index
    %c2752 = arith.constant 2752 : index
    %246 = vector.load %arg15[%c0_181, %c2752] : memref<1x4096xf32, #tpu.memory_space<vmem>>, vector<1x64xf32>
    tpu.vector_store %arg15[%c0_181, %c2752], %245 {strides = array<i32>} : memref<1x4096xf32, #tpu.memory_space<vmem>>, vector<1x64xf32>,
    %247 = vector.extract_strided_slice %158 {offsets = [44, 0], sizes = [1, 64], strides = [1, 1]} : vector<64x64xf32> to vector<1x64xf32>
    %c0_182 = arith.constant 0 : index
    %c2816 = arith.constant 2816 : index
    %248 = vector.load %arg15[%c0_182, %c2816] : memref<1x4096xf32, #tpu.memory_space<vmem>>, vector<1x64xf32>
    tpu.vector_store %arg15[%c0_182, %c2816], %247 {strides = array<i32>} : memref<1x4096xf32, #tpu.memory_space<vmem>>, vector<1x64xf32>,
    %249 = vector.extract_strided_slice %158 {offsets = [45, 0], sizes = [1, 64], strides = [1, 1]} : vector<64x64xf32> to vector<1x64xf32>
    %c0_183 = arith.constant 0 : index
    %c2880 = arith.constant 2880 : index
    %250 = vector.load %arg15[%c0_183, %c2880] : memref<1x4096xf32, #tpu.memory_space<vmem>>, vector<1x64xf32>
    tpu.vector_store %arg15[%c0_183, %c2880], %249 {strides = array<i32>} : memref<1x4096xf32, #tpu.memory_space<vmem>>, vector<1x64xf32>,
    %251 = vector.extract_strided_slice %158 {offsets = [46, 0], sizes = [1, 64], strides = [1, 1]} : vector<64x64xf32> to vector<1x64xf32>
    %c0_184 = arith.constant 0 : index
    %c2944 = arith.constant 2944 : index
    %252 = vector.load %arg15[%c0_184, %c2944] : memref<1x4096xf32, #tpu.memory_space<vmem>>, vector<1x64xf32>
    tpu.vector_store %arg15[%c0_184, %c2944], %251 {strides = array<i32>} : memref<1x4096xf32, #tpu.memory_space<vmem>>, vector<1x64xf32>,
    %253 = vector.extract_strided_slice %158 {offsets = [47, 0], sizes = [1, 64], strides = [1, 1]} : vector<64x64xf32> to vector<1x64xf32>
    %c0_185 = arith.constant 0 : index
    %c3008 = arith.constant 3008 : index
    %254 = vector.load %arg15[%c0_185, %c3008] : memref<1x4096xf32, #tpu.memory_space<vmem>>, vector<1x64xf32>
    tpu.vector_store %arg15[%c0_185, %c3008], %253 {strides = array<i32>} : memref<1x4096xf32, #tpu.memory_space<vmem>>, vector<1x64xf32>,
    %255 = vector.extract_strided_slice %158 {offsets = [48, 0], sizes = [1, 64], strides = [1, 1]} : vector<64x64xf32> to vector<1x64xf32>
    %c0_186 = arith.constant 0 : index
    %c3072 = arith.constant 3072 : index
    %256 = vector.load %arg15[%c0_186, %c3072] : memref<1x4096xf32, #tpu.memory_space<vmem>>, vector<1x64xf32>
    tpu.vector_store %arg15[%c0_186, %c3072], %255 {strides = array<i32>} : memref<1x4096xf32, #tpu.memory_space<vmem>>, vector<1x64xf32>,
    %257 = vector.extract_strided_slice %158 {offsets = [49, 0], sizes = [1, 64], strides = [1, 1]} : vector<64x64xf32> to vector<1x64xf32>
    %c0_187 = arith.constant 0 : index
    %c3136 = arith.constant 3136 : index
    %258 = vector.load %arg15[%c0_187, %c3136] : memref<1x4096xf32, #tpu.memory_space<vmem>>, vector<1x64xf32>
    tpu.vector_store %arg15[%c0_187, %c3136], %257 {strides = array<i32>} : memref<1x4096xf32, #tpu.memory_space<vmem>>, vector<1x64xf32>,
    %259 = vector.extract_strided_slice %158 {offsets = [50, 0], sizes = [1, 64], strides = [1, 1]} : vector<64x64xf32> to vector<1x64xf32>
    %c0_188 = arith.constant 0 : index
    %c3200 = arith.constant 3200 : index
    %260 = vector.load %arg15[%c0_188, %c3200] : memref<1x4096xf32, #tpu.memory_space<vmem>>, vector<1x64xf32>
    tpu.vector_store %arg15[%c0_188, %c3200], %259 {strides = array<i32>} : memref<1x4096xf32, #tpu.memory_space<vmem>>, vector<1x64xf32>,
    %261 = vector.extract_strided_slice %158 {offsets = [51, 0], sizes = [1, 64], strides = [1, 1]} : vector<64x64xf32> to vector<1x64xf32>
    %c0_189 = arith.constant 0 : index
    %c3264 = arith.constant 3264 : index
    %262 = vector.load %arg15[%c0_189, %c3264] : memref<1x4096xf32, #tpu.memory_space<vmem>>, vector<1x64xf32>
    tpu.vector_store %arg15[%c0_189, %c3264], %261 {strides = array<i32>} : memref<1x4096xf32, #tpu.memory_space<vmem>>, vector<1x64xf32>,
    %263 = vector.extract_strided_slice %158 {offsets = [52, 0], sizes = [1, 64], strides = [1, 1]} : vector<64x64xf32> to vector<1x64xf32>
    %c0_190 = arith.constant 0 : index
    %c3328 = arith.constant 3328 : index
    %264 = vector.load %arg15[%c0_190, %c3328] : memref<1x4096xf32, #tpu.memory_space<vmem>>, vector<1x64xf32>
    tpu.vector_store %arg15[%c0_190, %c3328], %263 {strides = array<i32>} : memref<1x4096xf32, #tpu.memory_space<vmem>>, vector<1x64xf32>,
    %265 = vector.extract_strided_slice %158 {offsets = [53, 0], sizes = [1, 64], strides = [1, 1]} : vector<64x64xf32> to vector<1x64xf32>
    %c0_191 = arith.constant 0 : index
    %c3392 = arith.constant 3392 : index
    %266 = vector.load %arg15[%c0_191, %c3392] : memref<1x4096xf32, #tpu.memory_space<vmem>>, vector<1x64xf32>
    tpu.vector_store %arg15[%c0_191, %c3392], %265 {strides = array<i32>} : memref<1x4096xf32, #tpu.memory_space<vmem>>, vector<1x64xf32>,
    %267 = vector.extract_strided_slice %158 {offsets = [54, 0], sizes = [1, 64], strides = [1, 1]} : vector<64x64xf32> to vector<1x64xf32>
    %c0_192 = arith.constant 0 : index
    %c3456 = arith.constant 3456 : index
    %268 = vector.load %arg15[%c0_192, %c3456] : memref<1x4096xf32, #tpu.memory_space<vmem>>, vector<1x64xf32>
    tpu.vector_store %arg15[%c0_192, %c3456], %267 {strides = array<i32>} : memref<1x4096xf32, #tpu.memory_space<vmem>>, vector<1x64xf32>,
    %269 = vector.extract_strided_slice %158 {offsets = [55, 0], sizes = [1, 64], strides = [1, 1]} : vector<64x64xf32> to vector<1x64xf32>
    %c0_193 = arith.constant 0 : index
    %c3520 = arith.constant 3520 : index
    %270 = vector.load %arg15[%c0_193, %c3520] : memref<1x4096xf32, #tpu.memory_space<vmem>>, vector<1x64xf32>
    tpu.vector_store %arg15[%c0_193, %c3520], %269 {strides = array<i32>} : memref<1x4096xf32, #tpu.memory_space<vmem>>, vector<1x64xf32>,
    %271 = vector.extract_strided_slice %158 {offsets = [56, 0], sizes = [1, 64], strides = [1, 1]} : vector<64x64xf32> to vector<1x64xf32>
    %c0_194 = arith.constant 0 : index
    %c3584 = arith.constant 3584 : index
    %272 = vector.load %arg15[%c0_194, %c3584] : memref<1x4096xf32, #tpu.memory_space<vmem>>, vector<1x64xf32>
    tpu.vector_store %arg15[%c0_194, %c3584], %271 {strides = array<i32>} : memref<1x4096xf32, #tpu.memory_space<vmem>>, vector<1x64xf32>,
    %273 = vector.extract_strided_slice %158 {offsets = [57, 0], sizes = [1, 64], strides = [1, 1]} : vector<64x64xf32> to vector<1x64xf32>
    %c0_195 = arith.constant 0 : index
    %c3648 = arith.constant 3648 : index
    %274 = vector.load %arg15[%c0_195, %c3648] : memref<1x4096xf32, #tpu.memory_space<vmem>>, vector<1x64xf32>
    tpu.vector_store %arg15[%c0_195, %c3648], %273 {strides = array<i32>} : memref<1x4096xf32, #tpu.memory_space<vmem>>, vector<1x64xf32>,
    %275 = vector.extract_strided_slice %158 {offsets = [58, 0], sizes = [1, 64], strides = [1, 1]} : vector<64x64xf32> to vector<1x64xf32>
    %c0_196 = arith.constant 0 : index
    %c3712 = arith.constant 3712 : index
    %276 = vector.load %arg15[%c0_196, %c3712] : memref<1x4096xf32, #tpu.memory_space<vmem>>, vector<1x64xf32>
    tpu.vector_store %arg15[%c0_196, %c3712], %275 {strides = array<i32>} : memref<1x4096xf32, #tpu.memory_space<vmem>>, vector<1x64xf32>,
    %277 = vector.extract_strided_slice %158 {offsets = [59, 0], sizes = [1, 64], strides = [1, 1]} : vector<64x64xf32> to vector<1x64xf32>
    %c0_197 = arith.constant 0 : index
    %c3776 = arith.constant 3776 : index
    %278 = vector.load %arg15[%c0_197, %c3776] : memref<1x4096xf32, #tpu.memory_space<vmem>>, vector<1x64xf32>
    tpu.vector_store %arg15[%c0_197, %c3776], %277 {strides = array<i32>} : memref<1x4096xf32, #tpu.memory_space<vmem>>, vector<1x64xf32>,
    %279 = vector.extract_strided_slice %158 {offsets = [60, 0], sizes = [1, 64], strides = [1, 1]} : vector<64x64xf32> to vector<1x64xf32>
    %c0_198 = arith.constant 0 : index
    %c3840 = arith.constant 3840 : index
    %280 = vector.load %arg15[%c0_198, %c3840] : memref<1x4096xf32, #tpu.memory_space<vmem>>, vector<1x64xf32>
    tpu.vector_store %arg15[%c0_198, %c3840], %279 {strides = array<i32>} : memref<1x4096xf32, #tpu.memory_space<vmem>>, vector<1x64xf32>,
    %281 = vector.extract_strided_slice %158 {offsets = [61, 0], sizes = [1, 64], strides = [1, 1]} : vector<64x64xf32> to vector<1x64xf32>
    %c0_199 = arith.constant 0 : index
    %c3904 = arith.constant 3904 : index
    %282 = vector.load %arg15[%c0_199, %c3904] : memref<1x4096xf32, #tpu.memory_space<vmem>>, vector<1x64xf32>
    tpu.vector_store %arg15[%c0_199, %c3904], %281 {strides = array<i32>} : memref<1x4096xf32, #tpu.memory_space<vmem>>, vector<1x64xf32>,
    %283 = vector.extract_strided_slice %158 {offsets = [62, 0], sizes = [1, 64], strides = [1, 1]} : vector<64x64xf32> to vector<1x64xf32>
    %c0_200 = arith.constant 0 : index
    %c3968 = arith.constant 3968 : index
    %284 = vector.load %arg15[%c0_200, %c3968] : memref<1x4096xf32, #tpu.memory_space<vmem>>, vector<1x64xf32>
    tpu.vector_store %arg15[%c0_200, %c3968], %283 {strides = array<i32>} : memref<1x4096xf32, #tpu.memory_space<vmem>>, vector<1x64xf32>,
    %285 = vector.extract_strided_slice %158 {offsets = [63, 0], sizes = [1, 64], strides = [1, 1]} : vector<64x64xf32> to vector<1x64xf32>
    %c0_201 = arith.constant 0 : index
    %c4032 = arith.constant 4032 : index
    %286 = vector.load %arg15[%c0_201, %c4032] : memref<1x4096xf32, #tpu.memory_space<vmem>>, vector<1x64xf32>
    tpu.vector_store %arg15[%c0_201, %c4032], %285 {strides = array<i32>} : memref<1x4096xf32, #tpu.memory_space<vmem>>, vector<1x64xf32>,
    %c0_202 = arith.constant 0 : index
    %c0_203 = arith.constant 0 : index
    %287 = vector.load %arg15[%c0_202, %c0_203] : memref<1x4096xf32, #tpu.memory_space<vmem>>, vector<1x4096xf32>
    %288 = arith.truncf %287 : vector<1x4096xf32> to vector<1x4096xbf16>
    %c0_204 = arith.constant 0 : index
    %c0_205 = arith.constant 0 : index
    %289 = vector.load %arg6[%c0_204, %c0_205] : memref<4096x256xbf16, #tpu.memory_space<vmem>>, vector<4096x256xbf16>
    %cst_206 = arith.constant dense<0.000000e+00> : vector<1x256xf32>
    %290 = tpu.matmul %288, %289, %cst_206 {dimension_numbers = #tpu.dot_dimension_numbers<[1], [0], [0], [1], [0, 0, 1, 1], [], []>} : vector<1x4096xbf16>, vector<4096x256xbf16>, vector<1x256xf32> -> vector<1x256xf32>
    %c0_207 = arith.constant 0 : index
    %c0_208 = arith.constant 0 : index
    %291 = vector.load %arg7[%c0_207, %c0_208] : memref<1x256xf32, #tpu.memory_space<vmem>>, vector<1x256xf32>
    %292 = arith.addf %290, %291 : vector<1x256xf32>
    %cst_209 = arith.constant 0.000000e+00 : f32
    %293 = vector.broadcast %cst_209 : f32 to vector<1x256xf32>
    %294 = arith.maximumf %292, %293 : vector<1x256xf32>
    %295 = arith.truncf %294 : vector<1x256xf32> to vector<1x256xbf16>
    %c0_210 = arith.constant 0 : index
    %c0_211 = arith.constant 0 : index
    %296 = vector.load %arg8[%c0_210, %c0_211] : memref<256x128xbf16, #tpu.memory_space<vmem>>, vector<256x128xbf16>
    %cst_212 = arith.constant dense<0.000000e+00> : vector<1x128xf32>
    %297 = tpu.matmul %295, %296, %cst_212 {dimension_numbers = #tpu.dot_dimension_numbers<[1], [0], [0], [1], [0, 0, 1, 1], [], []>} : vector<1x256xbf16>, vector<256x128xbf16>, vector<1x128xf32> -> vector<1x128xf32>
    %c0_213 = arith.constant 0 : index
    %c0_214 = arith.constant 0 : index
    %298 = vector.load %arg9[%c0_213, %c0_214] : memref<1x128xf32, #tpu.memory_space<vmem>>, vector<1x128xf32>
    %299 = arith.addf %297, %298 : vector<1x128xf32>
    %c0_215 = arith.constant 0 : index
    %c0_216 = arith.constant 0 : index
    %c0_217 = arith.constant 0 : index
    %300 = vector.load %arg10[%c0_215, %c0_216, %c0_217] : memref<1x1x128xf32, #tpu.memory_space<vmem>>, vector<1x1x128xf32>
    %301 = vector.shape_cast %300 : vector<1x1x128xf32> to vector<1x128xf32>
    %302 = vector.shape_cast %299 : vector<1x128xf32> to vector<1x1x128xf32>
    tpu.vector_store %arg10[%c0_215, %c0_216, %c0_217], %302 {strides = array<i32>} : memref<1x1x128xf32, #tpu.memory_space<vmem>>, vector<1x1x128xf32>,
    return
  }
  func.func @transform_0(%arg0: i32) -> (i32, i32, i32) {
    %c0_i32 = arith.constant 0 : i32
    %c0_i32_0 = arith.constant 0 : i32
    %c0_i32_1 = arith.constant 0 : i32
    return %arg0, %c0_i32, %c0_i32_0 : i32, i32, i32
  }
  func.func @transform_1(%arg0: i32) -> (i32, i32) {
    %c0_i32 = arith.constant 0 : i32
    %c0_i32_0 = arith.constant 0 : i32
    %c0_i32_1 = arith.constant 0 : i32
    return %c0_i32, %c0_i32_0 : i32, i32
  }
  func.func @transform_2(%arg0: i32) -> (i32, i32) {
    %c0_i32 = arith.constant 0 : i32
    %c0_i32_0 = arith.constant 0 : i32
    %c0_i32_1 = arith.constant 0 : i32
    return %c0_i32, %c0_i32_0 : i32, i32
  }
  func.func @transform_3(%arg0: i32) -> (i32, i32) {
    %c0_i32 = arith.constant 0 : i32
    %c0_i32_0 = arith.constant 0 : i32
    %c0_i32_1 = arith.constant 0 : i32
    return %c0_i32, %c0_i32_0 : i32, i32
  }
  func.func @transform_4(%arg0: i32) -> (i32, i32) {
    %c0_i32 = arith.constant 0 : i32
    %c0_i32_0 = arith.constant 0 : i32
    %c0_i32_1 = arith.constant 0 : i32
    return %c0_i32, %c0_i32_0 : i32, i32
  }
  func.func @transform_5(%arg0: i32) -> (i32, i32) {
    %c0_i32 = arith.constant 0 : i32
    %c0_i32_0 = arith.constant 0 : i32
    %c0_i32_1 = arith.constant 0 : i32
    return %c0_i32, %c0_i32_0 : i32, i32
  }
  func.func @transform_6(%arg0: i32) -> (i32, i32) {
    %c0_i32 = arith.constant 0 : i32
    %c0_i32_0 = arith.constant 0 : i32
    %c0_i32_1 = arith.constant 0 : i32
    return %c0_i32, %c0_i32_0 : i32, i32
  }
  func.func @transform_7(%arg0: i32) -> (i32, i32) {
    %c0_i32 = arith.constant 0 : i32
    %c0_i32_0 = arith.constant 0 : i32
    %c0_i32_1 = arith.constant 0 : i32
    return %c0_i32, %c0_i32_0 : i32, i32
  }
  func.func @transform_8(%arg0: i32) -> (i32, i32) {
    %c0_i32 = arith.constant 0 : i32
    %c0_i32_0 = arith.constant 0 : i32
    %c0_i32_1 = arith.constant 0 : i32
    return %c0_i32, %c0_i32_0 : i32, i32
  }
  func.func @transform_9(%arg0: i32) -> (i32, i32, i32) {
    %c0_i32 = arith.constant 0 : i32
    %c0_i32_0 = arith.constant 0 : i32
    %c0_i32_1 = arith.constant 0 : i32
    return %arg0, %c0_i32, %c0_i32_0 : i32, i32, i32
  }
}

</mosaic_0001>

<bundles_post_ra>
// kernel: vae_forward.1
= control target key start
LH: loop header
LB: loop body
LE: loop exit
PB: predicated region body
PF: predicated region fallthrough
CT: control target
= control target key end

     0   :  { %s11475_s0 = inlined_call_operand.vmem [shape: bf16[2,196,16], index: 0, kind: input, shape index: {}]   ;;  %s11476_s1 = inlined_call_operand.hbm [shape: bf16[16,32], index: 1, kind: input, shape index: {}]   ;;  %s11477_s2 = inlined_call_operand.hbm [shape: f32[1,32], index: 2, kind: input, shape index: {}]   ;;  %s11478_s3 = inlined_call_operand.vmem [shape: bf16[512,64], index: 3, kind: input, shape index: {}]   ;;  %s11479_s4 = inlined_call_operand.hbm [shape: f32[1,64], index: 4, kind: input, shape index: {}]   ;;  %s11480_s5 = inlined_call_operand.hbm [shape: bf16[4096,256], index: 5, kind: input, shape index: {}]   ;;  %s11481_s6 = inlined_call_operand.hbm [shape: f32[1,256], index: 6, kind: input, shape index: {}]   ;;  %s11482_s7 = inlined_call_operand.hbm [shape: bf16[256,128], index: 7, kind: input, shape index: {}]   ;;  %s11483_s8 = inlined_call_operand.hbm [shape: f32[1,128], index: 8, kind: input, shape index: {}]   ;;  %s11484_s9 = inlined_call_operand.hbm [shape: f32[2,1,128], index: 9, kind: output, shape index: {}]  }
   0x1   :  { %11492 = sst [smem:[#allocation29_spill]] %s11477_s2 }
   0x2   :  { %14 = vsyncpa [#allocation8], 0 }
   0x3   :  { %15 = vsyncpa [#allocation11], 0 }
   0x4   :  { %16 = vsyncpa [#allocation14], 0 }
   0x5   :  { %17 = vsyncpa [#allocation17], 0 }
   0x6   :  { %18 = vsyncpa [#allocation9], 0 }
   0x7   :  { %20 = vsyncpa [#allocation9 + $0x1], 0  ;;  %s10018_s30 = smov 0   ;;  %s10020_s10 = smov 0  }
   0x8   :  { %s10022_s11 = smov 0   ;;  %s10024_s12 = smov 0  }
   0x9 LB: > { %11493 = sst [smem:[#allocation25_spill]] %s9946_s11  ;;  %s10039_s13 = sadd.s32 4294967295, %s9950_s12   ;;  %s9950_s12 = sphi %s10024_s12, %s11542_s12   ;;  %s9946_s11 = sphi %s10022_s11, %s11544_s11   ;;  %s9942_s10 = sphi %s10020_s10, %s11546_s10   ;;  %s9938_s30 = sphi %s10018_s30, %s11545_s30  }
   0xa   : > { %s7490_s14 = sadd.s32 4294967294, %s9950_s12   ;;  %s10043_s15 = sadd.s32 1, %s9950_s12  }
   0xb   : > { %11494 = sst [smem:[#allocation26_spill]] %s10043_s15  ;;  %s227_s16 = sadd.s32 1, %s9946_s11 }
   0xc   : > { %s224_s17 = ssub.s32 %s9950_s12, %s10043_s15  ;;  %p237_p0 = scmp.ne.s32.totalorder %s9946_s11, %s9942_s10 }
   0xd   : > { %p225_p1 = scmp.eq.s32.totalorder %s224_s17, 0  ;;  %p238_p2 = scmp.eq.s32.totalorder %s10039_s13, 1 }
   0xe   : > { %p243_p3 = scmp.ne.s32.totalorder %s9942_s10, %s9938_s30  ;;  %p244_p4 = scmp.eq.s32.totalorder %s7490_s14, 1 }
   0xf   : > { %s10054_s18 = scalar_select %p225_p1, %s9946_s11, %s227_s16  }
  0x10   : > { %p10056_p5 = por %p238_p2, %p237_p0  ;;  %p10060_p6 = por %p244_p4, %p243_p3 }
  0x11   : > { %11495 = sst [smem:[#allocation27_spill]] %s10054_s18  ;;  %p7491_p7 = scmp.ge.s32.totalorder %s9950_s12, 1 }
  0x12   : > { %s11496_s19 = scalar_select %p10056_p5, 1, 0 }
  0x13   : > { %s11497_s20 = scalar_select %p10060_p6, 1, 0 }
  0x14   : > { %p251_p8 = scmp.lt.s32.totalorder %s9950_s12, 3  ;;  %p11485_p9 = scmp.eq.s32.totalorder %s10039_s13, 0 }
  0x15   : > { %11498 = sst [smem:[#allocation28_spill]] %s11497_s20  ;;  %s9952_s22 = smov [#allocation10]  }
  0x16   : > { %p10067_p10 = pnand %p7491_p7, %p251_p8  ;;  %s277_s23 = sshll.u32 %s9952_s22, 4  ;;  %s278_s23 = int_to_ptr.vmem [resolvable:$true] %s277_s23 }
  0x17   : > { %s9953_s24 = smov [#allocation13]   ;;  %s11501_s2 = sld [smem:[#allocation29_spill]] }
  0x18   : > { %s11499_s21 = scalar_select %p10067_p10, 1, 0 }
  0x19   : > { %p8756_p11 = pneg %p10067_p10  ;;  %s301_s25 = sshll.u32 %s9953_s24, 4  ;;  %s10079_s25 = int_to_ptr.vmem [resolvable:$true] %s301_s25 }
  0x1b   : > { %p10075_p12 = pnand %p11485_p9, %p8756_p11 }
  0x1d   : > { %s9676_s29 = scalar_lea.hbm %s11501_s2, 16  ;;  %p10089_p0 = pneg %p10075_p12 }
  0x1e   : > { %p9677_p13 = scmp.ne.s32.totalorder %s11501_s2, %s9676_s29  ;;  %p9683_p3 = scmp.lt.u32.totalorder %s9676_s29, %s11501_s2 }
  0x20   : > { %p9679_p1 = pnand %p10089_p0, %p9677_p13 }
  0x22   : > { %p9680_p2 = pneg %p9679_p1 }
  0x24   : > { %p9685_p4 = pnand %p9683_p3, %p9680_p2 }
  0x26   : > { %9688 = shalt.err (!%p9685_p4)
}
  0x27   : > { %s9689_s27 = scalar_lea.vmem %s278_s23, 16  ;;  %s9696_s28 = scalar_lea.vmem %s278_s23, 32 }
  0x28   : > { %p9690_p7 = scmp.ne.s32.totalorder %s278_s23, %s9689_s27  ;;  %p9697_p9 = scmp.lt.s32.totalorder %s278_s23, %s278_s23 }
  0x29   : > { %p9698_p6 = scmp.lt.s32.totalorder %s9696_s28, %s9689_s27 }
  0x2a   : > { %p9692_p8 = pnand %p9690_p7, %p10089_p0 }
  0x2b   : > { %p9699_p5 = por %p9698_p6, %p9697_p9 }
  0x2c   : > { %p9693_p11 = pneg %p9692_p8 }
  0x2e   : > { %p9700_p10 = pnand %p9699_p5, %p9693_p11 }
  0x30   : > { %9703 = shalt.err (!%p9700_p10)
}
  0x31   : > { %8762 = dma.hbm_to_vmem [thread:$0]  (!%p10075_p12), %s11501_s2, 16, %s278_s23, [#allocation11]  }
  0x32   : > { %s9704_s24 = scalar_lea.hbm %s11480_s5, 65536 }
  0x33   : > { %p9705_p13 = scmp.ne.s32.totalorder %s11480_s5, %s9704_s24  ;;  %p9711_p5 = scmp.lt.u32.totalorder %s9704_s24, %s11480_s5 }
  0x35   : > { %p9707_p1 = pnand %p9705_p13, %p10089_p0 }
  0x37   : > { %p9708_p6 = pneg %p9707_p1 }
  0x39   : > { %p9713_p9 = pnand %p9711_p5, %p9708_p6 }
  0x3b   : > { %9716 = shalt.err (!%p9713_p9)
}
  0x3c   : > { %s9717_s23 = scalar_lea.vmem %s10079_s25, 65536  ;;  %p9725_p4 = scmp.lt.s32.totalorder %s10079_s25, %s10079_s25 }
  0x3d   : > { %p9718_p10 = scmp.ne.s32.totalorder %s10079_s25, %s9717_s23  ;;  %p9726_p7 = scmp.lt.s32.totalorder %s9717_s23, %s9717_s23 }
  0x3f   : > { %p9720_p2 = pnand %p9718_p10, %p10089_p0  ;;  %p9727_p8 = por %p9726_p7, %p9725_p4 }
  0x41   : > { %p9721_p3 = pneg %p9720_p2 }
  0x43   : > { %p9728_p11 = pnand %p9727_p8, %p9721_p3 }
  0x45   : > { %9731 = shalt.err (!%p9728_p11)
}
  0x46   : > { %s9954_s11 = smov 128   ;;  %s9955_s18 = smov 8  }
  0x47   : > { %8768 = dma.hbm_to_vmem [thread:$0]  (!%p10075_p12), %s11480_s5, 65536, %s10079_s25, [#allocation14], %s9954_s11, %s9954_s11, %s9955_s18  }
  0x48   : > { %s9956_s29 = smov [#allocation16]   ;;  %s9957_s24 = smov [#allocation7]  }
  0x49   : > { %s325_s22 = sshll.u32 %s9956_s29, 4  ;;  %s263_s27 = sshll.u32 %s9957_s24, 4  ;;  %s326_s22 = int_to_ptr.vmem [resolvable:$true] %s325_s22  ;;  %s10128_s27 = int_to_ptr.vmem [resolvable:$true] %s263_s27 }
  0x4a   : > { %s9732_s2 = scalar_lea.hbm %s11482_s7, 2048 }
  0x4b   : > { %p9733_p13 = scmp.ne.s32.totalorder %s11482_s7, %s9732_s2  ;;  %p9739_p5 = scmp.lt.u32.totalorder %s9732_s2, %s11482_s7 }
  0x4d   : > { %p9735_p1 = pnand %p9733_p13, %p10089_p0 }
  0x4f   : > { %p9736_p6 = pneg %p9735_p1 }
  0x51   : > { %p9741_p9 = pnand %p9739_p5, %p9736_p6 }
  0x53   : > { %9744 = shalt.err (!%p9741_p9)
}
  0x54   : > { %s9745_s11 = scalar_lea.vmem %s326_s22, 2048  ;;  %p9753_p4 = scmp.lt.s32.totalorder %s326_s22, %s326_s22 }
  0x55   : > { %p9746_p10 = scmp.ne.s32.totalorder %s326_s22, %s9745_s11  ;;  %p9754_p7 = scmp.lt.s32.totalorder %s9745_s11, %s9745_s11 }
  0x57   : > { %p9748_p2 = pnand %p9746_p10, %p10089_p0  ;;  %p9755_p8 = por %p9754_p7, %p9753_p4 }
  0x59   : > { %p9749_p3 = pneg %p9748_p2 }
  0x5b   : > { %p9756_p11 = pnand %p9755_p8, %p9749_p3 }
  0x5d   : > { %9759 = shalt.err (!%p9756_p11)
}
  0x5e   : > { %s9958_s15 = smov 64   ;;  %s9959_s20 = smov 4  }
  0x5f   : > { %8774 = dma.hbm_to_vmem [thread:$0]  (!%p10075_p12), %s11482_s7, 2048, %s326_s22, [#allocation17], %s9958_s15, %s9958_s15, %s9959_s20  }
  0x60   : > { %s9760_s24 = scalar_lea.hbm %s11476_s1, 128 }
  0x61   : > { %p9761_p13 = scmp.ne.s32.totalorder %s11476_s1, %s9760_s24  ;;  %p9767_p5 = scmp.lt.u32.totalorder %s9760_s24, %s11476_s1 }
  0x63   : > { %p9763_p1 = pnand %p9761_p13, %p10089_p0 }
  0x65   : > { %p9764_p6 = pneg %p9763_p1 }
  0x67   : > { %p9769_p9 = pnand %p9767_p5, %p9764_p6 }
  0x69   : > { %9772 = shalt.err (!%p9769_p9)
}
  0x6a   : > { %s9773_s22 = scalar_lea.vmem %s10128_s27, 128  ;;  %p9781_p4 = scmp.lt.s32.totalorder %s10128_s27, %s10128_s27 }
  0x6b   : > { %p9774_p10 = scmp.ne.s32.totalorder %s10128_s27, %s9773_s22  ;;  %p9782_p7 = scmp.lt.s32.totalorder %s9773_s22, %s9773_s22 }
  0x6d   : > { %p9776_p2 = pnand %p9774_p10, %p10089_p0  ;;  %p9783_p8 = por %p9782_p7, %p9781_p4 }
  0x6f   : > { %p9777_p3 = pneg %p9776_p2 }
  0x71   : > { %p9784_p11 = pnand %p9783_p8, %p9777_p3 }
  0x73   : > { %9787 = shalt.err (!%p9784_p11)
}
  0x74   : > { %8759 = dma.hbm_to_vmem [thread:$0]  (!%p10075_p12), %s11476_s1, 128, %s10128_s27, [#allocation8], %s9958_s15, %s9958_s15, %s9959_s20  }
  0x75   : > { %s9960_s2 = smov [#allocation12]   ;;  %s9961_s29 = smov [#allocation15]  }
  0x76   : > { %s291_s16 = sshll.u32 %s9960_s2, 4  ;;  %s315_s24 = sshll.u32 %s9961_s29, 4  ;;  %s292_s16 = int_to_ptr.vmem [resolvable:$true] %s291_s16  ;;  %s10171_s24 = int_to_ptr.vmem [resolvable:$true] %s315_s24 }
  0x77   : > { %s9788_s14 = scalar_lea.hbm %s11479_s4, 16 }
  0x78   : > { %p9789_p13 = scmp.ne.s32.totalorder %s11479_s4, %s9788_s14  ;;  %p9795_p5 = scmp.lt.u32.totalorder %s9788_s14, %s11479_s4 }
  0x7a   : > { %p9791_p1 = pnand %p9789_p13, %p10089_p0 }
  0x7c   : > { %p9792_p6 = pneg %p9791_p1 }
  0x7e   : > { %p9797_p9 = pnand %p9795_p5, %p9792_p6 }
  0x80   : > { %9800 = shalt.err (!%p9797_p9)
}
  0x81   : > { %s9801_s15 = scalar_lea.vmem %s292_s16, 16  ;;  %s9808_s20 = scalar_lea.vmem %s292_s16, 32 }
  0x82   : > { %p9802_p10 = scmp.ne.s32.totalorder %s292_s16, %s9801_s15  ;;  %p9809_p4 = scmp.lt.s32.totalorder %s292_s16, %s292_s16 }
  0x83   : > { %p9810_p7 = scmp.lt.s32.totalorder %s9808_s20, %s9801_s15 }
  0x84   : > { %p9804_p2 = pnand %p9802_p10, %p10089_p0 }
  0x85   : > { %p9811_p8 = por %p9810_p7, %p9809_p4 }
  0x86   : > { %p9805_p3 = pneg %p9804_p2 }
  0x88   : > { %p9812_p11 = pnand %p9811_p8, %p9805_p3 }
  0x8a   : > { %9815 = shalt.err (!%p9812_p11)
}
  0x8b   : > { %8765 = dma.hbm_to_vmem [thread:$0]  (!%p10075_p12), %s11479_s4, 16, %s292_s16, [#allocation11]  }
  0x8c   : > { %s9816_s23 = scalar_lea.hbm %s11481_s6, 32 }
  0x8d   : > { %p9817_p13 = scmp.ne.s32.totalorder %s11481_s6, %s9816_s23  ;;  %p9823_p5 = scmp.lt.u32.totalorder %s9816_s23, %s11481_s6 }
  0x8f   : > { %p9819_p1 = pnand %p9817_p13, %p10089_p0 }
  0x91   : > { %p9820_p6 = pneg %p9819_p1 }
  0x93   : > { %p9825_p9 = pnand %p9823_p5, %p9820_p6 }
  0x95   : > { %9828 = shalt.err (!%p9825_p9)
}
  0x96   : > { %s9829_s16 = scalar_lea.vmem %s10171_s24, 32  ;;  %p9837_p4 = scmp.lt.s32.totalorder %s10171_s24, %s10171_s24 }
  0x97   : > { %p9830_p10 = scmp.ne.s32.totalorder %s10171_s24, %s9829_s16  ;;  %p9838_p7 = scmp.lt.s32.totalorder %s9829_s16, %s9829_s16 }
  0x99   : > { %p9832_p2 = pnand %p9830_p10, %p10089_p0  ;;  %p9839_p8 = por %p9838_p7, %p9837_p4 }
  0x9b   : > { %p9833_p3 = pneg %p9832_p2 }
  0x9d   : > { %p9840_p11 = pnand %p9839_p8, %p9833_p3 }
  0x9f   : > { %9843 = shalt.err (!%p9840_p11)
}
  0xa0   : > { %8771 = dma.hbm_to_vmem [thread:$0]  (!%p10075_p12), %s11481_s6, 32, %s10171_s24, [#allocation14]  }
  0xa1   : > { %s9962_s20 = smov [#allocation18]   ;;  %s9844_s28 = scalar_lea.hbm %s11483_s8, 16 }
  0xa2   : > { %s339_s18 = sshll.u32 %s9962_s20, 4  ;;  %p9845_p13 = scmp.ne.s32.totalorder %s11483_s8, %s9844_s28  ;;  %s340_s18 = int_to_ptr.vmem [resolvable:$true] %s339_s18 }
  0xa3   : > { %p9851_p5 = scmp.lt.u32.totalorder %s9844_s28, %s11483_s8 }
  0xa4   : > { %p9847_p1 = pnand %p9845_p13, %p10089_p0 }
  0xa6   : > { %p9848_p6 = pneg %p9847_p1 }
  0xa8   : > { %p9853_p9 = pnand %p9851_p5, %p9848_p6 }
  0xaa   : > { %9856 = shalt.err (!%p9853_p9)
}
  0xab   : > { %s9857_s24 = scalar_lea.vmem %s340_s18, 16  ;;  %s9864_s11 = scalar_lea.vmem %s340_s18, 32 }
  0xac   : > { %p9858_p10 = scmp.ne.s32.totalorder %s340_s18, %s9857_s24  ;;  %p9865_p4 = scmp.lt.s32.totalorder %s340_s18, %s340_s18 }
  0xad   : > { %p9866_p7 = scmp.lt.s32.totalorder %s9864_s11, %s9857_s24 }
  0xae   : > { %p9860_p2 = pnand %p9858_p10, %p10089_p0 }
  0xaf   : > { %p9867_p8 = por %p9866_p7, %p9865_p4 }
  0xb0   : > { %p9861_p3 = pneg %p9860_p2 }
  0xb2   : > { %p9868_p11 = pnand %p9867_p8, %p9861_p3 }
  0xb4   : > { %9871 = shalt.err (!%p9868_p11)
}
  0xb5   : > { %8777 = dma.hbm_to_vmem [thread:$0]  (!%p10075_p12), %s11483_s8, 16, %s340_s18, [#allocation17]  }
  0xb6   : > { %p11503_p13 = scmp.ne.s32.totalorder %s11499_s21, 0 }
  0xb7   : > { %p11504_p1 = scmp.eq.s32.totalorder (!%p11503_p13), %s10039_s13, 0 }
  0xb8   : > { %360 = sbr.rel (%p11503_p13) target bundleno = 2146 (0x862), region = 56 }
  0xbf   : > { %9917 = dma.done.wait (%p11504_p1), [#allocation8], 128   ;;  %p11505_p0 = pmov %p11504_p1 }
  0xc1   : > { %9919 = vsyncadd (%p11505_p0), [#allocation8], 4294967168  ;;  %p11506_p6 = pmov %p11505_p0 }
  0xc2   : > { %p11507_p5 = pmov %p11505_p0 }
  0xc3   : > { %9921 = dma.done.wait (%p11506_p6), [#allocation11], 32  }
  0xc4   : > { %9923 = vsyncadd (%p11507_p5), [#allocation11], 4294967264  ;;  %p11508_p9 = pmov %p11505_p0 }
  0xc5   : > { %p11509_p12 = pmov %p11505_p0 }
  0xc6   : > { %9925 = dma.done.wait (%p11508_p9), [#allocation14], 65568  }
  0xc7   : > { %9927 = vsyncadd (%p11509_p12), [#allocation14], 4294901728  ;;  %p11510_p10 = pmov %p11505_p0 }
  0xc8   : > { %p11511_p2 = pmov %p11505_p0 }
  0xc9   : > { %9929 = dma.done.wait (%p11510_p10), [#allocation17], 2064  }
  0xca   : > { %9931 = vsyncadd (%p11511_p2), [#allocation17], 4294965232  ;;  %p419_p3 = scmp.lt.s32.totalorder %s10039_s13, 1  ;;  %v9963_v0 = vmov 0.0   ;;  %vm9964_vm0 = vmmov 0   ;;  %vm425_vm1 = vcmask 261120  }
  0xcb   : > { %8297 = vmatprep.subr.bf16.mxu0 %v9963_v0  ;;  %8299 = vmatprep.mubr.msk.bf16.mxu0 %vm9964_vm0, %v9963_v0  ;;  %426 = vst.msk [vmem:[#allocation2] sm:$0xff] %vm425_vm1, %v9963_v0  ;;  %427 = vst.msk [vmem:[#allocation2 + $0x8] sm:$0xff] %vm425_vm1, %v9963_v0  ;;  %v8844_v1 = vld [vmem:[#allocation7] sm:$0xff]   ;;  %vm569_vm2 = vcmask 130048   ;;  %v8858_v15 = vld [vmem:[%s11478_s3 + $0x10] sm:$0xff]   ;;  %vm770_vm3 = vcmask 260096  }
  0xcc   : > { %s10255_s21 = scalar_select %p419_p3, %s10039_s13, 1  ;;  %8543 = vmatprep.subr.bf16.mxu1 %v9963_v0  ;;  %8347 = vmatprep.mubr.msk.bf16.mxu1 %vm9964_vm0, %v9963_v0  ;;  %428 = vst.msk [vmem:[#allocation2 + $0x10] sm:$0xff] %vm425_vm1, %v9963_v0  ;;  %429 = vst.msk [vmem:[#allocation2 + $0x18] sm:$0xff] %vm425_vm1, %v9963_v0  ;;  %v8859_v16 = vld [vmem:[%s11478_s3 + $0x18] sm:$0xff]   ;;  %v10403_v17 = vld [vmem:[%s11478_s3] sm:$0xff]   ;;  %vm772_vm4 = vcmask 261127  }
  0xcd   : > { %430 = vst.msk [vmem:[#allocation2 + $0x20] sm:$0xff] %vm425_vm1, %v9963_v0  ;;  %431 = vst.msk [vmem:[#allocation2 + $0x28] sm:$0xff] %vm425_vm1, %v9963_v0  ;;  %8298 = vmatpush3.bf16.msra.mxu0 %v8844_v1  ;;  %8544 = vmatpush3.bf16.msra.mxu1 %v8844_v1  ;;  %v10406_v18 = vld [vmem:[#allocation10] ss:$0 sm:$0xff]  ;;  %vm774_vm5 = vcmask 259072   ;;  %vm776_vm6 = vcmask 261126  }
  0xce   : > { %432 = vst.msk [vmem:[#allocation2 + $0x30] sm:$0xff] %vm425_vm1, %v9963_v0  ;;  %433 = vst.msk [vmem:[#allocation2 + $0x38] sm:$0xff] %vm425_vm1, %v9963_v0  ;;  %s8725_s26 = smul.u32 100, %s10255_s21  ;;  %8351 = vmatprep.subr.bf16.mxu1 %v8858_v15  ;;  %vm778_vm7 = vcmask 258048   ;;  %vm780_vm8 = vcmask 261125   ;;  %vm782_vm9 = vcmask 257024  }
  0xcf   : > { %434 = vst.msk [vmem:[#allocation2 + $0x40] sm:$0xff] %vm425_vm1, %v9963_v0  ;;  %435 = vst.msk [vmem:[#allocation2 + $0x48] sm:$0xff] %vm425_vm1, %v9963_v0  ;;  %vm784_vm10 = vcmask 261124   ;;  %vm786_vm11 = vcmask 256000   ;;  %vm788_vm12 = vcmask 261123   ;;  %vm790_vm13 = vcmask 254976  }
  0xd0   : > { %436 = vst.msk [vmem:[#allocation3] sm:$0xff] %vm425_vm1, %v9963_v0  ;;  %437 = vst.msk [vmem:[#allocation3 + $0x8] sm:$0xff] %vm425_vm1, %v9963_v0  ;;  %s10344_s20 = scalar_lea.vmem %s11475_s0, %s8725_s26  ;;  %vm792_vm14 = vcmask 261122   ;;  %vm794_vm15 = vcmask 253952   ;;  %s9966_s26 = smov 64  }
  0xd1   : > { %438 = vst.msk [vmem:[#allocation3 + $0x10] sm:$0xff] %vm425_vm1, %v9963_v0  ;;  %439 = vst.msk [vmem:[#allocation3 + $0x18] sm:$0xff] %vm425_vm1, %v9963_v0  ;;  %v8845_v2 = vld [vmem:[%s10344_s20] sm:$0xff]   ;;  %v8846_v3 = vld [vmem:[%s10344_s20 + $0x8] sm:$0xff]   ;;  %s417_s17 = sand.u32 1, %s9942_s10   ;;  %s8162_s15 = sshll.u32 %s10039_s13, 4 }
  0xd2   : > { %440 = vst.msk [vmem:[#allocation3 + $0x20] sm:$0xff] %vm425_vm1, %v9963_v0  ;;  %441 = vst.msk [vmem:[#allocation3 + $0x28] sm:$0xff] %vm425_vm1, %v9963_v0  ;;  %8300 = vmatmul.mubr.msk.bf16.vlgmr.msra.gmra.mrb[0].mxu0 %vm569_vm2, %v8845_v2  ;;  %v8856_v4 = vld [vmem:[%s10344_s20 + $0x60] ss:$0 sps:$4 sm:$0x33]   ;;  %v8847_v5 = vld [vmem:[%s10344_s20 + $0x10] sm:$0xff]   ;;  %s11433_s28 = scalar_lea.hbm %s11484_s9, %s8162_s15 }
  0xd3   : > { %442 = vst.msk [vmem:[#allocation3 + $0x30] sm:$0xff] %vm425_vm1, %v9963_v0  ;;  %443 = vst.msk [vmem:[#allocation3 + $0x38] sm:$0xff] %vm425_vm1, %v9963_v0  ;;  %8303 = vmatprep.mubr.msk.bf16.mxu0 %vm9964_vm0, %v9963_v0  ;;  %8348 = vmatmul.mubr.msk.bf16.vlgmr.msra.gmra.mrb[0].mxu1 %vm569_vm2, %v8856_v4  ;;  %v8848_v6 = vld [vmem:[%s10344_s20 + $0x18] sm:$0xff]   ;;  %v8849_v7 = vld [vmem:[%s10344_s20 + $0x20] sm:$0xff]   ;;  %s7354_s23 = scalar_lea.sflag [#allocation9], %s417_s17  ;;  %p11539_p7 = scmp.ne.s32.totalorder %s11496_s19, 0 }
  0xd4   : > { %444 = vst.msk [vmem:[#allocation3 + $0x40] sm:$0xff] %vm425_vm1, %v9963_v0  ;;  %445 = vst.msk [vmem:[#allocation3 + $0x48] sm:$0xff] %vm425_vm1, %v9963_v0  ;;  %v8850_v8 = vld [vmem:[%s10344_s20 + $0x28] sm:$0xff]   ;;  %v8851_v9 = vld [vmem:[%s10344_s20 + $0x30] sm:$0xff]   ;;  %8352 = vmatpush3.bf16.msra.mxu1 %v8858_v15  ;;  %s9967_s13 = smov [#allocation19]  }
  0xd5   : > { %446 = vst.msk [vmem:[#allocation4] sm:$0xff] %vm425_vm1, %v9963_v0  ;;  %447 = vst.msk [vmem:[#allocation4 + $0x8] sm:$0xff] %vm425_vm1, %v9963_v0  ;;  %v8852_v10 = vld [vmem:[%s10344_s20 + $0x38] sm:$0xff]   ;;  %v8853_v11 = vld [vmem:[%s10344_s20 + $0x40] sm:$0xff]   ;;  %8353 = vmatprep.subr.bf16.mxu1 %v8859_v16  ;;  %s9876_s25 = sshll.u32 %s9967_s13, 4  ;;  %s9877_s25 = int_to_ptr.vmem [resolvable:$false] %s9876_s25 }
  0xd6   : > { %448 = vst.msk [vmem:[#allocation4 + $0x10] sm:$0xff] %vm425_vm1, %v9963_v0  ;;  %449 = vst.msk [vmem:[#allocation4 + $0x18] sm:$0xff] %vm425_vm1, %v9963_v0  ;;  %v8854_v12 = vld [vmem:[%s10344_s20 + $0x48] sm:$0xff]   ;;  %v8855_v13 = vld [vmem:[%s10344_s20 + $0x50] sm:$0xff]   ;;  %s9878_s22 = scalar_lea.vmem %s9877_s25, 32 }
  0xd7   : > { %450 = vst.msk [vmem:[#allocation4 + $0x20] sm:$0xff] %vm425_vm1, %v9963_v0  ;;  %451 = vst.msk [vmem:[#allocation4 + $0x28] sm:$0xff] %vm425_vm1, %v9963_v0  ;;  %v8857_v14 = vld [vmem:[%s10344_s20 + $0x58] sm:$0xff]   ;;  %s418_s20 = scalar_lea.vmem [#allocation19], %s417_s17 }
  0xd8   : > { %452 = vst.msk [vmem:[#allocation4 + $0x30] sm:$0xff] %vm425_vm1, %v9963_v0  ;;  %453 = vst.msk [vmem:[#allocation4 + $0x38] sm:$0xff] %vm425_vm1, %v9963_v0  ;;  %8354 = vmatpush3.bf16.msra.mxu1 %v8859_v16  ;;  %s7366_s18 = sshll.u32 %s418_s20, 4  ;;  %s11435_s18 = int_to_ptr.vmem [resolvable:$true] %s7366_s18 }
  0xd9   : > { %454 = vst.msk [vmem:[#allocation4 + $0x40] sm:$0xff] %vm425_vm1, %v9963_v0  ;;  %455 = vst.msk [vmem:[#allocation4 + $0x48] sm:$0xff] %vm425_vm1, %v9963_v0  ;;  %8363 = vmatprep.subr.bf16.mxu1 %v10403_v17  ;;  %s9872_s14 = scalar_lea.vmem %s11435_s18, 16  ;;  %p9879_p13 = scmp.lt.s32.totalorder %s11435_s18, %s9877_s25 }
  0xda   : > { %456 = vst.msk [vmem:[#allocation5] sm:$0xff] %vm425_vm1, %v9963_v0  ;;  %457 = vst.msk [vmem:[#allocation5 + $0x8] sm:$0xff] %vm425_vm1, %v9963_v0  ;;  %8304 = vmatmul.mubr.msk.bf16.gmra.mrb[4].mxu0 %vm569_vm2, %v8846_v3  ;;  %v8864_v3 = vld [vmem:[%s11478_s3 + $0x30] sm:$0xff]   ;;  %p9873_p4 = scmp.ne.s32.totalorder %s11435_s18, %s9872_s14  ;;  %p9880_p1 = scmp.lt.s32.totalorder %s9878_s22, %s9872_s14 }
  0xdb   : > { %458 = vst.msk [vmem:[#allocation5 + $0x10] sm:$0xff] %vm425_vm1, %v9963_v0  ;;  %459 = vst.msk [vmem:[#allocation5 + $0x18] sm:$0xff] %vm425_vm1, %v9963_v0  ;;  %8307 = vmatprep.mubr.msk.bf16.mxu0 %vm9964_vm0, %v9963_v0 }
  0xdc   : > { %460 = vst.msk [vmem:[#allocation5 + $0x20] sm:$0xff] %vm425_vm1, %v9963_v0  ;;  %461 = vst.msk [vmem:[#allocation5 + $0x28] sm:$0xff] %vm425_vm1, %v9963_v0  ;;  %p9874_p8 = pnand %p9873_p4, %p11539_p7  ;;  %p9881_p0 = por %p9880_p1, %p9879_p13 }
  0xdd   : > { %462 = vst.msk [vmem:[#allocation5 + $0x30] sm:$0xff] %vm425_vm1, %v9963_v0  ;;  %463 = vst.msk [vmem:[#allocation5 + $0x38] sm:$0xff] %vm425_vm1, %v9963_v0 }
  0xde   : > { %464 = vst.msk [vmem:[#allocation5 + $0x40] sm:$0xff] %vm425_vm1, %v9963_v0  ;;  %465 = vst.msk [vmem:[#allocation5 + $0x48] sm:$0xff] %vm425_vm1, %v9963_v0  ;;  %p9875_p11 = pneg %p9874_p8 }
  0xe0   : > { %p9882_p6 = pnand %p9881_p0, %p9875_p11 }
  0xe2   : > { %8308 = vmatmul.mubr.msk.bf16.gmra.mrb[8].mxu0 %vm569_vm2, %v8847_v5 }
  0xe3   : > { %8311 = vmatprep.mubr.msk.bf16.mxu0 %vm9964_vm0, %v9963_v0 }
  0xea   : > { %8312 = vmatmul.mubr.msk.bf16.gmra.mrb[12].mxu0 %vm569_vm2, %v8848_v6 }
  0xeb   : > { %8315 = vmatprep.mubr.msk.bf16.mxu0 %vm9964_vm0, %v9963_v0 }
  0xf2   : > { %8316 = vmatmul.mubr.msk.bf16.gmra.mrb[16].mxu0 %vm569_vm2, %v8849_v7 }
  0xf3   : > { %8319 = vmatprep.mubr.msk.bf16.mxu0 %vm9964_vm0, %v9963_v0 }
  0xfa   : > { %8320 = vmatmul.mubr.msk.bf16.gmra.mrb[20].mxu0 %vm569_vm2, %v8850_v8 }
  0xfb   : > { %8323 = vmatprep.mubr.msk.bf16.mxu0 %vm9964_vm0, %v9963_v0 }
 0x102   : > { %8324 = vmatmul.mubr.msk.bf16.gmra.mrb[24].mxu0 %vm569_vm2, %v8851_v9 }
 0x103   : > { %8327 = vmatprep.mubr.msk.bf16.mxu0 %vm9964_vm0, %v9963_v0 }
 0x10a   : > { %8328 = vmatmul.mubr.msk.bf16.gmra.mrb[28].mxu0 %vm569_vm2, %v8852_v10 }
 0x10b   : > { %8331 = vmatprep.mubr.msk.bf16.mxu0 %vm9964_vm0, %v9963_v0 }
 0x112   : > { %8332 = vmatmul.mubr.msk.bf16.gmra.mrb[32].mxu0 %vm569_vm2, %v8853_v11 }
 0x113   : > { %8335 = vmatprep.mubr.msk.bf16.mxu0 %vm9964_vm0, %v9963_v0 }
 0x11a   : > { %8336 = vmatmul.mubr.msk.bf16.gmra.mrb[36].mxu0 %vm569_vm2, %v8854_v12 }
 0x11b   : > { %8339 = vmatprep.mubr.msk.bf16.mxu0 %vm9964_vm0, %v9963_v0 }
 0x122   : > { %8340 = vmatmul.mubr.msk.bf16.gmra.mrb[40].mxu0 %vm569_vm2, %v8855_v13 }
 0x123   : > { %8343 = vmatprep.mubr.msk.bf16.mxu0 %vm9964_vm0, %v9963_v0  ;;  %vm796_vm0 = vcmask 261121  }
 0x12a   : > { %8344 = vmatmul.mubr.msk.bf16.gmra.mrb[44].mxu0 %vm569_vm2, %v8857_v14 }
 0x1a5   : > { %v643_v19 = vpop.f32.mrb[0].mxu0 }
 0x1a6   : > { %v644_v20 = vadd.f32 %v10406_v18, %v643_v19  ;;  %v8301_v21 = vpop.f32.mrb[1].mxu0  ;;  %v739_v30 = vpop.f32.mrb[0].mxu1 }
 0x1a7   : > { %v646_v22 = vpop.f32.mrb[2].mxu0  ;;  %v740_v32 = vadd.f32 %v10406_v18, %v739_v30  ;;  %v8349_v33 = vpop.f32.mrb[1].mxu1 }
 0x1a8   : > { %v745_v23 = vmax.f32 %v644_v20, 0.0  ;;  %v647_v24 = vadd.f32 %v10406_v18, %v646_v22  ;;  %v8302_v25 = vpop.f32.mrb[3].mxu0  ;;  %v742_v37 = vpop.f32.mrb[2].mxu1 }
 0x1a9   : > { %v769_v38 = vmax.f32 %v740_v32, 0.0  ;;  %v8350_v39 = vpop.f32.mrb[3].mxu1 }
 0x1aa   : > { %771 = vst.msk [vmem:[#allocation2] sm:$0x7f] %vm770_vm3, %v745_v23  ;;  %v746_v26 = vmax.f32 %v647_v24, 0.0 }
 0x1ab   : > { %773 = vst.msk [vmem:[#allocation2 + $0x1] sm:$0x80] %vm772_vm4, %v745_v23 }
 0x1ac   : > { %775 = vst.msk [vmem:[#allocation2 + $0x9] sm:$0x3f] %vm774_vm5, %v746_v26 }
 0x1ad   : > { %777 = vst.msk [vmem:[#allocation2 + $0xa] sm:$0xc0] %vm776_vm6, %v746_v26  ;;  %v651_v27 = vpop.f32.mrb[4].mxu0 }
 0x1ae   : > { %v652_v28 = vadd.f32 %v10406_v18, %v651_v27  ;;  %v8305_v29 = vpop.f32.mrb[5].mxu0  ;;  %832 = vst.msk [vmem:[#allocation5 + $0x3c] sm:$0xf] %vm782_vm9, %v769_v38 }
 0x1af   : > { %v654_v31 = vpop.f32.mrb[6].mxu0 }
 0x1b0   : > { %v747_v34 = vmax.f32 %v652_v28, 0.0  ;;  %v655_v35 = vadd.f32 %v10406_v18, %v654_v31  ;;  %v8306_v36 = vpop.f32.mrb[7].mxu0 }
 0x1b2   : > { %779 = vst.msk [vmem:[#allocation2 + $0x12] sm:$0x1f] %vm778_vm7, %v747_v34  ;;  %v748_v40 = vmax.f32 %v655_v35, 0.0 }
 0x1b3   : > { %781 = vst.msk [vmem:[#allocation2 + $0x13] sm:$0xe0] %vm780_vm8, %v747_v34  ;;  %v10424_v48 = vld [vmem:[#allocation2 + $0x8] sm:$0xff] }
 0x1b4   : > { %783 = vst.msk [vmem:[#allocation2 + $0x1b] sm:$0xf] %vm782_vm9, %v748_v40  ;;  %v10428_v50 = vld [vmem:[#allocation2 + $0x9] sm:$0xff] }
 0x1b5   : > { %785 = vst.msk [vmem:[#allocation2 + $0x1c] sm:$0xf0] %vm784_vm10, %v748_v40  ;;  %v659_v41 = vpop.f32.mrb[8].mxu0 }
 0x1b6   : > { %v660_v42 = vadd.f32 %v10406_v18, %v659_v41  ;;  %v8309_v43 = vpop.f32.mrb[9].mxu0 }
 0x1b7   : > { %v662_v44 = vpop.f32.mrb[10].mxu0 }
 0x1b8   : > { %v749_v45 = vmax.f32 %v660_v42, 0.0  ;;  %v663_v46 = vadd.f32 %v10406_v18, %v662_v44  ;;  %v8310_v47 = vpop.f32.mrb[11].mxu0 }
 0x1b9   : > { %v10426_v49 = vld [vmem:[#allocation2 + $0x10] sm:$0xff] }
 0x1ba   : > { %v10430_v51 = vld [vmem:[#allocation2 + $0x11] sm:$0xff]  ;;  %787 = vst.msk [vmem:[#allocation2 + $0x24] sm:$0x7] %vm786_vm11, %v749_v45  ;;  %v750_v52 = vmax.f32 %v663_v46, 0.0 }
 0x1bb   : > { %789 = vst.msk [vmem:[#allocation2 + $0x25] sm:$0xf8] %vm788_vm12, %v749_v45  ;;  %v10442_v62 = vld [vmem:[#allocation2 + $0x18] sm:$0xff] }
 0x1bc   : > { %791 = vst.msk [vmem:[#allocation2 + $0x2d] sm:$0x3] %vm790_vm13, %v750_v52  ;;  %v10446_v0 = vld [vmem:[#allocation2 + $0x19] sm:$0xff] }
 0x1bd   : > { %793 = vst.msk [vmem:[#allocation2 + $0x2e] sm:$0xfc] %vm792_vm14, %v750_v52  ;;  %v667_v55 = vpop.f32.mrb[12].mxu0 }
 0x1be   : > { %v668_v56 = vadd.f32 %v10406_v18, %v667_v55  ;;  %v8313_v57 = vpop.f32.mrb[13].mxu0 }
 0x1bf   : > { %v670_v58 = vpop.f32.mrb[14].mxu0 }
 0x1c0   : > { %v751_v59 = vmax.f32 %v668_v56, 0.0  ;;  %v671_v60 = vadd.f32 %v10406_v18, %v670_v58  ;;  %v8314_v61 = vpop.f32.mrb[15].mxu0 }
 0x1c1   : > { %v10444_v63 = vld [vmem:[#allocation2 + $0x20] sm:$0xff] }
 0x1c2   : > { %v10448_v1 = vld [vmem:[#allocation2 + $0x21] sm:$0xff]  ;;  %795 = vst.msk [vmem:[#allocation2 + $0x36] sm:$0x1] %vm794_vm15, %v751_v59  ;;  %v752_v2 = vmax.f32 %v671_v60, 0.0 }
 0x1c3   : > { %797 = vst.msk [vmem:[#allocation3] sm:$0xfe] %vm796_vm0, %v751_v59  ;;  %v10460_v12 = vld [vmem:[#allocation2 + $0x28] sm:$0xff] }
 0x1c4   : > { %798 = vst.msk [vmem:[#allocation3 + $0x9] sm:$0x7f] %vm770_vm3, %v752_v2  ;;  %v10466_v15 = vld [vmem:[#allocation2 + $0x29] sm:$0xff] }
 0x1c5   : > { %799 = vst.msk [vmem:[#allocation3 + $0xa] sm:$0x80] %vm772_vm4, %v752_v2  ;;  %v675_v5 = vpop.f32.mrb[16].mxu0  ;;  %v849_v2 = vld [vmem:[#allocation4] sm:$0xff] }
 0x1c6   : > { %v676_v6 = vadd.f32 %v10406_v18, %v675_v5  ;;  %v8317_v7 = vpop.f32.mrb[17].mxu0 }
 0x1c7   : > { %v678_v8 = vpop.f32.mrb[18].mxu0 }
 0x1c8   : > { %v753_v9 = vmax.f32 %v676_v6, 0.0  ;;  %v679_v10 = vadd.f32 %v10406_v18, %v678_v8  ;;  %v8318_v11 = vpop.f32.mrb[19].mxu0 }
 0x1c9   : > { %v10462_v13 = vld [vmem:[#allocation2 + $0x30] sm:$0xff] }
 0x1ca   : > { %800 = vst.msk [vmem:[#allocation3 + $0x12] sm:$0x3f] %vm774_vm5, %v753_v9  ;;  %v754_v14 = vmax.f32 %v679_v10, 0.0  ;;  %v10468_v16 = vld [vmem:[#allocation2 + $0x31] sm:$0xff] }
 0x1cb   : > { %801 = vst.msk [vmem:[#allocation3 + $0x13] sm:$0xc0] %vm776_vm6, %v753_v9  ;;  %v10478_v28 = vld [vmem:[#allocation3 + $0x8] sm:$0xff] }
 0x1cc   : > { %802 = vst.msk [vmem:[#allocation3 + $0x1b] sm:$0x1f] %vm778_vm7, %v754_v14  ;;  %v10482_v30 = vld [vmem:[#allocation3 + $0x9] sm:$0xff] }
 0x1cd   : > { %803 = vst.msk [vmem:[#allocation3 + $0x1c] sm:$0xe0] %vm780_vm8, %v754_v14  ;;  %v683_v21 = vpop.f32.mrb[20].mxu0 }
 0x1ce   : > { %v684_v22 = vadd.f32 %v10406_v18, %v683_v21  ;;  %v8321_v23 = vpop.f32.mrb[21].mxu0 }
 0x1cf   : > { %v686_v24 = vpop.f32.mrb[22].mxu0 }
 0x1d0   : > { %v755_v25 = vmax.f32 %v684_v22, 0.0  ;;  %v687_v26 = vadd.f32 %v10406_v18, %v686_v24  ;;  %v8322_v27 = vpop.f32.mrb[23].mxu0 }
 0x1d1   : > { %v10480_v29 = vld [vmem:[#allocation3 + $0x10] sm:$0xff] }
 0x1d2   : > { %v10484_v31 = vld [vmem:[#allocation3 + $0x11] sm:$0xff]  ;;  %804 = vst.msk [vmem:[#allocation3 + $0x24] sm:$0xf] %vm782_vm9, %v755_v25  ;;  %v756_v32 = vmax.f32 %v687_v26, 0.0 }
 0x1d3   : > { %805 = vst.msk [vmem:[#allocation3 + $0x25] sm:$0xf0] %vm784_vm10, %v755_v25  ;;  %v10496_v42 = vld [vmem:[#allocation3 + $0x18] sm:$0xff] }
 0x1d4   : > { %806 = vst.msk [vmem:[#allocation3 + $0x2d] sm:$0x7] %vm786_vm11, %v756_v32  ;;  %v10500_v44 = vld [vmem:[#allocation3 + $0x19] sm:$0xff] }
 0x1d5   : > { %807 = vst.msk [vmem:[#allocation3 + $0x2e] sm:$0xf8] %vm788_vm12, %v756_v32  ;;  %v691_v35 = vpop.f32.mrb[24].mxu0 }
 0x1d6   : > { %v692_v36 = vadd.f32 %v10406_v18, %v691_v35  ;;  %v8325_v37 = vpop.f32.mrb[25].mxu0 }
 0x1d7   : > { %v694_v38 = vpop.f32.mrb[26].mxu0 }
 0x1d8   : > { %v757_v39 = vmax.f32 %v692_v36, 0.0  ;;  %v695_v40 = vadd.f32 %v10406_v18, %v694_v38  ;;  %v8326_v41 = vpop.f32.mrb[27].mxu0 }
 0x1d9   : > { %v10498_v43 = vld [vmem:[#allocation3 + $0x20] sm:$0xff] }
 0x1da   : > { %v10502_v45 = vld [vmem:[#allocation3 + $0x21] sm:$0xff]  ;;  %808 = vst.msk [vmem:[#allocation3 + $0x36] sm:$0x3] %vm790_vm13, %v757_v39  ;;  %v758_v46 = vmax.f32 %v695_v40, 0.0 }
 0x1db   : > { %809 = vst.msk [vmem:[#allocation4 + $0x6] sm:$0xfc] %vm792_vm14, %v757_v39  ;;  %v10514_v5 = vld [vmem:[#allocation3 + $0x28] sm:$0xff] }
 0x1dc   : > { %810 = vst.msk [vmem:[#allocation4 + $0xe] sm:$0x1] %vm794_vm15, %v758_v46  ;;  %v10522_v9 = vld [vmem:[#allocation3 + $0x29] sm:$0xff] }
 0x1dd   : > { %811 = vst.msk [vmem:[#allocation4 + $0xf] sm:$0xfe] %vm796_vm0, %v758_v46  ;;  %v699_v55 = vpop.f32.mrb[28].mxu0  ;;  %v8861_v46 = vld [vmem:[%s11478_s3 + $0x8] sm:$0xff]  }
 0x1de   : > { %v700_v56 = vadd.f32 %v10406_v18, %v699_v55  ;;  %v8329_v57 = vpop.f32.mrb[29].mxu0 }
 0x1df   : > { %v702_v58 = vpop.f32.mrb[30].mxu0 }
 0x1e0   : > { %v759_v59 = vmax.f32 %v700_v56, 0.0  ;;  %v703_v60 = vadd.f32 %v10406_v18, %v702_v58  ;;  %v8330_v61 = vpop.f32.mrb[31].mxu0 }
 0x1e1   : > { %v10516_v6 = vld [vmem:[#allocation3 + $0x30] sm:$0xff] }
 0x1e2   : > { %v10518_v7 = vld [vmem:[#allocation3 + $0x31] sm:$0xff]  ;;  %812 = vst.msk [vmem:[#allocation4 + $0x18] sm:$0x7f] %vm770_vm3, %v759_v59  ;;  %v760_v8 = vmax.f32 %v703_v60, 0.0 }
 0x1e3   : > { %813 = vst.msk [vmem:[#allocation4 + $0x19] sm:$0x80] %vm772_vm4, %v759_v59  ;;  %v10526_v11 = vld [vmem:[#allocation4 + $0x8] sm:$0xff] }
 0x1e4   : > { %v10528_v14 = vld [vmem:[#allocation4 + $0x10] sm:$0xff]  ;;  %814 = vst.msk [vmem:[#allocation4 + $0x21] sm:$0x3f] %vm774_vm5, %v760_v8  ;;  %v857_v22 = vpack.c.bf16 %v10526_v11, %v849_v2  ;;  %v1156_v60 = vld [vmem:[#allocation4 + $0x1] sm:$0xff] }
 0x1e5   : > { %815 = vst.msk [vmem:[#allocation4 + $0x22] sm:$0xc0] %vm776_vm6, %v760_v8  ;;  %v707_v24 = vpop.f32.mrb[32].mxu0  ;;  %v10542_v38 = vld [vmem:[#allocation4 + $0x9] sm:$0xff] }
 0x1e6   : > { %v708_v25 = vadd.f32 %v10406_v18, %v707_v24  ;;  %v8333_v26 = vpop.f32.mrb[33].mxu0  ;;  %8355 = vmatprep.mubr.msk.bf16.mxu1 %vm425_vm1, %v857_v22  ;;  %v10573_v22 = vld [vmem:[%s11478_s3 + $0x20] sm:$0xff]  }
 0x1e7   : > { %v710_v27 = vpop.f32.mrb[34].mxu0 }
 0x1e8   : > { %v761_v32 = vmax.f32 %v708_v25, 0.0  ;;  %v711_v35 = vadd.f32 %v10406_v18, %v710_v27  ;;  %v8334_v36 = vpop.f32.mrb[35].mxu0 }
 0x1e9   : > { %v10540_v37 = vld [vmem:[#allocation4 + $0x18] sm:$0xff] }
 0x1ea   : > { %v10544_v39 = vld [vmem:[#allocation4 + $0x11] sm:$0xff]  ;;  %816 = vst.msk [vmem:[#allocation4 + $0x2a] sm:$0x1f] %vm778_vm7, %v761_v32  ;;  %v762_v40 = vmax.f32 %v711_v35, 0.0  ;;  %v858_v41 = vpack.c.bf16 %v10540_v37, %v10528_v14  ;;  %v10557_v57 = vld [vmem:[#allocation4 + $0x19] sm:$0xff] }
 0x1eb   : > { %817 = vst.msk [vmem:[#allocation4 + $0x2b] sm:$0xe0] %vm780_vm8, %v761_v32  ;;  %v10555_v56 = vld [vmem:[#allocation4 + $0x20] sm:$0xff] }
 0x1ec   : > { %v10559_v58 = vld [vmem:[#allocation4 + $0x21] sm:$0xff]  ;;  %818 = vst.msk [vmem:[#allocation4 + $0x33] sm:$0xf] %vm782_vm9, %v762_v40  ;;  %8356 = vmatmul.mubr.msk.bf16.vlgmr.msra.gmra.mrb[4].mxu1 %vm425_vm1, %v858_v41 }
 0x1ed   : > { %819 = vst.msk [vmem:[#allocation4 + $0x34] sm:$0xf0] %vm784_vm10, %v762_v40  ;;  %v715_v61 = vpop.f32.mrb[36].mxu0  ;;  %8364 = vmatpush3.bf16.msra.mxu1 %v10403_v17 }
 0x1ee   : > { %v716_v2 = vadd.f32 %v10406_v18, %v715_v61  ;;  %v8337_v8 = vpop.f32.mrb[37].mxu0  ;;  %8365 = vmatprep.subr.bf16.mxu1 %v8861_v46 }
 0x1ef   : > { %v718_v24 = vpop.f32.mrb[38].mxu0 }
 0x1f0   : > { %v763_v25 = vmax.f32 %v716_v2, 0.0  ;;  %v719_v26 = vadd.f32 %v10406_v18, %v718_v24  ;;  %v8338_v27 = vpop.f32.mrb[39].mxu0 }
 0x1f1   : > { %v10576_v32 = vld [vmem:[#allocation4 + $0x28] sm:$0xff]  ;;  %8366 = vmatpush3.bf16.msra.mxu1 %v8861_v46  ;;  %v1164_v46 = vpack.c.bf16 %v10542_v38, %v1156_v60  ;;  %v8868_v60 = vld [vmem:[%s11478_s3 + $0x50] sm:$0xff]  }
 0x1f2   : > { %820 = vst.msk [vmem:[#allocation4 + $0x3c] sm:$0x7] %vm786_vm11, %v763_v25  ;;  %v764_v17 = vmax.f32 %v719_v26, 0.0  ;;  %v859_v35 = vpack.c.bf16 %v10576_v32, %v10555_v56  ;;  %8375 = vmatprep.subr.bf16.mxu1 %v10573_v22  ;;  %v10585_v40 = vld [vmem:[#allocation4 + $0x29] sm:$0xff] }
 0x1f3   : > { %821 = vst.msk [vmem:[#allocation5 + $0x6] sm:$0xf8] %vm788_vm12, %v763_v25  ;;  %v10583_v36 = vld [vmem:[#allocation4 + $0x30] sm:$0xff] }
 0x1f4   : > { %v10587_v41 = vld [vmem:[#allocation4 + $0x31] sm:$0xff]  ;;  %822 = vst.msk [vmem:[#allocation5 + $0xe] sm:$0x3] %vm790_vm13, %v764_v17  ;;  %8359 = vmatprep.mubr.msk.bf16.mxu1 %vm425_vm1, %v859_v35 }
 0x1f5   : > { %823 = vst.msk [vmem:[#allocation5 + $0xf] sm:$0xfc] %vm792_vm14, %v764_v17  ;;  %v723_v2 = vpop.f32.mrb[40].mxu0  ;;  %v833_v17 = vld [vmem:[#allocation5] sm:$0xff] }
 0x1f6   : > { %v724_v8 = vadd.f32 %v10406_v18, %v723_v2  ;;  %v8341_v24 = vpop.f32.mrb[41].mxu0 }
 0x1f7   : > { %v726_v25 = vpop.f32.mrb[42].mxu0 }
 0x1f8   : > { %v765_v26 = vmax.f32 %v724_v8, 0.0  ;;  %v727_v27 = vadd.f32 %v10406_v18, %v726_v25  ;;  %v8342_v20 = vpop.f32.mrb[43].mxu0 }
 0x1f9   : > { %v10598_v4 = vld [vmem:[#allocation4 + $0x38] sm:$0xff] }
 0x1fa   : > { %824 = vst.msk [vmem:[#allocation5 + $0x17] sm:$0x1] %vm794_vm15, %v765_v26  ;;  %v766_v35 = vmax.f32 %v727_v27, 0.0  ;;  %v860_v54 = vpack.c.bf16 %v10598_v4, %v10583_v36 }
 0x1fb   : > { %825 = vst.msk [vmem:[#allocation5 + $0x18] sm:$0xfe] %vm796_vm0, %v765_v26  ;;  %v10604_v21 = vld [vmem:[#allocation5 + $0x8] sm:$0xff] }
 0x1fc   : > { %826 = vst.msk [vmem:[#allocation5 + $0x21] sm:$0x7f] %vm770_vm3, %v766_v35  ;;  %8360 = vmatmul.mubr.msk.bf16.gmra.mrb[8].mxu1 %vm425_vm1, %v860_v54  ;;  %v841_v20 = vpack.c.bf16 %v10604_v21, %v833_v17  ;;  %v10613_v34 = vld [vmem:[#allocation5 + $0x9] sm:$0xff] }
 0x1fd   : > { %827 = vst.msk [vmem:[#allocation5 + $0x22] sm:$0x80] %vm772_vm4, %v766_v35  ;;  %v731_v2 = vpop.f32.mrb[44].mxu0 }
 0x1fe   : > { %v732_v8 = vadd.f32 %v10406_v18, %v731_v2  ;;  %v8345_v24 = vpop.f32.mrb[45].mxu0  ;;  %8367 = vmatprep.mubr.msk.bf16.mxu1 %vm425_vm1, %v841_v20 }
 0x1ff   : > { %v734_v25 = vpop.f32.mrb[46].mxu0 }
 0x200   : > { %v767_v26 = vmax.f32 %v732_v8, 0.0  ;;  %v735_v27 = vadd.f32 %v10406_v18, %v734_v25  ;;  %v8346_v52 = vpop.f32.mrb[47].mxu0  ;;  %v8863_v18 = vld [vmem:[%s11478_s3 + $0x28] sm:$0xff]  }
 0x201   : > { %v10615_v19 = vld [vmem:[#allocation5 + $0x10] sm:$0xff] }
 0x202   : > { %v10617_v35 = vld [vmem:[#allocation5 + $0x18] sm:$0xff]  ;;  %828 = vst.msk [vmem:[#allocation5 + $0x2a] sm:$0x3f] %vm774_vm5, %v767_v26  ;;  %v768_v17 = vmax.f32 %v735_v27, 0.0  ;;  %v1729_v52 = vpack.c.bf16 %v10615_v19, %v10604_v21  ;;  %v1728_v21 = vld [vmem:[#allocation5 + $0x40] sm:$0xff] }
 0x203   : > { %v10619_v54 = vld [vmem:[#allocation5 + $0x11] sm:$0xff]  ;;  %829 = vst.msk [vmem:[#allocation5 + $0x2b] sm:$0xc0] %vm776_vm6, %v767_v26  ;;  %v842_v20 = vpack.c.bf16 %v10617_v35, %v10615_v19  ;;  %v10632_v8 = vld [vmem:[#allocation5 + $0x20] sm:$0xff] }
 0x204   : > { %v10634_v24 = vld [vmem:[#allocation5 + $0x19] sm:$0xff]  ;;  %v10636_v25 = vld [vmem:[#allocation5 + $0x21] sm:$0xff]  ;;  %830 = vst.msk [vmem:[#allocation5 + $0x33] sm:$0x1f] %vm778_vm7, %v768_v17  ;;  %v8878_v19 = vld [vmem:[%s11478_s3 + $0xa0] sm:$0xff]  }
 0x205   : > { %831 = vst.msk [vmem:[#allocation5 + $0x34] sm:$0xe0] %vm780_vm8, %v768_v17  ;;  %8368 = vmatmul.mubr.msk.bf16.vlgmr.msra.gmra.mrb[4].mxu1 %vm425_vm1, %v842_v20  ;;  %v1043_v20 = vld [vmem:[#allocation5 + $0x1] sm:$0xff]  ;;  %v1052_v27 = vpack.c.bf16 %v10634_v24, %v10619_v54 }
 0x206   : > { %8376 = vmatpush3.bf16.msra.mxu1 %v10573_v22  ;;  %v1051_v55 = vpack.c.bf16 %v10613_v34, %v1043_v20 }
 0x207   : > { %8377 = vmatprep.subr.bf16.mxu1 %v8863_v18 }
 0x209   : > { %v10649_v53 = vld [vmem:[#allocation5 + $0x28] sm:$0xff] }
 0x20a   : > { %8378 = vmatpush3.bf16.msra.mxu1 %v8863_v18  ;;  %v843_v17 = vpack.c.bf16 %v10649_v53, %v10632_v8  ;;  %v10653_v10 = vld [vmem:[#allocation5 + $0x29] sm:$0xff] }
 0x20b   : > { %8387 = vmatprep.subr.bf16.mxu1 %v8864_v3  ;;  %v10655_v47 = vld [vmem:[#allocation5 + $0x30] sm:$0xff]  ;;  %v1053_v2 = vpack.c.bf16 %v10653_v10, %v10636_v25 }
 0x20c   : > { %v10657_v33 = vld [vmem:[#allocation5 + $0x38] sm:$0xff]  ;;  %8371 = vmatprep.mubr.msk.bf16.mxu1 %vm425_vm1, %v843_v17  ;;  %v8865_v17 = vld [vmem:[%s11478_s3 + $0x38] sm:$0xff]  }
 0x20d   : > { %v10659_v22 = vld [vmem:[#allocation5 + $0x31] sm:$0xff]  ;;  %v844_v61 = vpack.c.bf16 %v10657_v33, %v10655_v47 }
 0x20f   : > { %8372 = vmatmul.mubr.msk.bf16.gmra.mrb[8].mxu1 %vm425_vm1, %v844_v61  ;;  %v10683_v61 = vld [vmem:[#allocation5 + $0x39] sm:$0xff] }
 0x210   : > { %8379 = vmatprep.mubr.msk.bf16.mxu1 %vm425_vm1, %v1051_v55  ;;  %v8866_v55 = vld [vmem:[%s11478_s3 + $0x40] sm:$0xff]   ;;  %v1054_v20 = vpack.c.bf16 %v10683_v61, %v10659_v22 }
 0x217   : > { %8380 = vmatmul.mubr.msk.bf16.vlgmr.msra.gmra.mrb[4].mxu1 %vm425_vm1, %v1052_v27  ;;  %v1166_v27 = vpack.c.bf16 %v10585_v40, %v10559_v58 }
 0x218   : > { %8388 = vmatpush3.bf16.msra.mxu1 %v8864_v3  ;;  %8383 = vmatprep.mubr.msk.bf16.mxu1 %vm425_vm1, %v1053_v2  ;;  %v1165_v3 = vpack.c.bf16 %v10557_v57, %v10544_v39  ;;  %v8867_v2 = vld [vmem:[%s11478_s3 + $0x48] sm:$0xff]  }
 0x219   : > { %8389 = vmatprep.subr.bf16.mxu1 %v8865_v17 }
 0x21c   : > { %8390 = vmatpush3.bf16.msra.mxu1 %v8865_v17 }
 0x21d   : > { %8399 = vmatprep.subr.bf16.mxu1 %v8866_v55 }
 0x21f   : > { %8384 = vmatmul.mubr.msk.bf16.gmra.mrb[8].mxu1 %vm425_vm1, %v1054_v20  ;;  %v1269_v20 = vld [vmem:[#allocation3] sm:$0xff] }
 0x220   : > { %8391 = vmatprep.mubr.msk.bf16.mxu1 %vm425_vm1, %v1164_v46  ;;  %v10702_v46 = vld [vmem:[#allocation4 + $0x39] sm:$0xff]  ;;  %v1277_v59 = vpack.c.bf16 %v10478_v28, %v1269_v20 }
 0x221   : > { %v1167_v17 = vpack.c.bf16 %v10702_v46, %v10587_v41  ;;  %v1382_v20 = vld [vmem:[#allocation2] sm:$0xff] }
 0x222   : > { %v1390_v23 = vpack.c.bf16 %v10424_v48, %v1382_v20  ;;  %v1495_v20 = vld [vmem:[#allocation3 + $0x1] sm:$0xff] }
 0x223   : > { %v1503_v18 = vpack.c.bf16 %v10482_v30, %v1495_v20  ;;  %v1608_v20 = vld [vmem:[#allocation2 + $0x1] sm:$0xff] }
 0x224   : > { %v1616_v26 = vpack.c.bf16 %v10428_v50, %v1608_v20  ;;  %v11512_v20 = vpack.c.bf16 %v10632_v8, %v10617_v35  ;;  %v11514_v35 = vpack.c.bf16 %v10528_v14, %v10526_v11  ;;  %v8880_v11 = vld [vmem:[%s11478_s3 + $0xb0] sm:$0xff]   ;;  %v1841_v14 = vld [vmem:[#allocation4 + $0x40] sm:$0xff] }
 0x225   : > { %v1845_v8 = vpack.c.bf16 %v1841_v14, %v10598_v4  ;;  %v11519_v4 = vpack.c.bf16 %v10659_v22, %v10653_v10  ;;  %v8883_v10 = vld [vmem:[%s11478_s3 + $0xc8] sm:$0xff]   ;;  %v11522_v22 = vpack.c.bf16 %v10587_v41, %v10585_v40  ;;  %v11524_v40 = vpack.c.bf16 %v10498_v43, %v10496_v42  ;;  %v8917_v14 = vld [vmem:[#allocation13 + $0x690] ss:$8 sps:$4 sm:$0xff]  }
 0x226   : > { %v11525_v41 = vpack.c.bf16 %v10516_v6, %v10514_v5 }
 0x227   : > { %8392 = vmatmul.mubr.msk.bf16.vlgmr.msra.gmra.mrb[4].mxu1 %vm425_vm1, %v1165_v3  ;;  %v8869_v3 = vld [vmem:[%s11478_s3 + $0x58] sm:$0xff]  }
 0x228   : > { %8400 = vmatpush3.bf16.msra.mxu1 %v8866_v55  ;;  %8395 = vmatprep.mubr.msk.bf16.mxu1 %vm425_vm1, %v1166_v27  ;;  %v1278_v55 = vpack.c.bf16 %v10496_v42, %v10480_v29  ;;  %v10721_v27 = vld [vmem:[#allocation3 + $0x38] sm:$0xff]  ;;  %v11526_v42 = vpack.c.bf16 %v10426_v49, %v10424_v48  ;;  %v8888_v48 = vld [vmem:[%s11478_s3 + $0xf0] sm:$0xff]  }
 0x229   : > { %8401 = vmatprep.subr.bf16.mxu1 %v8867_v2 }
 0x22c   : > { %8402 = vmatpush3.bf16.msra.mxu1 %v8867_v2  ;;  %v1279_v2 = vpack.c.bf16 %v10514_v5, %v10498_v43  ;;  %v8887_v43 = vld [vmem:[%s11478_s3 + $0xe8] sm:$0xff]   ;;  %v11527_v5 = vpack.c.bf16 %v10444_v63, %v10442_v62 }
 0x22d   : > { %8411 = vmatprep.subr.bf16.mxu1 %v8868_v60 }
 0x22f   : > { %8396 = vmatmul.mubr.msk.bf16.gmra.mrb[8].mxu1 %vm425_vm1, %v1167_v17  ;;  %v1280_v17 = vpack.c.bf16 %v10721_v27, %v10516_v6  ;;  %v11528_v6 = vpack.c.bf16 %v10462_v13, %v10460_v12 }
 0x230   : > { %8403 = vmatprep.mubr.msk.bf16.mxu1 %vm425_vm1, %v1277_v59  ;;  %v8870_v59 = vld [vmem:[%s11478_s3 + $0x60] sm:$0xff]  }
 0x237   : > { %8404 = vmatmul.mubr.msk.bf16.vlgmr.msra.gmra.mrb[4].mxu1 %vm425_vm1, %v1278_v55  ;;  %v8871_v55 = vld [vmem:[%s11478_s3 + $0x68] sm:$0xff]  }
 0x238   : > { %8412 = vmatpush3.bf16.msra.mxu1 %v8868_v60  ;;  %8407 = vmatprep.mubr.msk.bf16.mxu1 %vm425_vm1, %v1279_v2  ;;  %v1391_v60 = vpack.c.bf16 %v10442_v62, %v10426_v49  ;;  %v10740_v2 = vld [vmem:[#allocation2 + $0x38] sm:$0xff]  ;;  %v11529_v62 = vpack.c.bf16 %v10484_v31, %v10482_v30 }
 0x239   : > { %8413 = vmatprep.subr.bf16.mxu1 %v8869_v3 }
 0x23c   : > { %8414 = vmatpush3.bf16.msra.mxu1 %v8869_v3  ;;  %v1392_v3 = vpack.c.bf16 %v10460_v12, %v10444_v63  ;;  %v8889_v63 = vld [vmem:[%s11478_s3 + $0xf8] sm:$0xff]   ;;  %v11530_v12 = vpack.c.bf16 %v10502_v45, %v10500_v44 }
 0x23d   : > { %8423 = vmatprep.subr.bf16.mxu1 %v8870_v59 }
 0x23f   : > { %8408 = vmatmul.mubr.msk.bf16.gmra.mrb[8].mxu1 %vm425_vm1, %v1280_v17  ;;  %v1393_v17 = vpack.c.bf16 %v10740_v2, %v10462_v13  ;;  %v11531_v13 = vpack.c.bf16 %v10518_v7, %v10522_v9 }
 0x240   : > { %8415 = vmatprep.mubr.msk.bf16.mxu1 %vm425_vm1, %v1390_v23  ;;  %v8872_v23 = vld [vmem:[%s11478_s3 + $0x70] sm:$0xff]  }
 0x247   : > { %8416 = vmatmul.mubr.msk.bf16.vlgmr.msra.gmra.mrb[4].mxu1 %vm425_vm1, %v1391_v60  ;;  %v8873_v60 = vld [vmem:[%s11478_s3 + $0x78] sm:$0xff]  }
 0x248   : > { %8424 = vmatpush3.bf16.msra.mxu1 %v8870_v59  ;;  %8419 = vmatprep.mubr.msk.bf16.mxu1 %vm425_vm1, %v1392_v3  ;;  %v1504_v59 = vpack.c.bf16 %v10500_v44, %v10484_v31  ;;  %v10759_v3 = vld [vmem:[#allocation3 + $0x39] sm:$0xff]  ;;  %v11532_v31 = vpack.c.bf16 %v10430_v51, %v10428_v50  ;;  %v11533_v44 = vpack.c.bf16 %v10448_v1, %v10446_v0  ;;  %v8893_v50 = vld [vmem:[#allocation13 + $0x610] ss:$8 sps:$4 sm:$0xff]  }
 0x249   : > { %8425 = vmatprep.subr.bf16.mxu1 %v8871_v55 }
 0x24c   : > { %8426 = vmatpush3.bf16.msra.mxu1 %v8871_v55  ;;  %v1505_v55 = vpack.c.bf16 %v10522_v9, %v10502_v45  ;;  %v11534_v45 = vpack.c.bf16 %v10468_v16, %v10466_v15 }
 0x24d   : > { %8435 = vmatprep.subr.bf16.mxu1 %v8872_v23 }
 0x24f   : > { %8420 = vmatmul.mubr.msk.bf16.gmra.mrb[8].mxu1 %vm425_vm1, %v1393_v17  ;;  %v1506_v17 = vpack.c.bf16 %v10759_v3, %v10518_v7  ;;  %v2519_v7 = vld [vmem:[#allocation2 + $0x41] sm:$0xff] }
 0x250   : > { %8427 = vmatprep.mubr.msk.bf16.mxu1 %vm425_vm1, %v1503_v18  ;;  %v8874_v18 = vld [vmem:[%s11478_s3 + $0x80] sm:$0xff]  }
 0x257   : > { %8428 = vmatmul.mubr.msk.bf16.vlgmr.msra.gmra.mrb[4].mxu1 %vm425_vm1, %v1504_v59  ;;  %v8875_v59 = vld [vmem:[%s11478_s3 + $0x88] sm:$0xff]  }
 0x258   : > { %8436 = vmatpush3.bf16.msra.mxu1 %v8872_v23  ;;  %8431 = vmatprep.mubr.msk.bf16.mxu1 %vm425_vm1, %v1505_v55  ;;  %v1617_v23 = vpack.c.bf16 %v10446_v0, %v10430_v51  ;;  %v10778_v55 = vld [vmem:[#allocation2 + $0x39] sm:$0xff]  ;;  %v8896_v0 = vld [vmem:[#allocation13 + $0x620] ss:$8 sps:$4 sm:$0xff]  }
 0x259   : > { %8437 = vmatprep.subr.bf16.mxu1 %v8873_v60  ;;  %v2523_v9 = vpack.c.bf16 %v2519_v7, %v10778_v55  ;;  %v8895_v51 = vld [vmem:[#allocation13 + $0x614] ss:$8 sps:$4 sm:$0xff]  }
 0x25c   : > { %8438 = vmatpush3.bf16.msra.mxu1 %v8873_v60  ;;  %v1618_v60 = vpack.c.bf16 %v10466_v15, %v10448_v1  ;;  %v8898_v1 = vld [vmem:[#allocation13 + $0x624] ss:$8 sps:$4 sm:$0xff]   ;;  %v8899_v15 = vld [vmem:[#allocation13 + $0x630] ss:$8 sps:$4 sm:$0xff]  }
 0x25d   : > { %8447 = vmatprep.subr.bf16.mxu1 %v8874_v18 }
 0x25f   : > { %8432 = vmatmul.mubr.msk.bf16.gmra.mrb[8].mxu1 %vm425_vm1, %v1506_v17  ;;  %v1619_v17 = vpack.c.bf16 %v10778_v55, %v10468_v16  ;;  %v8901_v16 = vld [vmem:[#allocation13 + $0x634] ss:$8 sps:$4 sm:$0xff]  }
 0x260   : > { %8439 = vmatprep.mubr.msk.bf16.mxu1 %vm425_vm1, %v1616_v26  ;;  %v8876_v26 = vld [vmem:[%s11478_s3 + $0x90] sm:$0xff]   ;;  %v8907_v55 = vld [vmem:[#allocation13 + $0x654] ss:$8 sps:$4 sm:$0xff]  }
 0x267   : > { %8440 = vmatmul.mubr.msk.bf16.vlgmr.msra.gmra.mrb[4].mxu1 %vm425_vm1, %v1617_v23  ;;  %v11513_v23 = vpack.c.bf16 %v10655_v47, %v10649_v53  ;;  %v8879_v53 = vld [vmem:[%s11478_s3 + $0xa8] sm:$0xff]   ;;  %v11515_v47 = vpack.c.bf16 %v10555_v56, %v10540_v37  ;;  %v11517_v37 = vpack.c.bf16 %v10619_v54, %v10613_v34  ;;  %v8881_v56 = vld [vmem:[%s11478_s3 + $0xb8] sm:$0xff]   ;;  %v8882_v34 = vld [vmem:[%s11478_s3 + $0xc0] sm:$0xff]  }
 0x268   : > { %8448 = vmatpush3.bf16.msra.mxu1 %v8874_v18  ;;  %8443 = vmatprep.mubr.msk.bf16.mxu1 %vm425_vm1, %v1618_v60  ;;  %v8877_v18 = vld [vmem:[%s11478_s3 + $0x98] sm:$0xff]  }
 0x269   : > { %8449 = vmatprep.subr.bf16.mxu1 %v8875_v59  ;;  %v8904_v60 = vld [vmem:[#allocation13 + $0x644] ss:$8 sps:$4 sm:$0xff]  }
 0x26c   : > { %8450 = vmatpush3.bf16.msra.mxu1 %v8875_v59  ;;  %v8892_v59 = vld [vmem:[#allocation13 + $0x604] ss:$8 sps:$4 sm:$0xff]  }
 0x26d   : > { %8459 = vmatprep.subr.bf16.mxu1 %v8876_v26  ;;  %6769 = vmatprep.subr.bf16.mxu0 %v8892_v59 }
 0x26f   : > { %8444 = vmatmul.mubr.msk.bf16.gmra.mrb[8].mxu1 %vm425_vm1, %v1619_v17  ;;  %v8923_v17 = vld [vmem:[#allocation13] ss:$8 sps:$4 sm:$0xff]  }
 0x270   : > { %8451 = vmatprep.mubr.msk.bf16.mxu1 %vm425_vm1, %v1729_v52  ;;  %v1732_v52 = vpack.c.bf16 %v1728_v21, %v10657_v33  ;;  %v11516_v33 = vpack.c.bf16 %v10583_v36, %v10576_v32  ;;  %v11518_v32 = vpack.c.bf16 %v10636_v25, %v10634_v24  ;;  %v1954_v36 = vld [vmem:[#allocation5 + $0x41] sm:$0xff]  ;;  %v11520_v24 = vpack.c.bf16 %v10544_v39, %v10542_v38  ;;  %v2067_v39 = vld [vmem:[#allocation4 + $0x41] sm:$0xff] }
 0x271   : > { %v1958_v54 = vpack.c.bf16 %v1954_v36, %v10683_v61  ;;  %v11521_v25 = vpack.c.bf16 %v10559_v58, %v10557_v57  ;;  %v8884_v38 = vld [vmem:[%s11478_s3 + $0xd0] sm:$0xff]   ;;  %v2071_v61 = vpack.c.bf16 %v2067_v39, %v10702_v46  ;;  %v11523_v57 = vpack.c.bf16 %v10480_v29, %v10478_v28  ;;  %v8885_v58 = vld [vmem:[%s11478_s3 + $0xd8] sm:$0xff]   ;;  %v8886_v28 = vld [vmem:[%s11478_s3 + $0xe0] sm:$0xff]  }
 0x272   : > { %v2180_v46 = vld [vmem:[#allocation3 + $0x40] sm:$0xff]  ;;  %v8929_v21 = vld [vmem:[#allocation13 + $0x10] ss:$8 sps:$4 sm:$0xff]  }
 0x273   : > { %v2184_v29 = vpack.c.bf16 %v2180_v46, %v10721_v27  ;;  %v2293_v27 = vld [vmem:[#allocation2 + $0x40] sm:$0xff] }
 0x274   : > { %v2297_v49 = vpack.c.bf16 %v2293_v27, %v10740_v2  ;;  %v2406_v2 = vld [vmem:[#allocation3 + $0x41] sm:$0xff] }
 0x275   : > { %v2410_v30 = vpack.c.bf16 %v2406_v2, %v10759_v3  ;;  %v8890_v3 = vld [vmem:[#allocation13 + $0x600] ss:$8 sps:$4 sm:$0xff]  }
 0x276   : > { %6770 = vmatpush1.bf16.msra.mxu0 %v8890_v3 }
 0x277   : > { %8452 = vmatmul.mubr.msk.bf16.vlgmr.msra.gmra.mrb[4].mxu1 %vm425_vm1, %v11512_v20  ;;  %6771 = vmatprep.subr.bf16.mxu0 %v8895_v51  ;;  %v8905_v20 = vld [vmem:[#allocation13 + $0x650] ss:$8 sps:$4 sm:$0xff]  }
 0x278   : > { %8460 = vmatpush3.bf16.msra.mxu1 %v8876_v26  ;;  %8455 = vmatprep.mubr.msk.bf16.mxu1 %vm425_vm1, %v11513_v23  ;;  %v8902_v26 = vld [vmem:[#allocation13 + $0x640] ss:$8 sps:$4 sm:$0xff]   ;;  %v8931_v23 = vld [vmem:[#allocation13 + $0x14] ss:$8 sps:$4 sm:$0xff]  }
 0x279   : > { %8461 = vmatprep.subr.bf16.mxu1 %v8877_v18 }
 0x27a   : > { %6772 = vmatpush1.bf16.msra.mxu0 %v8893_v50 }
 0x27b   : > { %6773 = vmatprep.subr.bf16.mxu0 %v8898_v1 }
 0x27c   : > { %8462 = vmatpush3.bf16.msra.mxu1 %v8877_v18  ;;  %v8925_v18 = vld [vmem:[#allocation13 + $0x4] ss:$8 sps:$4 sm:$0xff]  }
 0x27d   : > { %8471 = vmatprep.subr.bf16.mxu1 %v8878_v19 }
 0x27e   : > { %6774 = vmatpush1.bf16.msra.mxu0 %v8896_v0 }
 0x27f   : > { %8456 = vmatmul.mubr.msk.bf16.gmra.mrb[8].mxu1 %vm425_vm1, %v1732_v52  ;;  %6775 = vmatprep.subr.bf16.mxu0 %v8901_v16  ;;  %v8908_v52 = vld [vmem:[#allocation13 + $0x660] ss:$8 sps:$4 sm:$0xff]  }
 0x280   : > { %8463 = vmatprep.mubr.msk.bf16.mxu1 %vm425_vm1, %v11514_v35  ;;  %v8913_v35 = vld [vmem:[#allocation13 + $0x674] ss:$8 sps:$4 sm:$0xff]   ;;  %v8932_v16 = vld [vmem:[#allocation13 + $0x20] ss:$8 sps:$4 sm:$0xff]  }
 0x282   : > { %6776 = vmatpush1.bf16.msra.mxu0 %v8899_v15 }
 0x283   : > { %6777 = vmatprep.subr.bf16.mxu0 %v8904_v60  ;;  %v8934_v60 = vld [vmem:[#allocation13 + $0x24] ss:$8 sps:$4 sm:$0xff]  }
 0x286   : > { %6778 = vmatpush1.bf16.msra.mxu0 %v8902_v26 }
 0x287   : > { %8464 = vmatmul.mubr.msk.bf16.vlgmr.msra.gmra.mrb[4].mxu1 %vm425_vm1, %v11515_v47  ;;  %6779 = vmatprep.subr.bf16.mxu0 %v8907_v55  ;;  %v8916_v47 = vld [vmem:[#allocation13 + $0x684] ss:$8 sps:$4 sm:$0xff]  }
 0x288   : > { %8472 = vmatpush3.bf16.msra.mxu1 %v8878_v19  ;;  %8467 = vmatprep.mubr.msk.bf16.mxu1 %vm425_vm1, %v11516_v33  ;;  %v8910_v19 = vld [vmem:[#allocation13 + $0x664] ss:$8 sps:$4 sm:$0xff]   ;;  %v8914_v33 = vld [vmem:[#allocation13 + $0x680] ss:$8 sps:$4 sm:$0xff]  }
 0x289   : > { %8473 = vmatprep.subr.bf16.mxu1 %v8879_v53 }
 0x28a   : > { %6780 = vmatpush1.bf16.msra.mxu0 %v8905_v20 }
 0x28b   : > { %6781 = vmatprep.subr.bf16.mxu0 %v8910_v19  ;;  %v8937_v19 = vld [vmem:[#allocation13 + $0x6c4] ss:$8 sps:$4 sm:$0xff]  }
 0x28c   : > { %8474 = vmatpush3.bf16.msra.mxu1 %v8879_v53  ;;  %v8911_v53 = vld [vmem:[#allocation13 + $0x670] ss:$8 sps:$4 sm:$0xff]  }
 0x28d   : > { %8483 = vmatprep.subr.bf16.mxu1 %v8880_v11 }
 0x28e   : > { %6782 = vmatpush1.bf16.msra.mxu0 %v8908_v52 }
 0x28f   : > { %8468 = vmatmul.mubr.msk.bf16.gmra.mrb[8].mxu1 %vm425_vm1, %v1845_v8  ;;  %6783 = vmatprep.subr.bf16.mxu0 %v8913_v35  ;;  %v8922_v8 = vld [vmem:[#allocation13 + $0x6a4] ss:$8 sps:$4 sm:$0xff]  }
 0x290   : > { %8475 = vmatprep.mubr.msk.bf16.mxu1 %vm425_vm1, %v11517_v37  ;;  %v8920_v37 = vld [vmem:[#allocation13 + $0x6a0] ss:$8 sps:$4 sm:$0xff]  }
 0x292   : > { %6784 = vmatpush1.bf16.msra.mxu0 %v8911_v53 }
 0x293   : > { %6785 = vmatprep.subr.bf16.mxu0 %v8916_v47 }
 0x296   : > { %6786 = vmatpush1.bf16.msra.mxu0 %v8914_v33 }
 0x297   : > { %8476 = vmatmul.mubr.msk.bf16.vlgmr.msra.gmra.mrb[4].mxu1 %vm425_vm1, %v11518_v32  ;;  %v8926_v32 = vld [vmem:[#allocation13 + $0x6b0] ss:$8 sps:$4 sm:$0xff]  }
 0x298   : > { %8484 = vmatpush3.bf16.msra.mxu1 %v8880_v11  ;;  %8479 = vmatprep.mubr.msk.bf16.mxu1 %vm425_vm1, %v11519_v4  ;;  %v8919_v11 = vld [vmem:[#allocation13 + $0x694] ss:$8 sps:$4 sm:$0xff]   ;;  %v2648_v4 = vlaneseq }
 0x299   : > { %8485 = vmatprep.subr.bf16.mxu1 %v8881_v56  ;;  %6787 = vmatprep.subr.bf16.mxu0 %v8919_v11 }
 0x29a   : > { %6788 = vmatpush1.bf16.msra.mxu0 %v8917_v14  ;;  %vm2679_vm2 = vcmp.ge.s32.totalorder %v2648_v4, 64  ;;  %vm2680_vm3 = vcmp.lt.s32.totalorder %v2648_v4, 128 }
 0x29b   : > { %6789 = vmatprep.subr.bf16.mxu0 %v8922_v8  ;;  %vm11194_vm4 = vmand %vm2679_vm2, %vm2680_vm3 }
 0x29c   : > { %8486 = vmatpush3.bf16.msra.mxu1 %v8881_v56  ;;  %v8928_v56 = vld [vmem:[#allocation13 + $0x6b4] ss:$8 sps:$4 sm:$0xff]  }
 0x29d   : > { %8495 = vmatprep.subr.bf16.mxu1 %v8882_v34 }
 0x29e   : > { %6790 = vmatpush1.bf16.msra.mxu0 %v8920_v37 }
 0x29f   : > { %8480 = vmatmul.mubr.msk.bf16.gmra.mrb[8].mxu1 %vm425_vm1, %v1958_v54  ;;  %6791 = vmatprep.subr.bf16.mxu0 %v8928_v56 }
 0x2a0   : > { %8487 = vmatprep.mubr.msk.bf16.mxu1 %vm425_vm1, %v11520_v24  ;;  %v10935_v24 = vshrl.u32 %v2648_v4, 7 }
 0x2a2   : > { %6792 = vmatpush1.bf16.msra.mxu0 %v8926_v32 }
 0x2a3   : > { %6793 = vmatprep.subr.bf16.mxu0 %v8937_v19 }
 0x2a7   : > { %8488 = vmatmul.mubr.msk.bf16.vlgmr.msra.gmra.mrb[4].mxu1 %vm425_vm1, %v11521_v25 }
 0x2a8   : > { %8496 = vmatpush3.bf16.msra.mxu1 %v8882_v34  ;;  %8491 = vmatprep.mubr.msk.bf16.mxu1 %vm425_vm1, %v11522_v22  ;;  %v9965_v34 = vmov 1966171168  }
 0x2a9   : > { %8497 = vmatprep.subr.bf16.mxu1 %v8883_v10  ;;  %v2655_v36 = vunpack.c.l.s4 %v9965_v34  ;;  %v8938_v34 = vld [vmem:[#allocation13 + $0x30] ss:$8 sps:$4 sm:$0xff]  }
 0x2ab   : > { %v2656_v54 = vunpack.c.0.s8 %v2655_v36  ;;  %v8940_v36 = vld [vmem:[#allocation13 + $0x34] ss:$8 sps:$4 sm:$0xff]  }
 0x2ac   : > { %8498 = vmatpush3.bf16.msra.mxu1 %v8883_v10  ;;  %v10937_v10 = vld [vmem:[#allocation12] ss:$0 sm:$0xff] }
 0x2ad   : > { %8507 = vmatprep.subr.bf16.mxu1 %v8884_v38  ;;  %v10941_v39 = vsub.s32 %v2656_v54, %v10935_v24 }
 0x2af   : > { %8492 = vmatmul.mubr.msk.bf16.gmra.mrb[8].mxu1 %vm425_vm1, %v2071_v61 }
 0x2b0   : > { %8499 = vmatprep.mubr.msk.bf16.mxu1 %vm425_vm1, %v11523_v57 }
 0x2b7   : > { %8500 = vmatmul.mubr.msk.bf16.vlgmr.msra.gmra.mrb[4].mxu1 %vm425_vm1, %v11524_v40 }
 0x2b8   : > { %8508 = vmatpush3.bf16.msra.mxu1 %v8884_v38  ;;  %8503 = vmatprep.mubr.msk.bf16.mxu1 %vm425_vm1, %v11525_v41 }
 0x2b9   : > { %8509 = vmatprep.subr.bf16.mxu1 %v8885_v58 }
 0x2bc   : > { %8510 = vmatpush3.bf16.msra.mxu1 %v8885_v58 }
 0x2bd   : > { %8519 = vmatprep.subr.bf16.mxu1 %v8886_v28 }
 0x2bf   : > { %8504 = vmatmul.mubr.msk.bf16.gmra.mrb[8].mxu1 %vm425_vm1, %v2184_v29 }
 0x2c0   : > { %8511 = vmatprep.mubr.msk.bf16.mxu1 %vm425_vm1, %v11526_v42 }
 0x2c7   : > { %8512 = vmatmul.mubr.msk.bf16.vlgmr.msra.gmra.mrb[4].mxu1 %vm425_vm1, %v11527_v5 }
 0x2c8   : > { %8520 = vmatpush3.bf16.msra.mxu1 %v8886_v28  ;;  %8515 = vmatprep.mubr.msk.bf16.mxu1 %vm425_vm1, %v11528_v6 }
 0x2c9   : > { %8521 = vmatprep.subr.bf16.mxu1 %v8887_v43 }
 0x2cc   : > { %8522 = vmatpush3.bf16.msra.mxu1 %v8887_v43 }
 0x2cd   : > { %8531 = vmatprep.subr.bf16.mxu1 %v8888_v48 }
 0x2cf   : > { %8516 = vmatmul.mubr.msk.bf16.gmra.mrb[8].mxu1 %vm425_vm1, %v2297_v49 }
 0x2d0   : > { %8523 = vmatprep.mubr.msk.bf16.mxu1 %vm425_vm1, %v11529_v62 }
 0x2d7   : > { %8524 = vmatmul.mubr.msk.bf16.vlgmr.msra.gmra.mrb[4].mxu1 %vm425_vm1, %v11530_v12 }
 0x2d8   : > { %8532 = vmatpush3.bf16.msra.mxu1 %v8888_v48  ;;  %8527 = vmatprep.mubr.msk.bf16.mxu1 %vm425_vm1, %v11531_v13 }
 0x2d9   : > { %8533 = vmatprep.subr.bf16.mxu1 %v8889_v63 }
 0x2dc   : > { %8534 = vmatpush3.bf16.msra.mxu1 %v8889_v63 }
 0x2dd   : > { %6523 = vmatprep.subr.bf16.mxu1 %v8925_v18 }
 0x2df   : > { %8528 = vmatmul.mubr.msk.bf16.gmra.mrb[8].mxu1 %vm425_vm1, %v2410_v30 }
 0x2e0   : > { %8535 = vmatprep.mubr.msk.bf16.mxu1 %vm425_vm1, %v11532_v31 }
 0x2e7   : > { %8536 = vmatmul.mubr.msk.bf16.vlgmr.msra.gmra.mrb[4].mxu1 %vm425_vm1, %v11533_v44 }
 0x2e8   : > { %8539 = vmatprep.mubr.msk.bf16.mxu1 %vm425_vm1, %v11534_v45  ;;  %6524 = vmatpush1.bf16.msra.mxu1 %v8923_v17 }
 0x2e9   : > { %6525 = vmatprep.subr.bf16.mxu1 %v8931_v23  ;;  %v8935_v23 = vld [vmem:[#allocation13 + $0x6c0] ss:$8 sps:$4 sm:$0xff]  }
 0x2ea   : > { %6794 = vmatpush1.bf16.msra.mxu0 %v8935_v23 }
 0x2ec   : > { %6526 = vmatpush1.bf16.msra.mxu1 %v8929_v21 }
 0x2ed   : > { %6527 = vmatprep.subr.bf16.mxu1 %v8934_v60 }
 0x2ef   : > { %8540 = vmatmul.mubr.msk.bf16.gmra.mrb[8].mxu1 %vm425_vm1, %v2523_v9  ;;  %vm10944_vm1 = vcmp.lt.s32.totalorder %v2648_v4, 64 }
 0x2f0   : > { %6528 = vmatpush1.bf16.msra.mxu1 %v8932_v16 }
 0x2f1   : > { %6529 = vmatprep.subr.bf16.mxu1 %v8940_v36 }
 0x2f4   : > { %6530 = vmatpush1.bf16.msra.mxu1 %v8938_v34  ;;  %v8961_v34 = vld [vmem:[#allocation13 + $0x74] ss:$8 sps:$4 sm:$0xff]  }
 0x3ba   : > { %v8537_v25 = vpop.f32.mrb[4].mxu1 }
 0x3bb   : > { %v2634_v22 = vadd.f32 %v8537_v25, %v10937_v10  ;;  %v2586_v38 = vpop.f32.mrb[5].mxu1 }
 0x3bc   : > { %v2632_v57 = vadd.f32 %v10937_v10, %v2586_v38  ;;  %v8538_v58 = vpop.f32.mrb[6].mxu1 }
 0x3bd   : > { %v10949_v40 = vmax.f32 %v2634_v22, 0.0  ;;  %v2635_v41 = vadd.f32 %v8538_v58, %v10937_v10  ;;  %v2589_v46 = vpop.f32.mrb[7].mxu1  ;;  %v8943_v58 = vld [vmem:[#allocation13 + $0x6d4] ss:$8 sps:$4 sm:$0xff]  }
 0x3be   : > { %v2640_v28 = vmax.f32 %v2632_v57, 0.0  ;;  %v2633_v29 = vadd.f32 %v10937_v10, %v2589_v46  ;;  %v8941_v57 = vld [vmem:[#allocation13 + $0x6d0] ss:$8 sps:$4 sm:$0xff]   ;;  %6795 = vmatprep.subr.bf16.mxu0 %v8943_v58 }
 0x3bf   : > { %2801 = vst.msk [vmem:[#allocation6 + $0x8] sm:$0x1] %vm10944_vm1, %v10949_v40  ;;  %v2643_v42 = vmax.f32 %v2635_v41, 0.0  ;;  %v2809_v43 = vrot.slane %v10949_v40, %v10941_v39  ;;  %v2837_v5 = vcombine.high %v10949_v40, %v10949_v40  ;;  %6796 = vmatpush1.bf16.msra.mxu0 %v8941_v57  ;;  %v8959_v58 = vld [vmem:[#allocation13 + $0x70] ss:$8 sps:$4 sm:$0xff]  }
 0x3c0   : > { %2652 = vst.msk [vmem:[#allocation6] sm:$0x1] %vm10944_vm1, %v2640_v28  ;;  %v10963_v6 = vrot.slane %v2640_v28, %v10941_v39  ;;  %v2691_v27 = vcombine.high %v2640_v28, %v2640_v28  ;;  %v2641_v48 = vmax.f32 %v2633_v29, 0.0 }
 0x3c1   : > { %2874 = vst.msk [vmem:[#allocation6 + $0xc] sm:$0x1] %vm10944_vm1, %v2643_v42  ;;  %v10968_v49 = vrot.slane %v2643_v42, %v10941_v39  ;;  %v2910_v62 = vcombine.high %v2643_v42, %v2643_v42  ;;  %v2810_v63 = vcombine.high %v2809_v43, %v2809_v43  ;;  %v10971_v12 = vrot.slane %v2809_v43, %v10941_v39 }
 0x3c2   : > { %v2668_v13 = vrot.slane %v10963_v6, %v10941_v39  ;;  %v10976_v2 = vrot.slane %v2691_v27, %v10941_v39  ;;  %2728 = vst.msk [vmem:[#allocation6 + $0x4] sm:$0x1] %vm10944_vm1, %v2641_v48  ;;  %v10981_v30 = vrot.slane %v2641_v48, %v10941_v39  ;;  %v2764_v31 = vcombine.high %v2641_v48, %v2641_v48  ;;  %v8541_v44 = vpop.f32.mrb[8].mxu1 }
 0x3c3   : > { %v2890_v45 = vrot.slane %v10968_v49, %v10941_v39  ;;  %v10986_v7 = vrot.slane %v2910_v62, %v10941_v39  ;;  %v2638_v9 = vadd.f32 %v8541_v44, %v10937_v10  ;;  %v2602_v3 = vpop.f32.mrb[9].mxu1  ;;  %v2824_v59 = vrot.slane %v2810_v63, %v10941_v39  ;;  %v8944_v63 = vld [vmem:[#allocation13 + $0x40] ss:$8 sps:$4 sm:$0xff]  }
 0x3c4   : > { %v2683_v50 = vcombine.high %v2668_v13, %v2668_v13  ;;  %v2705_v51 = vrot.slane %v10976_v2, %v10941_v39  ;;  %v2744_v0 = vrot.slane %v10981_v30, %v10941_v39  ;;  %v10995_v1 = vrot.slane %v2764_v31, %v10941_v39  ;;  %v8542_v15 = vpop.f32.mrb[10].mxu1 }
 0x3c5   : > { %v2902_v26 = vcombine.high %v2890_v45, %v2890_v45  ;;  %v2924_v55 = vrot.slane %v10986_v7, %v10941_v39  ;;  %v2646_v17 = vmax.f32 %v2638_v9, 0.0  ;;  %v2636_v18 = vadd.f32 %v10937_v10, %v2602_v3  ;;  %2825 = vrot.lane.b32.xlu0 %v2824_v59, %s9966_s26  ;;  %v2605_v20 = vpop.f32.mrb[11].mxu1 }
 0x3c6   : > { %v2720_v21 = vcombine.high %v2705_v51, %v2705_v51  ;;  %2685 = vst.msk [vmem:[#allocation6 + $0x1] sm:$0x1] %vm10944_vm1, %v2683_v50  ;;  %2707 = vst.msk [vmem:[#allocation6 + $0x2] sm:$0x1] %vm10944_vm1, %v2705_v51  ;;  %v2756_v52 = vcombine.high %v2744_v0, %v2744_v0  ;;  %v2778_v35 = vrot.slane %v10995_v1, %v10941_v39 }
 0x3c7   : > { %v2639_v53 = vadd.f32 %v8542_v15, %v10937_v10  ;;  %v2939_v47 = vcombine.high %v2924_v55, %v2924_v55  ;;  %2904 = vst.msk [vmem:[#allocation6 + $0xd] sm:$0x1] %vm10944_vm1, %v2902_v26  ;;  %2926 = vst.msk [vmem:[#allocation6 + $0xe] sm:$0x1] %vm10944_vm1, %v2924_v55  ;;  %v11015_v33 = vrot.slane %v2646_v17, %v10941_v39  ;;  %v2644_v14 = vmax.f32 %v2636_v18, 0.0 }
 0x3c8   : > { %3093 = vst.msk [vmem:[#allocation6 + $0x18] sm:$0x1] %vm10944_vm1, %v2646_v17  ;;  %v3129_v11 = vcombine.high %v2646_v17, %v2646_v17  ;;  %2722 = vst.msk [vmem:[#allocation6 + $0x3] sm:$0x1] %vm10944_vm1, %v2720_v21  ;;  %v2793_v8 = vcombine.high %v2778_v35, %v2778_v35  ;;  %v2829_v56 = vcombine.high %v10971_v12, %v10971_v12  ;;  %v8946_v12 = vld [vmem:[#allocation13 + $0x44] ss:$8 sps:$4 sm:$0xff]  }
 0x3c9   : > { %2758 = vst.msk [vmem:[#allocation6 + $0x5] sm:$0x1] %vm10944_vm1, %v2756_v52  ;;  %2780 = vst.msk [vmem:[#allocation6 + $0x6] sm:$0x1] %vm10944_vm1, %v2778_v35  ;;  %v2647_v37 = vmax.f32 %v2639_v53, 0.0  ;;  %v2832_v32 = vcombine.high %v2824_v59, %v2824_v59  ;;  %v3109_v54 = vrot.slane %v11015_v33, %v10941_v39  ;;  %v11035_v22 = vrot.slane %v2644_v14, %v10941_v39 }
 0x3ca   : > { %2941 = vst.msk [vmem:[#allocation6 + $0xf] sm:$0x1] %vm10944_vm1, %v2939_v47  ;;  %v11030_v25 = vrot.slane %v3129_v11, %v10941_v39  ;;  %2947 = vst.msk [vmem:[#allocation6 + $0x10] sm:$0x1] %vm10944_vm1, %v2644_v14  ;;  %v2983_v38 = vcombine.high %v2644_v14, %v2644_v14  ;;  %v2637_v28 = vadd.f32 %v10937_v10, %v2605_v20  ;;  %6531 = vmatprep.subr.bf16.mxu1 %v8946_v12  ;;  %v8949_v17 = vld [vmem:[#allocation13 + $0x54] ss:$8 sps:$4 sm:$0xff]  }
 0x3cb   : > { %2795 = vst.msk [vmem:[#allocation6 + $0x7] sm:$0x1] %vm10944_vm1, %v2793_v8  ;;  %3166 = vst.msk [vmem:[#allocation6 + $0x1c] sm:$0x1] %vm10944_vm1, %v2647_v37  ;;  %v11042_v41 = vrot.slane %v2647_v37, %v10941_v39  ;;  %v3202_v46 = vcombine.high %v2647_v37, %v2647_v37  ;;  %v2844_v29 = vrot.slane %v2837_v5, %v10941_v39  ;;  %2833 = vrot.lane.b32.xlu0 %v2832_v32, %s9966_s26  ;;  %v8952_v20 = vld [vmem:[#allocation13 + $0x6e4] ss:$8 sps:$4 sm:$0xff]  }
 0x3cc   : > { %2831 = vst.msk [vmem:[#allocation6 + $0x9] sm:$0x1] %vm10944_vm1, %v2829_v56  ;;  %v3121_v42 = vcombine.high %v3109_v54, %v3109_v54  ;;  %v3143_v43 = vrot.slane %v11030_v25, %v10941_v39  ;;  %v2963_v27 = vrot.slane %v11035_v22, %v10941_v39  ;;  %v11057_v48 = vrot.slane %v2983_v38, %v10941_v39  ;;  %v8947_v21 = vld [vmem:[#allocation13 + $0x50] ss:$8 sps:$4 sm:$0xff]   ;;  %v8955_v11 = vld [vmem:[#allocation13 + $0x64] ss:$8 sps:$4 sm:$0xff]  }
 0x3cd   : > { %v3182_v10 = vrot.slane %v11042_v41, %v10941_v39  ;;  %v11062_v62 = vrot.slane %v3202_v46, %v10941_v39  ;;  %v2645_v40 = vmax.f32 %v2637_v28, 0.0  ;;  %v2854_v5 = vcombine.high %v2844_v29, %v2844_v29  ;;  %6532 = vmatpush1.bf16.msra.mxu1 %v8944_v63  ;;  %6797 = vmatprep.subr.bf16.mxu0 %v8952_v20  ;;  %v8958_v14 = vld [vmem:[#allocation13 + $0x6f4] ss:$8 sps:$4 sm:$0xff]   ;;  %v8953_v37 = vld [vmem:[#allocation13 + $0x60] ss:$8 sps:$4 sm:$0xff]  }
 0x3ce   : > { %v3158_v13 = vcombine.high %v3143_v43, %v3143_v43  ;;  %3123 = vst.msk [vmem:[#allocation6 + $0x19] sm:$0x1] %vm10944_vm1, %v3121_v42  ;;  %3145 = vst.msk [vmem:[#allocation6 + $0x1a] sm:$0x1] %vm10944_vm1, %v3143_v43  ;;  %v2975_v31 = vcombine.high %v2963_v27, %v2963_v27  ;;  %v2997_v44 = vrot.slane %v11057_v48, %v10941_v39  ;;  %6533 = vmatprep.subr.bf16.mxu1 %v8949_v17  ;;  %v8956_v32 = vld [vmem:[#allocation13 + $0x6f0] ss:$8 sps:$4 sm:$0xff]  }
 0x3cf   : > { %v2851_v45 = vrot.slane %v2844_v29, %v10941_v39  ;;  %v3194_v9 = vcombine.high %v3182_v10, %v3182_v10  ;;  %v3216_v3 = vrot.slane %v11062_v62, %v10941_v39  ;;  %3020 = vst.msk [vmem:[#allocation6 + $0x14] sm:$0x1] %vm10944_vm1, %v2645_v40  ;;  %v11076_v59 = vrot.slane %v2645_v40, %v10941_v39  ;;  %v8967_v29 = vld [vmem:[#allocation13 + $0x704] ss:$8 sps:$4 sm:$0xff]   ;;  %v8962_v43 = vld [vmem:[#allocation13 + $0x80] ss:$8 sps:$4 sm:$0xff]  }
 0x3d0   : > { %v3056_v50 = vcombine.high %v2645_v40, %v2645_v40  ;;  %3160 = vst.msk [vmem:[#allocation6 + $0x1b] sm:$0x1] %vm10944_vm1, %v3158_v13  ;;  %v3012_v51 = vcombine.high %v2997_v44, %v2997_v44  ;;  %2977 = vst.msk [vmem:[#allocation6 + $0x11] sm:$0x1] %vm10944_vm1, %v2975_v31  ;;  %v2861_v0 = vrot.slane %v2854_v5, %v10941_v39  ;;  %v8970_v27 = vld [vmem:[#allocation13 + $0x94] ss:$8 sps:$4 sm:$0xff]  }
 0x3d1   : > { %2999 = vst.msk [vmem:[#allocation6 + $0x12] sm:$0x1] %vm10944_vm1, %v2997_v44  ;;  %v2866_v15 = vcombine.high %v2851_v45, %v2851_v45  ;;  %2853 = vst.msk [vmem:[#allocation6 + $0xa] sm:$0x1] %vm10944_vm1, %v2851_v45  ;;  %v2883_v16 = vcombine.high %v10968_v49, %v10968_v49  ;;  %v3231_v60 = vcombine.high %v3216_v3, %v3216_v3  ;;  %6534 = vmatpush1.bf16.msra.mxu1 %v8947_v21  ;;  %v8968_v40 = vld [vmem:[#allocation13 + $0x90] ss:$8 sps:$4 sm:$0xff]  }
 0x3d2   : > { %3196 = vst.msk [vmem:[#allocation6 + $0x1d] sm:$0x1] %vm10944_vm1, %v3194_v9  ;;  %3218 = vst.msk [vmem:[#allocation6 + $0x1e] sm:$0x1] %vm10944_vm1, %v3216_v3  ;;  %v3036_v26 = vrot.slane %v11076_v59, %v10941_v39  ;;  %v11096_v55 = vrot.slane %v3056_v50, %v10941_v39  ;;  %2862 = vrot.lane.b32.xlu1 %v2861_v0, %s9966_s26  ;;  %v2927_v18 = vcombine.high %v10986_v7, %v10986_v7  ;;  %v8950_v7 = vld [vmem:[#allocation13 + $0x6e0] ss:$8 sps:$4 sm:$0xff]  }
 0x3d3   : > { %3014 = vst.msk [vmem:[#allocation6 + $0x13] sm:$0x1] %vm10944_vm1, %v3012_v51  ;;  %2868 = vst.msk [vmem:[#allocation6 + $0xb] sm:$0x1] %vm10944_vm1, %v2866_v15  ;;  %v2897_v49 = vrot.slane %v2883_v16, %v10941_v39  ;;  %v2869_v52 = vcombine.high %v2861_v0, %v2861_v0  ;;  %v2956_v47 = vcombine.high %v11035_v22, %v11035_v22  ;;  %6798 = vmatpush1.bf16.msra.mxu0 %v8950_v7  ;;  %v8976_v5 = vld [vmem:[#allocation13 + $0xa4] ss:$8 sps:$4 sm:$0xff]  }
 0x3d4   : > { %3233 = vst.msk [vmem:[#allocation6 + $0x1f] sm:$0x1] %vm10944_vm1, %v3231_v60  ;;  %v3048_v23 = vcombine.high %v3036_v26, %v3036_v26  ;;  %v3070_v19 = vrot.slane %v11096_v55, %v10941_v39  ;;  %v2934_v53 = vrot.slane %v2927_v18, %v10941_v39  ;;  %v3175_v56 = vcombine.high %v11042_v41, %v11042_v41  ;;  %v8964_v41 = vld [vmem:[#allocation13 + $0x84] ss:$8 sps:$4 sm:$0xff]   ;;  %v8974_v31 = vld [vmem:[#allocation13 + $0xa0] ss:$8 sps:$4 sm:$0xff]  }
 0x3d5   : > { %2898 = vrot.lane.b32.xlu0 %v2897_v49, %s9966_s26  ;;  %v2905_v8 = vcombine.high %v2897_v49, %v2897_v49  ;;  %v2970_v36 = vrot.slane %v2956_v47, %v10941_v39  ;;  %v3000_v61 = vcombine.high %v11057_v48, %v11057_v48  ;;  %v3219_v54 = vcombine.high %v11062_v62, %v11062_v62  ;;  %v8982_v44 = vld [vmem:[#allocation13 + $0xb4] ss:$8 sps:$4 sm:$0xff]   ;;  %v8986_v15 = vld [vmem:[#allocation13 + $0xc0] ss:$8 sps:$4 sm:$0xff]  }
 0x3d6   : > { %v3085_v35 = vcombine.high %v3070_v19, %v3070_v19  ;;  %3050 = vst.msk [vmem:[#allocation6 + $0x15] sm:$0x1] %vm10944_vm1, %v3048_v23  ;;  %3072 = vst.msk [vmem:[#allocation6 + $0x16] sm:$0x1] %vm10944_vm1, %v3070_v19  ;;  %2870 = vrot.lane.b32.xlu1 %v2869_v52, %s9966_s26  ;;  %v11131_v22 = vrot.slane %v3175_v56, %v10941_v39  ;;  %6535 = vmatprep.subr.bf16.mxu1 %v8955_v11  ;;  %v8998_v20 = vld [vmem:[#allocation13 + $0xe0] ss:$8 sps:$4 sm:$0xff]  }
 0x3d7   : > { %6799 = vmatprep.subr.bf16.mxu0 %v8958_v14  ;;  %v2942_v38 = vcombine.high %v2934_v53, %v2934_v53  ;;  %v11135_v57 = vrot.slane %v3219_v54, %v10941_v39  ;;  %6536 = vmatpush1.bf16.msra.mxu1 %v8953_v37  ;;  %v3007_v46 = vrot.slane %v3000_v61, %v10941_v39  ;;  %v9004_v52 = vld [vmem:[#allocation13 + $0xf0] ss:$8 sps:$4 sm:$0xff]  }
 0x3d8   : > { %3087 = vst.msk [vmem:[#allocation6 + $0x17] sm:$0x1] %vm10944_vm1, %v3085_v35  ;;  %6800 = vmatpush1.bf16.msra.mxu0 %v8956_v32  ;;  %6537 = vmatprep.subr.bf16.mxu1 %v8961_v34  ;;  %v3029_v28 = vcombine.high %v11076_v59, %v11076_v59  ;;  %v2978_v42 = vcombine.high %v2970_v36, %v2970_v36  ;;  %v8980_v59 = vld [vmem:[#allocation13 + $0xb0] ss:$8 sps:$4 sm:$0xff]  }
 0x3d9   : > { %2935 = vrot.lane.b32.xlu0 %v2934_v53, %s9966_s26  ;;  %6810 = vmatprep.subr.bf16.mxu0 %v8967_v29  ;;  %v3073_v10 = vcombine.high %v11096_v55, %v11096_v55  ;;  %v3015_v62 = vcombine.high %v3007_v46, %v3007_v46  ;;  %v2661_v12 = vcombine.high %v10963_v6, %v10963_v6  ;;  %v8988_v6 = vld [vmem:[#allocation13 + $0xc4] ss:$8 sps:$4 sm:$0xff]   ;;  %v8992_v55 = vld [vmem:[#allocation13 + $0xd0] ss:$8 sps:$4 sm:$0xff]  }
 0x3da   : > { %2906 = vrot.lane.b32.xlu1 %v2905_v8, %s9966_s26  ;;  %v3043_v48 = vrot.slane %v3029_v28, %v10941_v39  ;;  %v2708_v9 = vcombine.high %v10976_v2, %v10976_v2  ;;  %v2737_v51 = vcombine.high %v10981_v30, %v10981_v30  ;;  %v8994_v2 = vld [vmem:[#allocation13 + $0xd4] ss:$8 sps:$4 sm:$0xff]   ;;  %v2781_v60 = vcombine.high %v10995_v1, %v10995_v1  ;;  %v9000_v30 = vld [vmem:[#allocation13 + $0xe4] ss:$8 sps:$4 sm:$0xff]  }
 0x3db   : > { %6538 = vmatpush1.bf16.msra.mxu1 %v8959_v58  ;;  %v3080_v63 = vrot.slane %v3073_v10, %v10941_v39  ;;  %v2675_v45 = vrot.slane %v2661_v12, %v10941_v39  ;;  %v3102_v49 = vcombine.high %v11015_v33, %v11015_v33  ;;  %v9006_v1 = vld [vmem:[#allocation13 + $0xf4] ss:$8 sps:$4 sm:$0xff]   ;;  %v3146_v19 = vcombine.high %v11030_v25, %v11030_v25  ;;  %v9012_v33 = vld [vmem:[#allocation13 + $0x104] ss:$8 sps:$4 sm:$0xff]  }
 0x3dc   : > { %6539 = vmatprep.subr.bf16.mxu1 %v8964_v41  ;;  %v3051_v13 = vcombine.high %v3043_v48, %v3043_v48  ;;  %v2715_v50 = vrot.slane %v2708_v9, %v10941_v39  ;;  %v2751_v16 = vrot.slane %v2737_v51, %v10941_v39  ;;  %v2788_v17 = vrot.slane %v2781_v60, %v10941_v39  ;;  %v8985_v51 = vld [vmem:[#allocation13 + $0x734] ss:$8 sps:$4 sm:$0xff]  }
 0x3dd   : > { %2971 = vrot.lane.b32.xlu0 %v2970_v36, %s9966_s26  ;;  %v3088_v3 = vcombine.high %v3080_v63, %v3080_v63  ;;  %v2686_v0 = vcombine.high %v2675_v45, %v2675_v45  ;;  %v3116_v23 = vrot.slane %v3102_v49, %v10941_v39  ;;  %v3153_v35 = vrot.slane %v3146_v19, %v10941_v39 }
 0x3de   : > { %2943 = vrot.lane.b32.xlu1 %v2942_v38, %s9966_s26  ;;  %v2723_v26 = vcombine.high %v2715_v50, %v2715_v50  ;;  %v2759_v18 = vcombine.high %v2751_v16, %v2751_v16  ;;  %v2796_v21 = vcombine.high %v2788_v17, %v2788_v17  ;;  %v3197_v25 = vcombine.high %v11131_v22, %v11131_v22 }
 0x3df   : > { %6540 = vmatpush1.bf16.msra.mxu1 %v8962_v43  ;;  %v3124_v7 = vcombine.high %v3116_v23, %v3116_v23  ;;  %v3161_v53 = vcombine.high %v3153_v35, %v3153_v35  ;;  %v3234_v39 = vcombine.high %v11135_v57, %v11135_v57  ;;  %v11224_v38 = vsub.s32 4, %v10935_v24 }
 0x3e0   : > { %6541 = vmatprep.subr.bf16.mxu1 %v8970_v27  ;;  %v11230_v41 = vsub.s32 3, %v10935_v24  ;;  %v11270_v60 = vsub.s32 6, %v10935_v24 }
 0x3e1   : > { %3008 = vrot.lane.b32.xlu0 %v3007_v46, %s9966_s26  ;;  %v11233_v46 = vsub.s32 2, %v10935_v24 }
 0x3e2   : > { %2979 = vrot.lane.b32.xlu1 %v2978_v42, %s9966_s26 }
 0x3e3   : > { %6542 = vmatpush1.bf16.msra.mxu1 %v8968_v40 }
 0x3e4   : > { %6543 = vmatprep.subr.bf16.mxu1 %v8976_v5  ;;  %v8965_v5 = vld [vmem:[#allocation13 + $0x700] ss:$8 sps:$4 sm:$0xff]  }
 0x3e5   : > { %3044 = vrot.lane.b32.xlu0 %v3043_v48, %s9966_s26 }
 0x3e6   : > { %3016 = vrot.lane.b32.xlu1 %v3015_v62, %s9966_s26 }
 0x3e7   : > { %6544 = vmatpush1.bf16.msra.mxu1 %v8974_v31 }
 0x3e8   : > { %6545 = vmatprep.subr.bf16.mxu1 %v8982_v44 }
 0x3e9   : > { %3081 = vrot.lane.b32.xlu0 %v3080_v63, %s9966_s26 }
 0x3ea   : > { %3052 = vrot.lane.b32.xlu1 %v3051_v13, %s9966_s26  ;;  %v8973_v13 = vld [vmem:[#allocation13 + $0x714] ss:$8 sps:$4 sm:$0xff]  }
 0x3eb   : > { %6546 = vmatpush1.bf16.msra.mxu1 %v8980_v59 }
 0x3ec   : > { %6547 = vmatprep.subr.bf16.mxu1 %v8988_v6  ;;  %v8977_v6 = vld [vmem:[#allocation13 + $0x720] ss:$8 sps:$4 sm:$0xff]  }
 0x3ed   : > { %2676 = vrot.lane.b32.xlu0 %v2675_v45, %s9966_s26  ;;  %v8971_v45 = vld [vmem:[#allocation13 + $0x710] ss:$8 sps:$4 sm:$0xff]  }
 0x3ee   : > { %3089 = vrot.lane.b32.xlu1 %v3088_v3, %s9966_s26  ;;  %v8979_v3 = vld [vmem:[#allocation13 + $0x724] ss:$8 sps:$4 sm:$0xff]  }
 0x3ef   : > { %6548 = vmatpush1.bf16.msra.mxu1 %v8986_v15  ;;  %v8983_v15 = vld [vmem:[#allocation13 + $0x730] ss:$8 sps:$4 sm:$0xff]  }
 0x3f0   : > { %6549 = vmatprep.subr.bf16.mxu1 %v8994_v2 }
 0x3f1   : > { %2716 = vrot.lane.b32.xlu0 %v2715_v50, %s9966_s26 }
 0x3f2   : > { %2687 = vrot.lane.b32.xlu1 %v2686_v0, %s9966_s26 }
 0x3f3   : > { %6550 = vmatpush1.bf16.msra.mxu1 %v8992_v55 }
 0x3f4   : > { %6551 = vmatprep.subr.bf16.mxu1 %v9000_v30 }
 0x3f5   : > { %2752 = vrot.lane.b32.xlu0 %v2751_v16, %s9966_s26  ;;  %v8991_v16 = vld [vmem:[#allocation13 + $0x744] ss:$8 sps:$4 sm:$0xff]  }
 0x3f6   : > { %2724 = vrot.lane.b32.xlu1 %v2723_v26, %s9966_s26 }
 0x3f7   : > { %6552 = vmatpush1.bf16.msra.mxu1 %v8998_v20 }
 0x3f8   : > { %6553 = vmatprep.subr.bf16.mxu1 %v9006_v1 }
 0x3f9   : > { %2789 = vrot.lane.b32.xlu0 %v2788_v17, %s9966_s26 }
 0x3fa   : > { %2760 = vrot.lane.b32.xlu1 %v2759_v18, %s9966_s26 }
 0x3fb   : > { %6554 = vmatpush1.bf16.msra.mxu1 %v9004_v52 }
 0x3fc   : > { %6564 = vmatprep.subr.bf16.mxu1 %v9012_v33  ;;  %v8995_v33 = vld [vmem:[#allocation13 + $0x750] ss:$8 sps:$4 sm:$0xff]  }
 0x3fd   : > { %3117 = vrot.lane.b32.xlu0 %v3116_v23, %s9966_s26  ;;  %v8989_v23 = vld [vmem:[#allocation13 + $0x740] ss:$8 sps:$4 sm:$0xff]  }
 0x3fe   : > { %2797 = vrot.lane.b32.xlu1 %v2796_v21, %s9966_s26  ;;  %v8997_v21 = vld [vmem:[#allocation13 + $0x754] ss:$8 sps:$4 sm:$0xff]  }
 0x401   : > { %3154 = vrot.lane.b32.xlu0 %v3153_v35, %s9966_s26 }
 0x402   : > { %3125 = vrot.lane.b32.xlu1 %v3124_v7, %s9966_s26  ;;  %v9003_v7 = vld [vmem:[#allocation13 + $0x764] ss:$8 sps:$4 sm:$0xff]  }
 0x405   : > { %3190 = vrot.lane.b32.xlu0 %v11131_v22, %s9966_s26  ;;  %v11221_v22 = vsub.s32 5, %v10935_v24 }
 0x406   : > { %3162 = vrot.lane.b32.xlu1 %v3161_v53, %s9966_s26 }
 0x409   : > { %3227 = vrot.lane.b32.xlu0 %v11135_v57, %s9966_s26  ;;  %v11227_v57 = vsub.s32 7, %v10935_v24 }
 0x40a   : > { %3198 = vrot.lane.b32.xlu1 %v3197_v25, %s9966_s26  ;;  %v9001_v25 = vld [vmem:[#allocation13 + $0x760] ss:$8 sps:$4 sm:$0xff]  }
 0x40e   : > { %3235 = vrot.lane.b32.xlu1 %v3234_v39, %s9966_s26 }
 0x437   : > { %v2826_v11 = vpop.permute.xlu0 %2825 }
 0x438   : > { %2828 = vst.msk [vmem:[#allocation6 + $0x8] sm:$0x1] %vm11194_vm4, %v2826_v11  ;;  %v9009_v11 = vld [vmem:[#allocation13 + $0x774] ss:$8 sps:$4 sm:$0xff]  }
 0x43d   : > { %v2834_v14 = vpop.permute.xlu0 %2833 }
 0x43e   : > { %2836 = vst.msk [vmem:[#allocation6 + $0x9] sm:$0x1] %vm11194_vm4, %v2834_v14 }
 0x444   : > { %v2863_v8 = vpop.permute.xlu1 %2862 }
 0x445   : > { %2865 = vst.msk [vmem:[#allocation6 + $0xa] sm:$0x1] %vm11194_vm4, %v2863_v8  ;;  %v9007_v8 = vld [vmem:[#allocation13 + $0x770] ss:$8 sps:$4 sm:$0xff]  }
 0x447   : > { %v2899_v37 = vpop.permute.xlu0 %2898 }
 0x448   : > { %2901 = vst.msk [vmem:[#allocation6 + $0xc] sm:$0x1] %vm11194_vm4, %v2899_v37  ;;  %v2871_v4 = vpop.permute.xlu1 %2870  ;;  %v11315_v37 = vsub.s32 1, %v10935_v24 }
 0x449   : > { %2873 = vst.msk [vmem:[#allocation6 + $0xb] sm:$0x1] %vm11194_vm4, %v2871_v4  ;;  %v11318_v4 = vsub.s32 0, %v10935_v24 }
 0x44b   : > { %v2936_v56 = vpop.permute.xlu0 %2935 }
 0x44c   : > { %2938 = vst.msk [vmem:[#allocation6 + $0xe] sm:$0x1] %vm11194_vm4, %v2936_v56  ;;  %v2907_v32 = vpop.permute.xlu1 %2906 }
 0x44d   : > { %2909 = vst.msk [vmem:[#allocation6 + $0xd] sm:$0x1] %vm11194_vm4, %v2907_v32 }
 0x44f   : > { %v2972_v34 = vpop.permute.xlu0 %2971 }
 0x450   : > { %2974 = vst.msk [vmem:[#allocation6 + $0x10] sm:$0x1] %vm11194_vm4, %v2972_v34  ;;  %v2944_v36 = vpop.permute.xlu1 %2943  ;;  %v9015_v34 = vld [vmem:[#allocation13 + $0x784] ss:$8 sps:$4 sm:$0xff]  }
 0x451   : > { %2946 = vst.msk [vmem:[#allocation6 + $0xf] sm:$0x1] %vm11194_vm4, %v2944_v36 }
 0x453   : > { %v3009_v61 = vpop.permute.xlu0 %3008 }
 0x454   : > { %3011 = vst.msk [vmem:[#allocation6 + $0x12] sm:$0x1] %vm11194_vm4, %v3009_v61  ;;  %v2980_v54 = vpop.permute.xlu1 %2979 }
 0x455   : > { %2982 = vst.msk [vmem:[#allocation6 + $0x11] sm:$0x1] %vm11194_vm4, %v2980_v54 }
 0x457   : > { %v3045_v58 = vpop.permute.xlu0 %3044 }
 0x458   : > { %3047 = vst.msk [vmem:[#allocation6 + $0x14] sm:$0x1] %vm11194_vm4, %v3045_v58  ;;  %v3017_v28 = vpop.permute.xlu1 %3016  ;;  %v11237_v29 = vld [vmem:[#allocation6 + $0x8] sm:$0xff] }
 0x459   : > { %3019 = vst.msk [vmem:[#allocation6 + $0x13] sm:$0x1] %vm11194_vm4, %v3017_v28  ;;  %v3302_v42 = vrot.slane %v11237_v29, %v11221_v22  ;;  %v3298_v43 = vrot.slane %v11237_v29, %v11224_v38  ;;  %v3310_v27 = vrot.slane %v11237_v29, %v11227_v57  ;;  %v11249_v10 = vrot.slane %v11237_v29, %v11230_v41 }
 0x45a   : > { %v11253_v62 = vrot.slane %v11237_v29, %v11233_v46 }
 0x45b   : > { %v3082_v48 = vpop.permute.xlu0 %3081  ;;  %v3420_v40 = vpack.c.bf16 %v3302_v42, %v3302_v42  ;;  %v3419_v63 = vpack.c.bf16 %v3298_v43, %v3298_v43  ;;  %v3422_v31 = vpack.c.bf16 %v3310_v27, %v3310_v27 }
 0x45c   : > { %3084 = vst.msk [vmem:[#allocation6 + $0x16] sm:$0x1] %vm11194_vm4, %v3082_v48  ;;  %v3053_v12 = vpop.permute.xlu1 %3052  ;;  %v9010_v48 = vld [vmem:[#allocation13 + $0x100] ss:$8 sps:$4 sm:$0xff]  }
 0x45d   : > { %3055 = vst.msk [vmem:[#allocation6 + $0x15] sm:$0x1] %vm11194_vm4, %v3053_v12  ;;  %6801 = vmatprep.mubr.bf16.mxu0 %v3420_v40  ;;  %v9013_v40 = vld [vmem:[#allocation13 + $0x780] ss:$8 sps:$4 sm:$0xff]   ;;  %v9018_v12 = vld [vmem:[#allocation13 + $0x114] ss:$8 sps:$4 sm:$0xff]  }
 0x45e   : > { %6802 = vmatmul.mubr.bf16.vlgmr.msra.gmra.mrb[48].mxu0 %v3419_v63 }
 0x45f   : > { %v2677_v44 = vpop.permute.xlu0 %2676  ;;  %6811 = vmatpush1.bf16.msra.mxu0 %v8965_v5  ;;  %6842 = vmatprep.mubr.bf16.mxu0 %v3422_v31 }
 0x460   : > { %2682 = vst.msk [vmem:[#allocation6] sm:$0x1] %vm11194_vm4, %v2677_v44  ;;  %v3090_v9 = vpop.permute.xlu1 %3089  ;;  %6812 = vmatprep.subr.bf16.mxu0 %v8973_v13  ;;  %v9021_v13 = vld [vmem:[#allocation13 + $0x794] ss:$8 sps:$4 sm:$0xff]   ;;  %v9016_v44 = vld [vmem:[#allocation13 + $0x110] ss:$8 sps:$4 sm:$0xff]  }
 0x461   : > { %3092 = vst.msk [vmem:[#allocation6 + $0x17] sm:$0x1] %vm11194_vm4, %v3090_v9 }
 0x463   : > { %v2717_v59 = vpop.permute.xlu0 %2716  ;;  %6813 = vmatpush1.bf16.msra.mxu0 %v8971_v45  ;;  %v9019_v45 = vld [vmem:[#allocation13 + $0x790] ss:$8 sps:$4 sm:$0xff]  }
 0x464   : > { %2719 = vst.msk [vmem:[#allocation6 + $0x2] sm:$0x1] %vm11194_vm4, %v2717_v59  ;;  %v2688_v50 = vpop.permute.xlu1 %2687  ;;  %6814 = vmatprep.subr.bf16.mxu0 %v8979_v3  ;;  %v9024_v3 = vld [vmem:[#allocation13 + $0x124] ss:$8 sps:$4 sm:$0xff]  }
 0x465   : > { %2690 = vst.msk [vmem:[#allocation6 + $0x1] sm:$0x1] %vm11194_vm4, %v2688_v50  ;;  %v9027_v59 = vld [vmem:[#allocation13 + $0x7a4] ss:$8 sps:$4 sm:$0xff]   ;;  %v9025_v50 = vld [vmem:[#allocation13 + $0x7a0] ss:$8 sps:$4 sm:$0xff]  }
 0x467   : > { %v2753_v0 = vpop.permute.xlu0 %2752  ;;  %6815 = vmatpush1.bf16.msra.mxu0 %v8977_v6  ;;  %v9022_v6 = vld [vmem:[#allocation13 + $0x120] ss:$8 sps:$4 sm:$0xff]  }
 0x468   : > { %2755 = vst.msk [vmem:[#allocation6 + $0x4] sm:$0x1] %vm11194_vm4, %v2753_v0  ;;  %v2725_v2 = vpop.permute.xlu1 %2724  ;;  %6816 = vmatprep.subr.bf16.mxu0 %v8985_v51  ;;  %v11272_v26 = vld [vmem:[#allocation6 + $0x10] sm:$0xff]  ;;  %v9030_v51 = vld [vmem:[#allocation13 + $0x134] ss:$8 sps:$4 sm:$0xff]  }
 0x469   : > { %2727 = vst.msk [vmem:[#allocation6 + $0x3] sm:$0x1] %vm11194_vm4, %v2725_v2  ;;  %v11278_v55 = vrot.slane %v11272_v26, %v11230_v41  ;;  %v11282_v30 = vrot.slane %v11272_v26, %v11233_v46  ;;  %v11286_v49 = vrot.slane %v11272_v26, %v11221_v22  ;;  %v11290_v18 = vrot.slane %v11272_v26, %v11224_v38  ;;  %v9033_v0 = vld [vmem:[#allocation13 + $0x7b4] ss:$8 sps:$4 sm:$0xff]   ;;  %v9031_v2 = vld [vmem:[#allocation13 + $0x7b0] ss:$8 sps:$4 sm:$0xff]  }
 0x46a   : > { %v11294_v20 = vrot.slane %v11272_v26, %v11227_v57  ;;  %v11298_v1 = vrot.slane %v11272_v26, %v11270_v60 }
 0x46b   : > { %v2790_v17 = vpop.permute.xlu0 %2789  ;;  %6817 = vmatpush1.bf16.msra.mxu0 %v8983_v15  ;;  %v9028_v15 = vld [vmem:[#allocation13 + $0x130] ss:$8 sps:$4 sm:$0xff]  }
 0x46c   : > { %2792 = vst.msk [vmem:[#allocation6 + $0x6] sm:$0x1] %vm11194_vm4, %v2790_v17  ;;  %v2761_v19 = vpop.permute.xlu1 %2760  ;;  %6818 = vmatprep.subr.bf16.mxu0 %v8991_v16  ;;  %v9036_v16 = vld [vmem:[#allocation13 + $0x144] ss:$8 sps:$4 sm:$0xff]  }
 0x46d   : > { %2763 = vst.msk [vmem:[#allocation6 + $0x5] sm:$0x1] %vm11194_vm4, %v2761_v19  ;;  %v9039_v17 = vld [vmem:[#allocation13 + $0x7c4] ss:$8 sps:$4 sm:$0xff]  }
 0x46f   : > { %v3118_v52 = vpop.permute.xlu0 %3117  ;;  %6819 = vmatpush1.bf16.msra.mxu0 %v8989_v23 }
 0x470   : > { %3120 = vst.msk [vmem:[#allocation6 + $0x18] sm:$0x1] %vm11194_vm4, %v3118_v52  ;;  %v2798_v35 = vpop.permute.xlu1 %2797  ;;  %6820 = vmatprep.subr.bf16.mxu0 %v8997_v21  ;;  %v9034_v21 = vld [vmem:[#allocation13 + $0x140] ss:$8 sps:$4 sm:$0xff]  }
 0x471   : > { %2800 = vst.msk [vmem:[#allocation6 + $0x7] sm:$0x1] %vm11194_vm4, %v2798_v35  ;;  %v9037_v52 = vld [vmem:[#allocation13 + $0x7c0] ss:$8 sps:$4 sm:$0xff]  }
 0x473   : > { %v3155_v53 = vpop.permute.xlu0 %3154  ;;  %6821 = vmatpush1.bf16.msra.mxu0 %v8995_v33 }
 0x474   : > { %3157 = vst.msk [vmem:[#allocation6 + $0x1a] sm:$0x1] %vm11194_vm4, %v3155_v53  ;;  %v3126_v39 = vpop.permute.xlu1 %3125  ;;  %6822 = vmatprep.subr.bf16.mxu0 %v9003_v7  ;;  %v9045_v53 = vld [vmem:[#allocation13 + $0x7d4] ss:$8 sps:$4 sm:$0xff]  }
 0x475   : > { %3128 = vst.msk [vmem:[#allocation6 + $0x19] sm:$0x1] %vm11194_vm4, %v3126_v39  ;;  %v9040_v39 = vld [vmem:[#allocation13 + $0x150] ss:$8 sps:$4 sm:$0xff]  }
 0x477   : > { %v3191_v14 = vpop.permute.xlu0 %3190  ;;  %6823 = vmatpush1.bf16.msra.mxu0 %v9001_v25 }
 0x478   : > { %3193 = vst.msk [vmem:[#allocation6 + $0x1c] sm:$0x1] %vm11194_vm4, %v3191_v14  ;;  %v3163_v56 = vpop.permute.xlu1 %3162  ;;  %6824 = vmatprep.subr.bf16.mxu0 %v9009_v11  ;;  %v11320_v32 = vld [vmem:[#allocation6] sm:$0xff]  ;;  %v9051_v14 = vld [vmem:[#allocation13 + $0x7e4] ss:$8 sps:$4 sm:$0xff]  }
 0x479   : > { %3165 = vst.msk [vmem:[#allocation6 + $0x1b] sm:$0x1] %vm11194_vm4, %v3163_v56  ;;  %v3254_v36 = vrot.slane %v11320_v32, %v11315_v37  ;;  %v3250_v61 = vrot.slane %v11320_v32, %v11318_v4  ;;  %v3262_v54 = vrot.slane %v11320_v32, %v11230_v41  ;;  %v11332_v24 = vrot.slane %v11320_v32, %v11221_v22  ;;  %v9043_v11 = vld [vmem:[#allocation13 + $0x7d0] ss:$8 sps:$4 sm:$0xff]   ;;  %v9057_v56 = vld [vmem:[#allocation13 + $0x7f4] ss:$8 sps:$4 sm:$0xff]  }
 0x47a   : > { %v11336_v28 = vrot.slane %v11320_v32, %v11224_v38  ;;  %v11340_v42 = vrot.slane %v11320_v32, %v11227_v57  ;;  %v11344_v43 = vrot.slane %v11320_v32, %v11270_v60 }
 0x47b   : > { %v3228_v58 = vpop.permute.xlu0 %3227  ;;  %6825 = vmatpush1.bf16.msra.mxu0 %v9007_v8  ;;  %v3408_v27 = vpack.c.bf16 %v3254_v36, %v3254_v36  ;;  %v3407_v5 = vpack.c.bf16 %v3250_v61, %v3250_v61  ;;  %v3410_v31 = vpack.c.bf16 %v3262_v54, %v3262_v54  ;;  %v9054_v8 = vld [vmem:[#allocation13 + $0x174] ss:$8 sps:$4 sm:$0xff]   ;;  %v9055_v36 = vld [vmem:[#allocation13 + $0x7f0] ss:$8 sps:$4 sm:$0xff]   ;;  %v9060_v61 = vld [vmem:[#allocation13 + $0x184] ss:$8 sps:$4 sm:$0xff]   ;;  %v3306_v54 = vrot.slane %v11237_v29, %v11270_v60 }
 0x47c   : > { %3230 = vst.msk [vmem:[#allocation6 + $0x1e] sm:$0x1] %vm11194_vm4, %v3228_v58  ;;  %v3199_v63 = vpop.permute.xlu1 %3198  ;;  %6826 = vmatprep.subr.bf16.mxu0 %v9015_v34  ;;  %v9052_v34 = vld [vmem:[#allocation13 + $0x170] ss:$8 sps:$4 sm:$0xff]   ;;  %v9063_v58 = vld [vmem:[#allocation13 + $0x804] ss:$8 sps:$4 sm:$0xff]  }
 0x47d   : > { %3201 = vst.msk [vmem:[#allocation6 + $0x1d] sm:$0x1] %vm11194_vm4, %v3199_v63  ;;  %6555 = vmatprep.mubr.bf16.mxu1 %v3408_v27  ;;  %v3318_v27 = vrot.slane %v11272_v26, %v11315_v37  ;;  %v9066_v63 = vld [vmem:[#allocation13 + $0x194] ss:$8 sps:$4 sm:$0xff]   ;;  %v9072_v29 = vld [vmem:[#allocation13 + $0x1a4] ss:$8 sps:$4 sm:$0xff]  }
 0x47e   : > { %6556 = vmatmul.mubr.bf16.vlgmr.msra.gmra.mrb[12].mxu1 %v3407_v5  ;;  %v3421_v5 = vpack.c.bf16 %v3306_v54, %v3306_v54  ;;  %v9114_v54 = vld [vmem:[#allocation13 + $0x214] ss:$8 sps:$4 sm:$0xff]  }
 0x47f   : > { %6827 = vmatpush1.bf16.msra.mxu0 %v9013_v40  ;;  %6565 = vmatpush1.bf16.msra.mxu1 %v9010_v48  ;;  %v9058_v48 = vld [vmem:[#allocation13 + $0x180] ss:$8 sps:$4 sm:$0xff]  }
 0x480   : > { %6596 = vmatprep.mubr.bf16.mxu1 %v3410_v31  ;;  %v3236_v9 = vpop.permute.xlu1 %3235  ;;  %6566 = vmatprep.subr.bf16.mxu1 %v9018_v12  ;;  %v9061_v40 = vld [vmem:[#allocation13 + $0x800] ss:$8 sps:$4 sm:$0xff]   ;;  %v9069_v12 = vld [vmem:[#allocation13 + $0x814] ss:$8 sps:$4 sm:$0xff]   ;;  %v9064_v31 = vld [vmem:[#allocation13 + $0x190] ss:$8 sps:$4 sm:$0xff]  }
 0x481   : > { %3238 = vst.msk [vmem:[#allocation6 + $0x1f] sm:$0x1] %vm11194_vm4, %v3236_v9  ;;  %6828 = vmatprep.subr.bf16.mxu0 %v9021_v13  ;;  %v3424_v13 = vpack.c.bf16 %v3318_v27, %v3318_v27  ;;  %v9073_v9 = vld [vmem:[#allocation13 + $0x820] ss:$8 sps:$4 sm:$0xff]   ;;  %v9117_v27 = vld [vmem:[#allocation13 + $0x894] ss:$8 sps:$4 sm:$0xff]  }
 0x483   : > { %6567 = vmatpush1.bf16.msra.mxu1 %v9016_v44  ;;  %6829 = vmatpush1.bf16.msra.mxu0 %v9019_v45  ;;  %v9067_v44 = vld [vmem:[#allocation13 + $0x810] ss:$8 sps:$4 sm:$0xff]   ;;  %v9070_v45 = vld [vmem:[#allocation13 + $0x1a0] ss:$8 sps:$4 sm:$0xff]  }
 0x484   : > { %6568 = vmatprep.subr.bf16.mxu1 %v9024_v3  ;;  %6830 = vmatprep.subr.bf16.mxu0 %v9027_v59  ;;  %v9078_v3 = vld [vmem:[#allocation13 + $0x1b4] ss:$8 sps:$4 sm:$0xff]  }
 0x485   : > { %v9081_v59 = vld [vmem:[#allocation13 + $0x834] ss:$8 sps:$4 sm:$0xff]  }
 0x487   : > { %6569 = vmatpush1.bf16.msra.mxu1 %v9022_v6  ;;  %6831 = vmatpush1.bf16.msra.mxu0 %v9025_v50  ;;  %v9076_v6 = vld [vmem:[#allocation13 + $0x1b0] ss:$8 sps:$4 sm:$0xff]  }
 0x488   : > { %6570 = vmatprep.subr.bf16.mxu1 %v9030_v51  ;;  %6832 = vmatprep.subr.bf16.mxu0 %v9033_v0  ;;  %v3242_v23 = vld [vmem:[#allocation6 + $0x18] sm:$0xff] }
 0x489   : > { %v11353_v47 = vrot.slane %v3242_v23, %v11230_v41  ;;  %v11356_v19 = vrot.slane %v3242_v23, %v11233_v46  ;;  %v11359_v33 = vrot.slane %v3242_v23, %v11221_v22  ;;  %v11362_v35 = vrot.slane %v3242_v23, %v11224_v38  ;;  %v9042_v41 = vld [vmem:[#allocation13 + $0x154] ss:$8 sps:$4 sm:$0xff]   ;;  %v9048_v22 = vld [vmem:[#allocation13 + $0x164] ss:$8 sps:$4 sm:$0xff]   ;;  %v9046_v38 = vld [vmem:[#allocation13 + $0x160] ss:$8 sps:$4 sm:$0xff]  }
 0x48a   : > { %v11365_v7 = vrot.slane %v3242_v23, %v11227_v57  ;;  %v11368_v25 = vrot.slane %v3242_v23, %v11270_v60  ;;  %v9049_v57 = vld [vmem:[#allocation13 + $0x7e0] ss:$8 sps:$4 sm:$0xff]   ;;  %v9075_v60 = vld [vmem:[#allocation13 + $0x824] ss:$8 sps:$4 sm:$0xff]   ;;  %v9079_v50 = vld [vmem:[#allocation13 + $0x830] ss:$8 sps:$4 sm:$0xff]  }
 0x48b   : > { %6571 = vmatpush1.bf16.msra.mxu1 %v9028_v15  ;;  %6833 = vmatpush1.bf16.msra.mxu0 %v9031_v2  ;;  %v9084_v51 = vld [vmem:[#allocation13 + $0x1c4] ss:$8 sps:$4 sm:$0xff]   ;;  %v9082_v15 = vld [vmem:[#allocation13 + $0x1c0] ss:$8 sps:$4 sm:$0xff]   ;;  %v9088_v23 = vld [vmem:[#allocation13 + $0x1d0] ss:$8 sps:$4 sm:$0xff]  }
 0x48c   : > { %6572 = vmatprep.subr.bf16.mxu1 %v9036_v16  ;;  %6834 = vmatprep.subr.bf16.mxu0 %v9039_v17  ;;  %v9087_v0 = vld [vmem:[#allocation13 + $0x844] ss:$8 sps:$4 sm:$0xff]   ;;  %v9085_v2 = vld [vmem:[#allocation13 + $0x840] ss:$8 sps:$4 sm:$0xff]   ;;  %v9090_v16 = vld [vmem:[#allocation13 + $0x1d4] ss:$8 sps:$4 sm:$0xff]  }
 0x48d   : > { %v9093_v17 = vld [vmem:[#allocation13 + $0x854] ss:$8 sps:$4 sm:$0xff]  }
 0x48f   : > { %6573 = vmatpush1.bf16.msra.mxu1 %v9034_v21  ;;  %6835 = vmatpush1.bf16.msra.mxu0 %v9037_v52  ;;  %v9091_v21 = vld [vmem:[#allocation13 + $0x850] ss:$8 sps:$4 sm:$0xff]   ;;  %v9096_v52 = vld [vmem:[#allocation13 + $0x1e4] ss:$8 sps:$4 sm:$0xff]  }
 0x490   : > { %6574 = vmatprep.subr.bf16.mxu1 %v9042_v41  ;;  %6836 = vmatprep.subr.bf16.mxu0 %v9045_v53  ;;  %v9099_v41 = vld [vmem:[#allocation13 + $0x864] ss:$8 sps:$4 sm:$0xff]   ;;  %v9094_v53 = vld [vmem:[#allocation13 + $0x1e0] ss:$8 sps:$4 sm:$0xff]  }
 0x493   : > { %6575 = vmatpush1.bf16.msra.mxu1 %v9040_v39  ;;  %6837 = vmatpush1.bf16.msra.mxu0 %v9043_v11  ;;  %v9097_v39 = vld [vmem:[#allocation13 + $0x860] ss:$8 sps:$4 sm:$0xff]   ;;  %v9102_v11 = vld [vmem:[#allocation13 + $0x1f4] ss:$8 sps:$4 sm:$0xff]  }
 0x494   : > { %6576 = vmatprep.subr.bf16.mxu1 %v9048_v22  ;;  %6838 = vmatprep.subr.bf16.mxu0 %v9051_v14  ;;  %v9105_v22 = vld [vmem:[#allocation13 + $0x874] ss:$8 sps:$4 sm:$0xff]   ;;  %v9100_v14 = vld [vmem:[#allocation13 + $0x1f0] ss:$8 sps:$4 sm:$0xff]  }
 0x497   : > { %6577 = vmatpush1.bf16.msra.mxu1 %v9046_v38  ;;  %6839 = vmatpush1.bf16.msra.mxu0 %v9049_v57  ;;  %v9103_v38 = vld [vmem:[#allocation13 + $0x870] ss:$8 sps:$4 sm:$0xff]   ;;  %v3258_v57 = vrot.slane %v11320_v32, %v11233_v46  ;;  %v9120_v32 = vld [vmem:[#allocation13 + $0x224] ss:$8 sps:$4 sm:$0xff]  }
 0x498   : > { %6578 = vmatprep.subr.bf16.mxu1 %v9054_v8  ;;  %6840 = vmatprep.subr.bf16.mxu0 %v9057_v56  ;;  %v9108_v8 = vld [vmem:[#allocation13 + $0x204] ss:$8 sps:$4 sm:$0xff]   ;;  %v9115_v46 = vld [vmem:[#allocation13 + $0x890] ss:$8 sps:$4 sm:$0xff]  }
 0x499   : > { %v9111_v56 = vld [vmem:[#allocation13 + $0x884] ss:$8 sps:$4 sm:$0xff]  }
 0x49b   : > { %6579 = vmatpush1.bf16.msra.mxu1 %v9052_v34  ;;  %6841 = vmatpush1.bf16.msra.mxu0 %v9055_v36  ;;  %v9106_v34 = vld [vmem:[#allocation13 + $0x200] ss:$8 sps:$4 sm:$0xff]   ;;  %v3409_v36 = vpack.c.bf16 %v3258_v57, %v3258_v57  ;;  %v9160_v57 = vld [vmem:[#allocation13 + $0x290] ss:$8 sps:$4 sm:$0xff]  }
 0x49c   : > { %6580 = vmatprep.subr.bf16.mxu1 %v9060_v61  ;;  %6851 = vmatprep.subr.bf16.mxu0 %v9063_v58  ;;  %v9109_v61 = vld [vmem:[#allocation13 + $0x880] ss:$8 sps:$4 sm:$0xff]   ;;  %v3412_v58 = vpack.c.bf16 %v11332_v24, %v11332_v24  ;;  %v9124_v24 = vld [vmem:[#allocation13 + $0x230] ss:$8 sps:$4 sm:$0xff]  }
 0x49e   : > { %6843 = vmatmul.mubr.bf16.vlgmr.msra.gmra.mrb[48].mxu0 %v3421_v5  ;;  %v9118_v5 = vld [vmem:[#allocation13 + $0x220] ss:$8 sps:$4 sm:$0xff]  }
 0x49f   : > { %6581 = vmatpush1.bf16.msra.mxu1 %v9058_v48  ;;  %6852 = vmatpush1.bf16.msra.mxu0 %v9061_v40  ;;  %v9112_v48 = vld [vmem:[#allocation13 + $0x210] ss:$8 sps:$4 sm:$0xff]   ;;  %v9123_v40 = vld [vmem:[#allocation13 + $0x8a4] ss:$8 sps:$4 sm:$0xff]  }
 0x4a0   : > { %6883 = vmatprep.mubr.bf16.mxu0 %v3424_v13  ;;  %6582 = vmatprep.subr.bf16.mxu1 %v9066_v63  ;;  %v9121_v63 = vld [vmem:[#allocation13 + $0x8a0] ss:$8 sps:$4 sm:$0xff]   ;;  %v9129_v13 = vld [vmem:[#allocation13 + $0x8b4] ss:$8 sps:$4 sm:$0xff]  }
 0x4a1   : > { %6853 = vmatprep.subr.bf16.mxu0 %v9069_v12  ;;  %v9126_v12 = vld [vmem:[#allocation13 + $0x234] ss:$8 sps:$4 sm:$0xff]  }
 0x4a3   : > { %6583 = vmatpush1.bf16.msra.mxu1 %v9064_v31  ;;  %6854 = vmatpush1.bf16.msra.mxu0 %v9067_v44  ;;  %v9127_v31 = vld [vmem:[#allocation13 + $0x8b0] ss:$8 sps:$4 sm:$0xff]   ;;  %v9132_v44 = vld [vmem:[#allocation13 + $0x244] ss:$8 sps:$4 sm:$0xff]  }
 0x4a4   : > { %6584 = vmatprep.subr.bf16.mxu1 %v9072_v29  ;;  %6855 = vmatprep.subr.bf16.mxu0 %v9075_v60  ;;  %v9135_v29 = vld [vmem:[#allocation13 + $0x8c4] ss:$8 sps:$4 sm:$0xff]   ;;  %v9130_v60 = vld [vmem:[#allocation13 + $0x240] ss:$8 sps:$4 sm:$0xff]  }
 0x4a7   : > { %6585 = vmatpush1.bf16.msra.mxu1 %v9070_v45  ;;  %6856 = vmatpush1.bf16.msra.mxu0 %v9073_v9  ;;  %v9133_v45 = vld [vmem:[#allocation13 + $0x8c0] ss:$8 sps:$4 sm:$0xff]   ;;  %v9138_v9 = vld [vmem:[#allocation13 + $0x254] ss:$8 sps:$4 sm:$0xff]  }
 0x4a8   : > { %6586 = vmatprep.subr.bf16.mxu1 %v9078_v3  ;;  %6857 = vmatprep.subr.bf16.mxu0 %v9081_v59  ;;  %v9141_v3 = vld [vmem:[#allocation13 + $0x8d4] ss:$8 sps:$4 sm:$0xff]   ;;  %v9136_v59 = vld [vmem:[#allocation13 + $0x250] ss:$8 sps:$4 sm:$0xff]  }
 0x4ab   : > { %6587 = vmatpush1.bf16.msra.mxu1 %v9076_v6  ;;  %6858 = vmatpush1.bf16.msra.mxu0 %v9079_v50  ;;  %v9139_v6 = vld [vmem:[#allocation13 + $0x8d0] ss:$8 sps:$4 sm:$0xff]   ;;  %v9144_v50 = vld [vmem:[#allocation13 + $0x264] ss:$8 sps:$4 sm:$0xff]  }
 0x4ac   : > { %6588 = vmatprep.subr.bf16.mxu1 %v9084_v51  ;;  %6859 = vmatprep.subr.bf16.mxu0 %v9087_v0  ;;  %v9147_v51 = vld [vmem:[#allocation13 + $0x8e4] ss:$8 sps:$4 sm:$0xff]   ;;  %v9142_v0 = vld [vmem:[#allocation13 + $0x260] ss:$8 sps:$4 sm:$0xff]  }
 0x4af   : > { %6589 = vmatpush1.bf16.msra.mxu1 %v9082_v15  ;;  %6860 = vmatpush1.bf16.msra.mxu0 %v9085_v2  ;;  %v9145_v15 = vld [vmem:[#allocation13 + $0x8e0] ss:$8 sps:$4 sm:$0xff]   ;;  %v9150_v2 = vld [vmem:[#allocation13 + $0x274] ss:$8 sps:$4 sm:$0xff]  }
 0x4b0   : > { %6590 = vmatprep.subr.bf16.mxu1 %v9090_v16  ;;  %6861 = vmatprep.subr.bf16.mxu0 %v9093_v17  ;;  %v9153_v16 = vld [vmem:[#allocation13 + $0x8f4] ss:$8 sps:$4 sm:$0xff]   ;;  %v9148_v17 = vld [vmem:[#allocation13 + $0x270] ss:$8 sps:$4 sm:$0xff]  }
 0x4b3   : > { %6591 = vmatpush1.bf16.msra.mxu1 %v9088_v23  ;;  %6862 = vmatpush1.bf16.msra.mxu0 %v9091_v21  ;;  %v9151_v23 = vld [vmem:[#allocation13 + $0x8f0] ss:$8 sps:$4 sm:$0xff]   ;;  %v9156_v21 = vld [vmem:[#allocation13 + $0x284] ss:$8 sps:$4 sm:$0xff]  }
 0x4b4   : > { %6592 = vmatprep.subr.bf16.mxu1 %v9096_v52  ;;  %6863 = vmatprep.subr.bf16.mxu0 %v9099_v41  ;;  %v3314_v52 = vrot.slane %v11272_v26, %v11318_v4  ;;  %v9159_v41 = vld [vmem:[#allocation13 + $0x904] ss:$8 sps:$4 sm:$0xff]  }
 0x4b5   : > { %v9168_v26 = vld [vmem:[#allocation13 + $0x2a4] ss:$8 sps:$4 sm:$0xff]  }
 0x4b7   : > { %6593 = vmatpush1.bf16.msra.mxu1 %v9094_v53  ;;  %6864 = vmatpush1.bf16.msra.mxu0 %v9097_v39  ;;  %v9154_v53 = vld [vmem:[#allocation13 + $0x280] ss:$8 sps:$4 sm:$0xff]  }
 0x4b8   : > { %6594 = vmatprep.subr.bf16.mxu1 %v9102_v11  ;;  %6865 = vmatprep.subr.bf16.mxu0 %v9105_v22  ;;  %v9157_v39 = vld [vmem:[#allocation13 + $0x900] ss:$8 sps:$4 sm:$0xff]   ;;  %v3423_v11 = vpack.c.bf16 %v3314_v52, %v3314_v52  ;;  %v9162_v22 = vld [vmem:[#allocation13 + $0x294] ss:$8 sps:$4 sm:$0xff]  }
 0x4b9   : > { %v9217_v52 = vld [vmem:[#allocation13 + $0x9a0] ss:$8 sps:$4 sm:$0xff]  }
 0x4bb   : > { %6595 = vmatpush1.bf16.msra.mxu1 %v9100_v14  ;;  %6866 = vmatpush1.bf16.msra.mxu0 %v9103_v38  ;;  %v9165_v14 = vld [vmem:[#allocation13 + $0x914] ss:$8 sps:$4 sm:$0xff]   ;;  %v3426_v38 = vpack.c.bf16 %v11278_v55, %v11278_v55  ;;  %v9172_v55 = vld [vmem:[#allocation13 + $0x2b0] ss:$8 sps:$4 sm:$0xff]  }
 0x4bc   : > { %6605 = vmatprep.subr.bf16.mxu1 %v9108_v8  ;;  %6867 = vmatprep.subr.bf16.mxu0 %v9111_v56  ;;  %v9163_v8 = vld [vmem:[#allocation13 + $0x910] ss:$8 sps:$4 sm:$0xff]   ;;  %v9171_v56 = vld [vmem:[#allocation13 + $0x924] ss:$8 sps:$4 sm:$0xff]  }
 0x4be   : > { %6597 = vmatmul.mubr.bf16.vlgmr.msra.gmra.mrb[12].mxu1 %v3409_v36  ;;  %v9169_v36 = vld [vmem:[#allocation13 + $0x920] ss:$8 sps:$4 sm:$0xff]  }
 0x4bf   : > { %6606 = vmatpush1.bf16.msra.mxu1 %v9106_v34  ;;  %6637 = vmatprep.mubr.bf16.mxu1 %v3412_v58  ;;  %v9166_v34 = vld [vmem:[#allocation13 + $0x2a0] ss:$8 sps:$4 sm:$0xff]   ;;  %v9175_v58 = vld [vmem:[#allocation13 + $0x930] ss:$8 sps:$4 sm:$0xff]  }
 0x4c0   : > { %6868 = vmatpush1.bf16.msra.mxu0 %v9109_v61  ;;  %6607 = vmatprep.subr.bf16.mxu1 %v9114_v54  ;;  %v9174_v61 = vld [vmem:[#allocation13 + $0x2b4] ss:$8 sps:$4 sm:$0xff]  }
 0x4c1   : > { %6869 = vmatprep.subr.bf16.mxu0 %v9117_v27  ;;  %v9177_v54 = vld [vmem:[#allocation13 + $0x934] ss:$8 sps:$4 sm:$0xff]   ;;  %v9180_v27 = vld [vmem:[#allocation13 + $0x2c4] ss:$8 sps:$4 sm:$0xff]  }
 0x4c3   : > { %6608 = vmatpush1.bf16.msra.mxu1 %v9112_v48  ;;  %v9183_v48 = vld [vmem:[#allocation13 + $0x944] ss:$8 sps:$4 sm:$0xff]  }
 0x4c4   : > { %6870 = vmatpush1.bf16.msra.mxu0 %v9115_v46  ;;  %6609 = vmatprep.subr.bf16.mxu1 %v9120_v32  ;;  %v9178_v46 = vld [vmem:[#allocation13 + $0x2c0] ss:$8 sps:$4 sm:$0xff]  }
 0x4c5   : > { %6871 = vmatprep.subr.bf16.mxu0 %v9123_v40  ;;  %v9181_v32 = vld [vmem:[#allocation13 + $0x940] ss:$8 sps:$4 sm:$0xff]   ;;  %v9186_v40 = vld [vmem:[#allocation13 + $0x2d4] ss:$8 sps:$4 sm:$0xff]  }
 0x4c7   : > { %6610 = vmatpush1.bf16.msra.mxu1 %v9118_v5  ;;  %v9189_v5 = vld [vmem:[#allocation13 + $0x954] ss:$8 sps:$4 sm:$0xff]  }
 0x4c8   : > { %6872 = vmatpush1.bf16.msra.mxu0 %v9121_v63  ;;  %6611 = vmatprep.subr.bf16.mxu1 %v9126_v12  ;;  %v9184_v63 = vld [vmem:[#allocation13 + $0x2d0] ss:$8 sps:$4 sm:$0xff]  }
 0x4c9   : > { %6873 = vmatprep.subr.bf16.mxu0 %v9129_v13  ;;  %v9187_v12 = vld [vmem:[#allocation13 + $0x950] ss:$8 sps:$4 sm:$0xff]   ;;  %v9192_v13 = vld [vmem:[#allocation13 + $0x2e4] ss:$8 sps:$4 sm:$0xff]  }
 0x4cb   : > { %6612 = vmatpush1.bf16.msra.mxu1 %v9124_v24  ;;  %v9195_v24 = vld [vmem:[#allocation13 + $0x964] ss:$8 sps:$4 sm:$0xff]  }
 0x4cc   : > { %6874 = vmatpush1.bf16.msra.mxu0 %v9127_v31  ;;  %6613 = vmatprep.subr.bf16.mxu1 %v9132_v44  ;;  %v9190_v31 = vld [vmem:[#allocation13 + $0x2e0] ss:$8 sps:$4 sm:$0xff]  }
 0x4cd   : > { %6875 = vmatprep.subr.bf16.mxu0 %v9135_v29  ;;  %v9193_v44 = vld [vmem:[#allocation13 + $0x960] ss:$8 sps:$4 sm:$0xff]   ;;  %v9198_v29 = vld [vmem:[#allocation13 + $0x2f4] ss:$8 sps:$4 sm:$0xff]  }
 0x4cf   : > { %6614 = vmatpush1.bf16.msra.mxu1 %v9130_v60  ;;  %v9201_v60 = vld [vmem:[#allocation13 + $0x974] ss:$8 sps:$4 sm:$0xff]  }
 0x4d0   : > { %6876 = vmatpush1.bf16.msra.mxu0 %v9133_v45  ;;  %6615 = vmatprep.subr.bf16.mxu1 %v9138_v9  ;;  %v9196_v45 = vld [vmem:[#allocation13 + $0x2f0] ss:$8 sps:$4 sm:$0xff]  }
 0x4d1   : > { %6877 = vmatprep.subr.bf16.mxu0 %v9141_v3  ;;  %v9199_v9 = vld [vmem:[#allocation13 + $0x970] ss:$8 sps:$4 sm:$0xff]   ;;  %v9204_v3 = vld [vmem:[#allocation13 + $0x304] ss:$8 sps:$4 sm:$0xff]  }
 0x4d3   : > { %6616 = vmatpush1.bf16.msra.mxu1 %v9136_v59  ;;  %v9207_v59 = vld [vmem:[#allocation13 + $0x984] ss:$8 sps:$4 sm:$0xff]  }
 0x4d4   : > { %6878 = vmatpush1.bf16.msra.mxu0 %v9139_v6  ;;  %6617 = vmatprep.subr.bf16.mxu1 %v9144_v50  ;;  %v9202_v6 = vld [vmem:[#allocation13 + $0x300] ss:$8 sps:$4 sm:$0xff]   ;;  %v3411_v50 = vpack.c.bf16 %v11336_v28, %v11336_v28 }
 0x4d5   : > { %6879 = vmatprep.subr.bf16.mxu0 %v9147_v51  ;;  %v9205_v51 = vld [vmem:[#allocation13 + $0x980] ss:$8 sps:$4 sm:$0xff]  }
 0x4d6   : > { %v9214_v28 = vld [vmem:[#allocation13 + $0x320] ss:$8 sps:$4 sm:$0xff]  }
 0x4d7   : > { %6618 = vmatpush1.bf16.msra.mxu1 %v9142_v0  ;;  %v9210_v0 = vld [vmem:[#allocation13 + $0x314] ss:$8 sps:$4 sm:$0xff]  }
 0x4d8   : > { %6880 = vmatpush1.bf16.msra.mxu0 %v9145_v15  ;;  %6619 = vmatprep.subr.bf16.mxu1 %v9150_v2  ;;  %v3414_v15 = vpack.c.bf16 %v11340_v42, %v11340_v42  ;;  %v9213_v2 = vld [vmem:[#allocation13 + $0x994] ss:$8 sps:$4 sm:$0xff]   ;;  %v9220_v42 = vld [vmem:[#allocation13 + $0x330] ss:$8 sps:$4 sm:$0xff]  }
 0x4d9   : > { %6881 = vmatprep.subr.bf16.mxu0 %v9153_v16  ;;  %v9208_v16 = vld [vmem:[#allocation13 + $0x310] ss:$8 sps:$4 sm:$0xff]  }
 0x4db   : > { %6620 = vmatpush1.bf16.msra.mxu1 %v9148_v17  ;;  %v9211_v17 = vld [vmem:[#allocation13 + $0x990] ss:$8 sps:$4 sm:$0xff]  }
 0x4dc   : > { %6882 = vmatpush1.bf16.msra.mxu0 %v9151_v23  ;;  %6621 = vmatprep.subr.bf16.mxu1 %v9156_v21  ;;  %v9216_v23 = vld [vmem:[#allocation13 + $0x324] ss:$8 sps:$4 sm:$0xff]  }
 0x4dd   : > { %6892 = vmatprep.subr.bf16.mxu0 %v9159_v41  ;;  %v9219_v21 = vld [vmem:[#allocation13 + $0x9a4] ss:$8 sps:$4 sm:$0xff]   ;;  %v9222_v41 = vld [vmem:[#allocation13 + $0x334] ss:$8 sps:$4 sm:$0xff]  }
 0x4df   : > { %6884 = vmatmul.mubr.bf16.vlgmr.msra.gmra.mrb[48].mxu0 %v3423_v11  ;;  %6622 = vmatpush1.bf16.msra.mxu1 %v9154_v53  ;;  %v9225_v53 = vld [vmem:[#allocation13 + $0x9b4] ss:$8 sps:$4 sm:$0xff]   ;;  %v9228_v11 = vld [vmem:[#allocation13 + $0x344] ss:$8 sps:$4 sm:$0xff]  }
 0x4e0   : > { %6893 = vmatpush1.bf16.msra.mxu0 %v9157_v39  ;;  %6924 = vmatprep.mubr.bf16.mxu0 %v3426_v38  ;;  %v9223_v39 = vld [vmem:[#allocation13 + $0x9b0] ss:$8 sps:$4 sm:$0xff]   ;;  %v9229_v38 = vld [vmem:[#allocation13 + $0x9c0] ss:$8 sps:$4 sm:$0xff]  }
 0x4e1   : > { %6623 = vmatprep.subr.bf16.mxu1 %v9162_v22  ;;  %6894 = vmatprep.subr.bf16.mxu0 %v9165_v14  ;;  %v9231_v22 = vld [vmem:[#allocation13 + $0x9c4] ss:$8 sps:$4 sm:$0xff]   ;;  %v9226_v14 = vld [vmem:[#allocation13 + $0x340] ss:$8 sps:$4 sm:$0xff]  }
 0x4e3   : > { %6624 = vmatpush1.bf16.msra.mxu1 %v9160_v57  ;;  %v9234_v57 = vld [vmem:[#allocation13 + $0x354] ss:$8 sps:$4 sm:$0xff]  }
 0x4e4   : > { %6895 = vmatpush1.bf16.msra.mxu0 %v9163_v8  ;;  %6625 = vmatprep.subr.bf16.mxu1 %v9168_v26  ;;  %v9237_v8 = vld [vmem:[#allocation13 + $0x9d4] ss:$8 sps:$4 sm:$0xff]   ;;  %v9232_v26 = vld [vmem:[#allocation13 + $0x350] ss:$8 sps:$4 sm:$0xff]  }
 0x4e5   : > { %6896 = vmatprep.subr.bf16.mxu0 %v9171_v56  ;;  %v9235_v56 = vld [vmem:[#allocation13 + $0x9d0] ss:$8 sps:$4 sm:$0xff]  }
 0x4e7   : > { %6626 = vmatpush1.bf16.msra.mxu1 %v9166_v34  ;;  %v9240_v34 = vld [vmem:[#allocation13 + $0x364] ss:$8 sps:$4 sm:$0xff]  }
 0x4e8   : > { %6897 = vmatpush1.bf16.msra.mxu0 %v9169_v36  ;;  %6627 = vmatprep.subr.bf16.mxu1 %v9174_v61  ;;  %v9243_v36 = vld [vmem:[#allocation13 + $0x9e4] ss:$8 sps:$4 sm:$0xff]   ;;  %v9238_v61 = vld [vmem:[#allocation13 + $0x360] ss:$8 sps:$4 sm:$0xff]  }
 0x4e9   : > { %6898 = vmatprep.subr.bf16.mxu0 %v9177_v54  ;;  %v9241_v54 = vld [vmem:[#allocation13 + $0x9e0] ss:$8 sps:$4 sm:$0xff]  }
 0x4eb   : > { %6628 = vmatpush1.bf16.msra.mxu1 %v9172_v55  ;;  %v9246_v55 = vld [vmem:[#allocation13 + $0x374] ss:$8 sps:$4 sm:$0xff]  }
 0x4ec   : > { %6899 = vmatpush1.bf16.msra.mxu0 %v9175_v58  ;;  %6629 = vmatprep.subr.bf16.mxu1 %v9180_v27  ;;  %v9249_v58 = vld [vmem:[#allocation13 + $0x9f4] ss:$8 sps:$4 sm:$0xff]   ;;  %v9244_v27 = vld [vmem:[#allocation13 + $0x370] ss:$8 sps:$4 sm:$0xff]  }
 0x4ed   : > { %6900 = vmatprep.subr.bf16.mxu0 %v9183_v48  ;;  %v9247_v48 = vld [vmem:[#allocation13 + $0x9f0] ss:$8 sps:$4 sm:$0xff]  }
 0x4ef   : > { %6630 = vmatpush1.bf16.msra.mxu1 %v9178_v46  ;;  %v9252_v46 = vld [vmem:[#allocation13 + $0x384] ss:$8 sps:$4 sm:$0xff]  }
 0x4f0   : > { %6901 = vmatpush1.bf16.msra.mxu0 %v9181_v32  ;;  %6631 = vmatprep.subr.bf16.mxu1 %v9186_v40  ;;  %v9255_v32 = vld [vmem:[#allocation13 + $0xa04] ss:$8 sps:$4 sm:$0xff]   ;;  %v9250_v40 = vld [vmem:[#allocation13 + $0x380] ss:$8 sps:$4 sm:$0xff]  }
 0x4f1   : > { %6902 = vmatprep.subr.bf16.mxu0 %v9189_v5  ;;  %v9253_v5 = vld [vmem:[#allocation13 + $0xa00] ss:$8 sps:$4 sm:$0xff]  }
 0x4f3   : > { %6632 = vmatpush1.bf16.msra.mxu1 %v9184_v63  ;;  %v3425_v63 = vpack.c.bf16 %v11282_v30, %v11282_v30  ;;  %v9265_v30 = vld [vmem:[#allocation13 + $0xa20] ss:$8 sps:$4 sm:$0xff]  }
 0x4f4   : > { %6903 = vmatpush1.bf16.msra.mxu0 %v9187_v12  ;;  %6633 = vmatprep.subr.bf16.mxu1 %v9192_v13  ;;  %v9258_v12 = vld [vmem:[#allocation13 + $0x394] ss:$8 sps:$4 sm:$0xff]  }
 0x4f5   : > { %6904 = vmatprep.subr.bf16.mxu0 %v9195_v24  ;;  %v9261_v13 = vld [vmem:[#allocation13 + $0xa14] ss:$8 sps:$4 sm:$0xff]   ;;  %v3428_v24 = vpack.c.bf16 %v11286_v49, %v11286_v49  ;;  %v9268_v49 = vld [vmem:[#allocation13 + $0x3b0] ss:$8 sps:$4 sm:$0xff]  }
 0x4f7   : > { %6634 = vmatpush1.bf16.msra.mxu1 %v9190_v31  ;;  %v9256_v31 = vld [vmem:[#allocation13 + $0x390] ss:$8 sps:$4 sm:$0xff]  }
 0x4f8   : > { %6905 = vmatpush1.bf16.msra.mxu0 %v9193_v44  ;;  %6635 = vmatprep.subr.bf16.mxu1 %v9198_v29  ;;  %v9259_v44 = vld [vmem:[#allocation13 + $0xa10] ss:$8 sps:$4 sm:$0xff]   ;;  %v9264_v29 = vld [vmem:[#allocation13 + $0x3a4] ss:$8 sps:$4 sm:$0xff]  }
 0x4f9   : > { %6906 = vmatprep.subr.bf16.mxu0 %v9201_v60  ;;  %v9267_v60 = vld [vmem:[#allocation13 + $0xa24] ss:$8 sps:$4 sm:$0xff]  }
 0x4fb   : > { %6636 = vmatpush1.bf16.msra.mxu1 %v9196_v45  ;;  %v9262_v45 = vld [vmem:[#allocation13 + $0x3a0] ss:$8 sps:$4 sm:$0xff]  }
 0x4fc   : > { %6907 = vmatpush1.bf16.msra.mxu0 %v9199_v9  ;;  %6646 = vmatprep.subr.bf16.mxu1 %v9204_v3  ;;  %v9270_v9 = vld [vmem:[#allocation13 + $0x3b4] ss:$8 sps:$4 sm:$0xff]  }
 0x4fd   : > { %6908 = vmatprep.subr.bf16.mxu0 %v9207_v59  ;;  %v9273_v3 = vld [vmem:[#allocation13 + $0xa34] ss:$8 sps:$4 sm:$0xff]   ;;  %v9271_v59 = vld [vmem:[#allocation13 + $0xa30] ss:$8 sps:$4 sm:$0xff]  }
 0x4fe   : > { %6638 = vmatmul.mubr.bf16.vlgmr.msra.gmra.mrb[12].mxu1 %v3411_v50  ;;  %v9279_v50 = vld [vmem:[#allocation13 + $0xa44] ss:$8 sps:$4 sm:$0xff]  }
 0x4ff   : > { %6647 = vmatpush1.bf16.msra.mxu1 %v9202_v6  ;;  %6678 = vmatprep.mubr.bf16.mxu1 %v3414_v15  ;;  %v9276_v6 = vld [vmem:[#allocation13 + $0x3c4] ss:$8 sps:$4 sm:$0xff]   ;;  %v9282_v15 = vld [vmem:[#allocation13 + $0x3d4] ss:$8 sps:$4 sm:$0xff]  }
 0x500   : > { %6909 = vmatpush1.bf16.msra.mxu0 %v9205_v51  ;;  %6648 = vmatprep.subr.bf16.mxu1 %v9210_v0  ;;  %v9274_v51 = vld [vmem:[#allocation13 + $0x3c0] ss:$8 sps:$4 sm:$0xff]  }
 0x501   : > { %6910 = vmatprep.subr.bf16.mxu0 %v9213_v2  ;;  %v9277_v0 = vld [vmem:[#allocation13 + $0xa40] ss:$8 sps:$4 sm:$0xff]   ;;  %v9285_v2 = vld [vmem:[#allocation13 + $0xa54] ss:$8 sps:$4 sm:$0xff]  }
 0x503   : > { %6649 = vmatpush1.bf16.msra.mxu1 %v9208_v16  ;;  %v9280_v16 = vld [vmem:[#allocation13 + $0x3d0] ss:$8 sps:$4 sm:$0xff]  }
 0x504   : > { %6911 = vmatpush1.bf16.msra.mxu0 %v9211_v17  ;;  %6650 = vmatprep.subr.bf16.mxu1 %v9216_v23  ;;  %v9283_v17 = vld [vmem:[#allocation13 + $0xa50] ss:$8 sps:$4 sm:$0xff]   ;;  %v9288_v23 = vld [vmem:[#allocation13 + $0x3e4] ss:$8 sps:$4 sm:$0xff]  }
 0x505   : > { %6912 = vmatprep.subr.bf16.mxu0 %v9219_v21  ;;  %v9291_v21 = vld [vmem:[#allocation13 + $0xa64] ss:$8 sps:$4 sm:$0xff]  }
 0x507   : > { %6651 = vmatpush1.bf16.msra.mxu1 %v9214_v28  ;;  %v9286_v28 = vld [vmem:[#allocation13 + $0x3e0] ss:$8 sps:$4 sm:$0xff]  }
 0x508   : > { %6913 = vmatpush1.bf16.msra.mxu0 %v9217_v52  ;;  %6652 = vmatprep.subr.bf16.mxu1 %v9222_v41  ;;  %v9289_v52 = vld [vmem:[#allocation13 + $0xa60] ss:$8 sps:$4 sm:$0xff]   ;;  %v9294_v41 = vld [vmem:[#allocation13 + $0x3f4] ss:$8 sps:$4 sm:$0xff]  }
 0x509   : > { %6914 = vmatprep.subr.bf16.mxu0 %v9225_v53  ;;  %v9297_v53 = vld [vmem:[#allocation13 + $0xa74] ss:$8 sps:$4 sm:$0xff]  }
 0x50b   : > { %6653 = vmatpush1.bf16.msra.mxu1 %v9220_v42  ;;  %v9292_v42 = vld [vmem:[#allocation13 + $0x3f0] ss:$8 sps:$4 sm:$0xff]  }
 0x50c   : > { %6915 = vmatpush1.bf16.msra.mxu0 %v9223_v39  ;;  %6654 = vmatprep.subr.bf16.mxu1 %v9228_v11  ;;  %v9295_v39 = vld [vmem:[#allocation13 + $0xa70] ss:$8 sps:$4 sm:$0xff]   ;;  %v9300_v11 = vld [vmem:[#allocation13 + $0x404] ss:$8 sps:$4 sm:$0xff]  }
 0x50d   : > { %6916 = vmatprep.subr.bf16.mxu0 %v9231_v22  ;;  %v9303_v22 = vld [vmem:[#allocation13 + $0xa84] ss:$8 sps:$4 sm:$0xff]  }
 0x50f   : > { %6655 = vmatpush1.bf16.msra.mxu1 %v9226_v14  ;;  %v11390_v14 = vld [vmem:[#allocation6 + $0x8] sm:$0xff] }
 0x510   : > { %6917 = vmatpush1.bf16.msra.mxu0 %v9229_v38  ;;  %6656 = vmatprep.subr.bf16.mxu1 %v9234_v57  ;;  %v3286_v38 = vrot.slane %v11390_v14, %v11315_v37  ;;  %v9298_v57 = vld [vmem:[#allocation13 + $0x400] ss:$8 sps:$4 sm:$0xff]  }
 0x511   : > { %6918 = vmatprep.subr.bf16.mxu0 %v9237_v8  ;;  %v3413_v8 = vpack.c.bf16 %v11344_v43, %v11344_v43  ;;  %v9313_v43 = vld [vmem:[#allocation13 + $0xaa0] ss:$8 sps:$4 sm:$0xff]  }
 0x513   : > { %6657 = vmatpush1.bf16.msra.mxu1 %v9232_v26  ;;  %v9301_v26 = vld [vmem:[#allocation13 + $0xa80] ss:$8 sps:$4 sm:$0xff]  }
 0x514   : > { %6919 = vmatpush1.bf16.msra.mxu0 %v9235_v56  ;;  %6658 = vmatprep.subr.bf16.mxu1 %v9240_v34  ;;  %v9306_v56 = vld [vmem:[#allocation13 + $0x414] ss:$8 sps:$4 sm:$0xff]   ;;  %v3416_v34 = vpack.c.bf16 %v3286_v38, %v3286_v38  ;;  %v9375_v38 = vld [vmem:[#allocation13 + $0xb44] ss:$8 sps:$4 sm:$0xff]  }
 0x515   : > { %6920 = vmatprep.subr.bf16.mxu0 %v9243_v36  ;;  %v9309_v36 = vld [vmem:[#allocation13 + $0xa94] ss:$8 sps:$4 sm:$0xff]  }
 0x517   : > { %6659 = vmatpush1.bf16.msra.mxu1 %v9238_v61  ;;  %v9304_v61 = vld [vmem:[#allocation13 + $0x410] ss:$8 sps:$4 sm:$0xff]  }
 0x518   : > { %6921 = vmatpush1.bf16.msra.mxu0 %v9241_v54  ;;  %6660 = vmatprep.subr.bf16.mxu1 %v9246_v55  ;;  %v9307_v54 = vld [vmem:[#allocation13 + $0xa90] ss:$8 sps:$4 sm:$0xff]   ;;  %v9312_v55 = vld [vmem:[#allocation13 + $0x424] ss:$8 sps:$4 sm:$0xff]  }
 0x519   : > { %6922 = vmatprep.subr.bf16.mxu0 %v9249_v58  ;;  %v9315_v58 = vld [vmem:[#allocation13 + $0xaa4] ss:$8 sps:$4 sm:$0xff]  }
 0x51b   : > { %6661 = vmatpush1.bf16.msra.mxu1 %v9244_v27  ;;  %v9310_v27 = vld [vmem:[#allocation13 + $0x420] ss:$8 sps:$4 sm:$0xff]  }
 0x51c   : > { %6923 = vmatpush1.bf16.msra.mxu0 %v9247_v48  ;;  %6662 = vmatprep.subr.bf16.mxu1 %v9252_v46  ;;  %v9318_v48 = vld [vmem:[#allocation13 + $0x434] ss:$8 sps:$4 sm:$0xff]  }
 0x51d   : > { %6933 = vmatprep.subr.bf16.mxu0 %v9255_v32  ;;  %v9321_v46 = vld [vmem:[#allocation13 + $0xab4] ss:$8 sps:$4 sm:$0xff]   ;;  %v9316_v32 = vld [vmem:[#allocation13 + $0x430] ss:$8 sps:$4 sm:$0xff]  }
 0x51f   : > { %6925 = vmatmul.mubr.bf16.vlgmr.msra.gmra.mrb[48].mxu0 %v3425_v63  ;;  %6663 = vmatpush1.bf16.msra.mxu1 %v9250_v40  ;;  %v9319_v40 = vld [vmem:[#allocation13 + $0xab0] ss:$8 sps:$4 sm:$0xff]   ;;  %v9327_v63 = vld [vmem:[#allocation13 + $0xac4] ss:$8 sps:$4 sm:$0xff]  }
 0x520   : > { %6934 = vmatpush1.bf16.msra.mxu0 %v9253_v5  ;;  %6965 = vmatprep.mubr.bf16.mxu0 %v3428_v24  ;;  %v9324_v5 = vld [vmem:[#allocation13 + $0x444] ss:$8 sps:$4 sm:$0xff]   ;;  %v9330_v24 = vld [vmem:[#allocation13 + $0x454] ss:$8 sps:$4 sm:$0xff]  }
 0x521   : > { %6664 = vmatprep.subr.bf16.mxu1 %v9258_v12  ;;  %6935 = vmatprep.subr.bf16.mxu0 %v9261_v13  ;;  %v9322_v12 = vld [vmem:[#allocation13 + $0x440] ss:$8 sps:$4 sm:$0xff]  }
 0x522   : > { %v9325_v13 = vld [vmem:[#allocation13 + $0xac0] ss:$8 sps:$4 sm:$0xff]  }
 0x523   : > { %6665 = vmatpush1.bf16.msra.mxu1 %v9256_v31  ;;  %v9333_v31 = vld [vmem:[#allocation13 + $0xad4] ss:$8 sps:$4 sm:$0xff]  }
 0x524   : > { %6936 = vmatpush1.bf16.msra.mxu0 %v9259_v44  ;;  %6666 = vmatprep.subr.bf16.mxu1 %v9264_v29  ;;  %v9328_v44 = vld [vmem:[#allocation13 + $0x450] ss:$8 sps:$4 sm:$0xff]  }
 0x525   : > { %6937 = vmatprep.subr.bf16.mxu0 %v9267_v60  ;;  %v9331_v29 = vld [vmem:[#allocation13 + $0xad0] ss:$8 sps:$4 sm:$0xff]   ;;  %v9336_v60 = vld [vmem:[#allocation13 + $0x464] ss:$8 sps:$4 sm:$0xff]  }
 0x527   : > { %6667 = vmatpush1.bf16.msra.mxu1 %v9262_v45  ;;  %v9339_v45 = vld [vmem:[#allocation13 + $0xae4] ss:$8 sps:$4 sm:$0xff]  }
 0x528   : > { %6938 = vmatpush1.bf16.msra.mxu0 %v9265_v30  ;;  %6668 = vmatprep.subr.bf16.mxu1 %v9270_v9  ;;  %v9334_v30 = vld [vmem:[#allocation13 + $0x460] ss:$8 sps:$4 sm:$0xff]  }
 0x529   : > { %6939 = vmatprep.subr.bf16.mxu0 %v9273_v3  ;;  %v9337_v9 = vld [vmem:[#allocation13 + $0xae0] ss:$8 sps:$4 sm:$0xff]   ;;  %v9342_v3 = vld [vmem:[#allocation13 + $0x474] ss:$8 sps:$4 sm:$0xff]  }
 0x52b   : > { %6669 = vmatpush1.bf16.msra.mxu1 %v9268_v49  ;;  %v9345_v49 = vld [vmem:[#allocation13 + $0xaf4] ss:$8 sps:$4 sm:$0xff]  }
 0x52c   : > { %6940 = vmatpush1.bf16.msra.mxu0 %v9271_v59  ;;  %6670 = vmatprep.subr.bf16.mxu1 %v9276_v6  ;;  %v9340_v59 = vld [vmem:[#allocation13 + $0x470] ss:$8 sps:$4 sm:$0xff]  }
 0x52d   : > { %6941 = vmatprep.subr.bf16.mxu0 %v9279_v50  ;;  %v9343_v6 = vld [vmem:[#allocation13 + $0xaf0] ss:$8 sps:$4 sm:$0xff]   ;;  %v9348_v50 = vld [vmem:[#allocation13 + $0x484] ss:$8 sps:$4 sm:$0xff]  }
 0x52f   : > { %6671 = vmatpush1.bf16.msra.mxu1 %v9274_v51  ;;  %v9351_v51 = vld [vmem:[#allocation13 + $0xb04] ss:$8 sps:$4 sm:$0xff]  }
 0x530   : > { %6942 = vmatpush1.bf16.msra.mxu0 %v9277_v0  ;;  %6672 = vmatprep.subr.bf16.mxu1 %v9282_v15  ;;  %v9346_v0 = vld [vmem:[#allocation13 + $0x480] ss:$8 sps:$4 sm:$0xff]  }
 0x531   : > { %6943 = vmatprep.subr.bf16.mxu0 %v9285_v2  ;;  %v9349_v15 = vld [vmem:[#allocation13 + $0xb00] ss:$8 sps:$4 sm:$0xff]   ;;  %v3427_v2 = vpack.c.bf16 %v11290_v18, %v11290_v18 }
 0x532   : > { %v9361_v18 = vld [vmem:[#allocation13 + $0xb20] ss:$8 sps:$4 sm:$0xff]  }
 0x533   : > { %6673 = vmatpush1.bf16.msra.mxu1 %v9280_v16  ;;  %v9354_v16 = vld [vmem:[#allocation13 + $0x494] ss:$8 sps:$4 sm:$0xff]  }
 0x534   : > { %6944 = vmatpush1.bf16.msra.mxu0 %v9283_v17  ;;  %6674 = vmatprep.subr.bf16.mxu1 %v9288_v23  ;;  %v9357_v17 = vld [vmem:[#allocation13 + $0xb14] ss:$8 sps:$4 sm:$0xff]   ;;  %v3430_v23 = vpack.c.bf16 %v11294_v20, %v11294_v20  ;;  %v9364_v20 = vld [vmem:[#allocation13 + $0x4b0] ss:$8 sps:$4 sm:$0xff]  }
 0x535   : > { %6945 = vmatprep.subr.bf16.mxu0 %v9291_v21  ;;  %v9352_v21 = vld [vmem:[#allocation13 + $0x490] ss:$8 sps:$4 sm:$0xff]  }
 0x537   : > { %6675 = vmatpush1.bf16.msra.mxu1 %v9286_v28  ;;  %v9355_v28 = vld [vmem:[#allocation13 + $0xb10] ss:$8 sps:$4 sm:$0xff]  }
 0x538   : > { %6946 = vmatpush1.bf16.msra.mxu0 %v9289_v52  ;;  %6676 = vmatprep.subr.bf16.mxu1 %v9294_v41  ;;  %v9360_v52 = vld [vmem:[#allocation13 + $0x4a4] ss:$8 sps:$4 sm:$0xff]  }
 0x539   : > { %6947 = vmatprep.subr.bf16.mxu0 %v9297_v53  ;;  %v9363_v41 = vld [vmem:[#allocation13 + $0xb24] ss:$8 sps:$4 sm:$0xff]   ;;  %v9358_v53 = vld [vmem:[#allocation13 + $0x4a0] ss:$8 sps:$4 sm:$0xff]  }
 0x53b   : > { %6677 = vmatpush1.bf16.msra.mxu1 %v9292_v42  ;;  %v9366_v42 = vld [vmem:[#allocation13 + $0x4b4] ss:$8 sps:$4 sm:$0xff]  }
 0x53c   : > { %6948 = vmatpush1.bf16.msra.mxu0 %v9295_v39  ;;  %6687 = vmatprep.subr.bf16.mxu1 %v9300_v11  ;;  %v9369_v39 = vld [vmem:[#allocation13 + $0xb34] ss:$8 sps:$4 sm:$0xff]   ;;  %v9367_v11 = vld [vmem:[#allocation13 + $0xb30] ss:$8 sps:$4 sm:$0xff]  }
 0x53d   : > { %6949 = vmatprep.subr.bf16.mxu0 %v9303_v22  ;;  %v9372_v22 = vld [vmem:[#allocation13 + $0x4c4] ss:$8 sps:$4 sm:$0xff]  }
 0x53e   : > { %6679 = vmatmul.mubr.bf16.vlgmr.msra.gmra.mrb[12].mxu1 %v3413_v8  ;;  %v9373_v8 = vld [vmem:[#allocation13 + $0xb40] ss:$8 sps:$4 sm:$0xff]  }
 0x53f   : > { %6688 = vmatpush1.bf16.msra.mxu1 %v9298_v57  ;;  %6719 = vmatprep.mubr.bf16.mxu1 %v3416_v34  ;;  %v9370_v57 = vld [vmem:[#allocation13 + $0x4c0] ss:$8 sps:$4 sm:$0xff]   ;;  %v9376_v34 = vld [vmem:[#allocation13 + $0x4d0] ss:$8 sps:$4 sm:$0xff]  }
 0x540   : > { %6950 = vmatpush1.bf16.msra.mxu0 %v9301_v26  ;;  %6689 = vmatprep.subr.bf16.mxu1 %v9306_v56  ;;  %v9378_v26 = vld [vmem:[#allocation13 + $0x4d4] ss:$8 sps:$4 sm:$0xff]  }
 0x541   : > { %6951 = vmatprep.subr.bf16.mxu0 %v9309_v36  ;;  %v9381_v56 = vld [vmem:[#allocation13 + $0xb54] ss:$8 sps:$4 sm:$0xff]   ;;  %v9379_v36 = vld [vmem:[#allocation13 + $0xb50] ss:$8 sps:$4 sm:$0xff]  }
 0x543   : > { %6690 = vmatpush1.bf16.msra.mxu1 %v9304_v61  ;;  %v9384_v61 = vld [vmem:[#allocation13 + $0x4e4] ss:$8 sps:$4 sm:$0xff]  }
 0x544   : > { %6952 = vmatpush1.bf16.msra.mxu0 %v9307_v54  ;;  %6691 = vmatprep.subr.bf16.mxu1 %v9312_v55  ;;  %v9387_v54 = vld [vmem:[#allocation13 + $0xb64] ss:$8 sps:$4 sm:$0xff]   ;;  %v9382_v55 = vld [vmem:[#allocation13 + $0x4e0] ss:$8 sps:$4 sm:$0xff]  }
 0x545   : > { %6953 = vmatprep.subr.bf16.mxu0 %v9315_v58  ;;  %v9385_v58 = vld [vmem:[#allocation13 + $0xb60] ss:$8 sps:$4 sm:$0xff]  }
 0x547   : > { %6692 = vmatpush1.bf16.msra.mxu1 %v9310_v27  ;;  %v9390_v27 = vld [vmem:[#allocation13 + $0x4f4] ss:$8 sps:$4 sm:$0xff]  }
 0x548   : > { %6954 = vmatpush1.bf16.msra.mxu0 %v9313_v43  ;;  %6693 = vmatprep.subr.bf16.mxu1 %v9318_v48  ;;  %v9393_v43 = vld [vmem:[#allocation13 + $0xb74] ss:$8 sps:$4 sm:$0xff]   ;;  %v9388_v48 = vld [vmem:[#allocation13 + $0x4f0] ss:$8 sps:$4 sm:$0xff]  }
 0x549   : > { %6955 = vmatprep.subr.bf16.mxu0 %v9321_v46  ;;  %v9391_v46 = vld [vmem:[#allocation13 + $0xb70] ss:$8 sps:$4 sm:$0xff]  }
 0x54b   : > { %6694 = vmatpush1.bf16.msra.mxu1 %v9316_v32  ;;  %v3282_v32 = vrot.slane %v11390_v14, %v11318_v4  ;;  %v9403_v14 = vld [vmem:[#allocation13 + $0xb90] ss:$8 sps:$4 sm:$0xff]  }
 0x54c   : > { %6956 = vmatpush1.bf16.msra.mxu0 %v9319_v40  ;;  %6695 = vmatprep.subr.bf16.mxu1 %v9324_v5  ;;  %v9396_v40 = vld [vmem:[#allocation13 + $0x504] ss:$8 sps:$4 sm:$0xff]  }
 0x54d   : > { %6957 = vmatprep.subr.bf16.mxu0 %v9327_v63  ;;  %v9399_v5 = vld [vmem:[#allocation13 + $0xb84] ss:$8 sps:$4 sm:$0xff]   ;;  %v9394_v63 = vld [vmem:[#allocation13 + $0x500] ss:$8 sps:$4 sm:$0xff]  }
 0x54f   : > { %6696 = vmatpush1.bf16.msra.mxu1 %v9322_v12  ;;  %v3415_v12 = vpack.c.bf16 %v3282_v32, %v3282_v32  ;;  %v9468_v32 = vld [vmem:[#allocation13 + $0x5c4] ss:$8 sps:$4 sm:$0xff]  }
 0x550   : > { %6958 = vmatpush1.bf16.msra.mxu0 %v9325_v13  ;;  %6697 = vmatprep.subr.bf16.mxu1 %v9330_v24  ;;  %v9397_v13 = vld [vmem:[#allocation13 + $0xb80] ss:$8 sps:$4 sm:$0xff]   ;;  %v9402_v24 = vld [vmem:[#allocation13 + $0x514] ss:$8 sps:$4 sm:$0xff]  }
 0x551   : > { %6959 = vmatprep.subr.bf16.mxu0 %v9333_v31  ;;  %v3418_v31 = vpack.c.bf16 %v11249_v10, %v11249_v10  ;;  %v9412_v10 = vld [vmem:[#allocation13 + $0x530] ss:$8 sps:$4 sm:$0xff]  }
 0x553   : > { %6698 = vmatpush1.bf16.msra.mxu1 %v9328_v44  ;;  %v9405_v44 = vld [vmem:[#allocation13 + $0xb94] ss:$8 sps:$4 sm:$0xff]  }
 0x554   : > { %6960 = vmatpush1.bf16.msra.mxu0 %v9331_v29  ;;  %6699 = vmatprep.subr.bf16.mxu1 %v9336_v60  ;;  %v9400_v29 = vld [vmem:[#allocation13 + $0x510] ss:$8 sps:$4 sm:$0xff]   ;;  %v9408_v60 = vld [vmem:[#allocation13 + $0x524] ss:$8 sps:$4 sm:$0xff]  }
 0x555   : > { %6961 = vmatprep.subr.bf16.mxu0 %v9339_v45  ;;  %v9411_v45 = vld [vmem:[#allocation13 + $0xba4] ss:$8 sps:$4 sm:$0xff]  }
 0x557   : > { %6700 = vmatpush1.bf16.msra.mxu1 %v9334_v30  ;;  %v9406_v30 = vld [vmem:[#allocation13 + $0x520] ss:$8 sps:$4 sm:$0xff]  }
 0x558   : > { %6962 = vmatpush1.bf16.msra.mxu0 %v9337_v9  ;;  %6701 = vmatprep.subr.bf16.mxu1 %v9342_v3  ;;  %v9409_v9 = vld [vmem:[#allocation13 + $0xba0] ss:$8 sps:$4 sm:$0xff]   ;;  %v9414_v3 = vld [vmem:[#allocation13 + $0x534] ss:$8 sps:$4 sm:$0xff]  }
 0x559   : > { %6963 = vmatprep.subr.bf16.mxu0 %v9345_v49  ;;  %v9417_v49 = vld [vmem:[#allocation13 + $0xbb4] ss:$8 sps:$4 sm:$0xff]  }
 0x55b   : > { %6702 = vmatpush1.bf16.msra.mxu1 %v9340_v59  ;;  %v9415_v59 = vld [vmem:[#allocation13 + $0xbb0] ss:$8 sps:$4 sm:$0xff]  }
 0x55c   : > { %6964 = vmatpush1.bf16.msra.mxu0 %v9343_v6  ;;  %6703 = vmatprep.subr.bf16.mxu1 %v9348_v50  ;;  %v9420_v6 = vld [vmem:[#allocation13 + $0x544] ss:$8 sps:$4 sm:$0xff]  }
 0x55d   : > { %6974 = vmatprep.subr.bf16.mxu0 %v9351_v51  ;;  %v9423_v50 = vld [vmem:[#allocation13 + $0xbc4] ss:$8 sps:$4 sm:$0xff]   ;;  %v9418_v51 = vld [vmem:[#allocation13 + $0x540] ss:$8 sps:$4 sm:$0xff]  }
 0x55f   : > { %6966 = vmatmul.mubr.bf16.vlgmr.msra.gmra.mrb[48].mxu0 %v3427_v2  ;;  %6704 = vmatpush1.bf16.msra.mxu1 %v9346_v0  ;;  %v9421_v0 = vld [vmem:[#allocation13 + $0xbc0] ss:$8 sps:$4 sm:$0xff]   ;;  %v9429_v2 = vld [vmem:[#allocation13 + $0xbd4] ss:$8 sps:$4 sm:$0xff]  }
 0x560   : > { %6975 = vmatpush1.bf16.msra.mxu0 %v9349_v15  ;;  %7006 = vmatprep.mubr.bf16.mxu0 %v3430_v23  ;;  %v9426_v15 = vld [vmem:[#allocation13 + $0x554] ss:$8 sps:$4 sm:$0xff]   ;;  %v9432_v23 = vld [vmem:[#allocation13 + $0x564] ss:$8 sps:$4 sm:$0xff]  }
 0x561   : > { %6705 = vmatprep.subr.bf16.mxu1 %v9354_v16  ;;  %6976 = vmatprep.subr.bf16.mxu0 %v9357_v17  ;;  %v9424_v16 = vld [vmem:[#allocation13 + $0x550] ss:$8 sps:$4 sm:$0xff]  }
 0x562   : > { %v9427_v17 = vld [vmem:[#allocation13 + $0xbd0] ss:$8 sps:$4 sm:$0xff]  }
 0x563   : > { %6706 = vmatpush1.bf16.msra.mxu1 %v9352_v21  ;;  %v9435_v21 = vld [vmem:[#allocation13 + $0xbe4] ss:$8 sps:$4 sm:$0xff]  }
 0x564   : > { %6977 = vmatpush1.bf16.msra.mxu0 %v9355_v28  ;;  %6707 = vmatprep.subr.bf16.mxu1 %v9360_v52  ;;  %v9430_v28 = vld [vmem:[#allocation13 + $0x560] ss:$8 sps:$4 sm:$0xff]  }
 0x565   : > { %6978 = vmatprep.subr.bf16.mxu0 %v9363_v41  ;;  %v9433_v52 = vld [vmem:[#allocation13 + $0xbe0] ss:$8 sps:$4 sm:$0xff]   ;;  %v9438_v41 = vld [vmem:[#allocation13 + $0x574] ss:$8 sps:$4 sm:$0xff]  }
 0x567   : > { %6708 = vmatpush1.bf16.msra.mxu1 %v9358_v53  ;;  %v9441_v53 = vld [vmem:[#allocation13 + $0xbf4] ss:$8 sps:$4 sm:$0xff]  }
 0x568   : > { %6979 = vmatpush1.bf16.msra.mxu0 %v9361_v18  ;;  %6709 = vmatprep.subr.bf16.mxu1 %v9366_v42  ;;  %v9436_v18 = vld [vmem:[#allocation13 + $0x570] ss:$8 sps:$4 sm:$0xff]  }
 0x569   : > { %6980 = vmatprep.subr.bf16.mxu0 %v9369_v39  ;;  %v9439_v42 = vld [vmem:[#allocation13 + $0xbf0] ss:$8 sps:$4 sm:$0xff]   ;;  %v9444_v39 = vld [vmem:[#allocation13 + $0x584] ss:$8 sps:$4 sm:$0xff]  }
 0x56b   : > { %6710 = vmatpush1.bf16.msra.mxu1 %v9364_v20  ;;  %v9447_v20 = vld [vmem:[#allocation13 + $0xc04] ss:$8 sps:$4 sm:$0xff]  }
 0x56c   : > { %6981 = vmatpush1.bf16.msra.mxu0 %v9367_v11  ;;  %6711 = vmatprep.subr.bf16.mxu1 %v9372_v22  ;;  %v11404_v11 = vld [vmem:[#allocation6 + $0x18] sm:$0xff] }
 0x56d   : > { %6982 = vmatprep.subr.bf16.mxu0 %v9375_v38  ;;  %v3350_v22 = vrot.slane %v11404_v11, %v11315_v37  ;;  %v9442_v38 = vld [vmem:[#allocation13 + $0x580] ss:$8 sps:$4 sm:$0xff]  }
 0x56f   : > { %6712 = vmatpush1.bf16.msra.mxu1 %v9370_v57  ;;  %v9445_v57 = vld [vmem:[#allocation13 + $0xc00] ss:$8 sps:$4 sm:$0xff]  }
 0x570   : > { %6983 = vmatpush1.bf16.msra.mxu0 %v9373_v8  ;;  %6713 = vmatprep.subr.bf16.mxu1 %v9378_v26  ;;  %v3429_v8 = vpack.c.bf16 %v11298_v1, %v11298_v1  ;;  %v9450_v26 = vld [vmem:[#allocation13 + $0x594] ss:$8 sps:$4 sm:$0xff]  }
 0x571   : > { %6984 = vmatprep.subr.bf16.mxu0 %v9381_v56  ;;  %v9453_v56 = vld [vmem:[#allocation13 + $0xc14] ss:$8 sps:$4 sm:$0xff]  }
 0x572   : > { %v9462_v1 = vld [vmem:[#allocation13 + $0x5b4] ss:$8 sps:$4 sm:$0xff]  }
 0x573   : > { %6714 = vmatpush1.bf16.msra.mxu1 %v9376_v34  ;;  %v3432_v34 = vpack.c.bf16 %v3350_v22, %v3350_v22  ;;  %v3434_v22 = vpack.c.bf16 %v11353_v47, %v11353_v47  ;;  %v9529_v47 = vld [vmem:[#allocation13 + $0xd50] ss:$8 sps:$4 sm:$0xff]  }
 0x574   : > { %6985 = vmatpush1.bf16.msra.mxu0 %v9379_v36  ;;  %6715 = vmatprep.subr.bf16.mxu1 %v9384_v61  ;;  %v9448_v36 = vld [vmem:[#allocation13 + $0x590] ss:$8 sps:$4 sm:$0xff]  }
 0x575   : > { %6986 = vmatprep.subr.bf16.mxu0 %v9387_v54  ;;  %v9451_v61 = vld [vmem:[#allocation13 + $0xc10] ss:$8 sps:$4 sm:$0xff]   ;;  %v9456_v54 = vld [vmem:[#allocation13 + $0x5a4] ss:$8 sps:$4 sm:$0xff]  }
 0x577   : > { %6716 = vmatpush1.bf16.msra.mxu1 %v9382_v55  ;;  %v9459_v55 = vld [vmem:[#allocation13 + $0xc24] ss:$8 sps:$4 sm:$0xff]  }
 0x578   : > { %6987 = vmatpush1.bf16.msra.mxu0 %v9385_v58  ;;  %6717 = vmatprep.subr.bf16.mxu1 %v9390_v27  ;;  %v9454_v58 = vld [vmem:[#allocation13 + $0x5a0] ss:$8 sps:$4 sm:$0xff]  }
 0x579   : > { %6988 = vmatprep.subr.bf16.mxu0 %v9393_v43  ;;  %v9457_v27 = vld [vmem:[#allocation13 + $0xc20] ss:$8 sps:$4 sm:$0xff]   ;;  %v9465_v43 = vld [vmem:[#allocation13 + $0xc34] ss:$8 sps:$4 sm:$0xff]  }
 0x57b   : > { %6718 = vmatpush1.bf16.msra.mxu1 %v9388_v48  ;;  %v9460_v48 = vld [vmem:[#allocation13 + $0x5b0] ss:$8 sps:$4 sm:$0xff]  }
 0x57c   : > { %6989 = vmatpush1.bf16.msra.mxu0 %v9391_v46  ;;  %6728 = vmatprep.subr.bf16.mxu1 %v9396_v40  ;;  %v9463_v46 = vld [vmem:[#allocation13 + $0xc30] ss:$8 sps:$4 sm:$0xff]   ;;  %v9471_v40 = vld [vmem:[#allocation13 + $0xc44] ss:$8 sps:$4 sm:$0xff]  }
 0x57d   : > { %6990 = vmatprep.subr.bf16.mxu0 %v9399_v5  ;;  %v9466_v5 = vld [vmem:[#allocation13 + $0x5c0] ss:$8 sps:$4 sm:$0xff]  }
 0x57e   : > { %6720 = vmatmul.mubr.bf16.vlgmr.msra.gmra.mrb[12].mxu1 %v3415_v12  ;;  %v9474_v12 = vld [vmem:[#allocation13 + $0x5d4] ss:$8 sps:$4 sm:$0xff]  }
 0x57f   : > { %6729 = vmatpush1.bf16.msra.mxu1 %v9394_v63  ;;  %6760 = vmatprep.mubr.bf16.mxu1 %v3418_v31  ;;  %v9469_v63 = vld [vmem:[#allocation13 + $0xc40] ss:$8 sps:$4 sm:$0xff]   ;;  %v9475_v31 = vld [vmem:[#allocation13 + $0xc50] ss:$8 sps:$4 sm:$0xff]  }
 0x580   : > { %6991 = vmatpush1.bf16.msra.mxu0 %v9397_v13  ;;  %6730 = vmatprep.subr.bf16.mxu1 %v9402_v24  ;;  %v9477_v13 = vld [vmem:[#allocation13 + $0xc54] ss:$8 sps:$4 sm:$0xff]   ;;  %v9472_v24 = vld [vmem:[#allocation13 + $0x5d0] ss:$8 sps:$4 sm:$0xff]  }
 0x581   : > { %6992 = vmatprep.subr.bf16.mxu0 %v9405_v44  ;;  %v9480_v44 = vld [vmem:[#allocation13 + $0x5e4] ss:$8 sps:$4 sm:$0xff]  }
 0x583   : > { %6731 = vmatpush1.bf16.msra.mxu1 %v9400_v29  ;;  %v9483_v29 = vld [vmem:[#allocation13 + $0xc64] ss:$8 sps:$4 sm:$0xff]  }
 0x584   : > { %6993 = vmatpush1.bf16.msra.mxu0 %v9403_v14  ;;  %6732 = vmatprep.subr.bf16.mxu1 %v9408_v60  ;;  %v9478_v14 = vld [vmem:[#allocation13 + $0x5e0] ss:$8 sps:$4 sm:$0xff]  }
 0x585   : > { %6994 = vmatprep.subr.bf16.mxu0 %v9411_v45  ;;  %v9481_v60 = vld [vmem:[#allocation13 + $0xc60] ss:$8 sps:$4 sm:$0xff]   ;;  %v9486_v45 = vld [vmem:[#allocation13 + $0x5f4] ss:$8 sps:$4 sm:$0xff]  }
 0x587   : > { %6733 = vmatpush1.bf16.msra.mxu1 %v9406_v30  ;;  %v9489_v30 = vld [vmem:[#allocation13 + $0xc74] ss:$8 sps:$4 sm:$0xff]  }
 0x588   : > { %6995 = vmatpush1.bf16.msra.mxu0 %v9409_v9  ;;  %6734 = vmatprep.subr.bf16.mxu1 %v9414_v3  ;;  %v9484_v9 = vld [vmem:[#allocation13 + $0x5f0] ss:$8 sps:$4 sm:$0xff]  }
 0x589   : > { %6996 = vmatprep.subr.bf16.mxu0 %v9417_v49  ;;  %v9487_v3 = vld [vmem:[#allocation13 + $0xc70] ss:$8 sps:$4 sm:$0xff]   ;;  %v9492_v49 = vld [vmem:[#allocation13 + $0xc84] ss:$8 sps:$4 sm:$0xff]  }
 0x58b   : > { %6735 = vmatpush1.bf16.msra.mxu1 %v9412_v10  ;;  %v3417_v10 = vpack.c.bf16 %v11253_v62, %v11253_v62  ;;  %v9507_v62 = vld [vmem:[#allocation13 + $0xcd4] ss:$8 sps:$4 sm:$0xff]  }
 0x58c   : > { %6997 = vmatpush1.bf16.msra.mxu0 %v9415_v59  ;;  %6736 = vmatprep.subr.bf16.mxu1 %v9420_v6  ;;  %v9490_v59 = vld [vmem:[#allocation13 + $0xc80] ss:$8 sps:$4 sm:$0xff]   ;;  %v9495_v6 = vld [vmem:[#allocation13 + $0xc94] ss:$8 sps:$4 sm:$0xff]  }
 0x58d   : > { %6998 = vmatprep.subr.bf16.mxu0 %v9423_v50  ;;  %v9493_v50 = vld [vmem:[#allocation13 + $0xc90] ss:$8 sps:$4 sm:$0xff]  }
 0x58f   : > { %6737 = vmatpush1.bf16.msra.mxu1 %v9418_v51  ;;  %v9498_v51 = vld [vmem:[#allocation13 + $0xca4] ss:$8 sps:$4 sm:$0xff]  }
 0x590   : > { %6999 = vmatpush1.bf16.msra.mxu0 %v9421_v0  ;;  %6738 = vmatprep.subr.bf16.mxu1 %v9426_v15  ;;  %v9496_v0 = vld [vmem:[#allocation13 + $0xca0] ss:$8 sps:$4 sm:$0xff]   ;;  %v9501_v15 = vld [vmem:[#allocation13 + $0xcb4] ss:$8 sps:$4 sm:$0xff]  }
 0x591   : > { %7000 = vmatprep.subr.bf16.mxu0 %v9429_v2  ;;  %v9499_v2 = vld [vmem:[#allocation13 + $0xcb0] ss:$8 sps:$4 sm:$0xff]  }
 0x593   : > { %6739 = vmatpush1.bf16.msra.mxu1 %v9424_v16  ;;  %v9504_v16 = vld [vmem:[#allocation13 + $0xcc4] ss:$8 sps:$4 sm:$0xff]  }
 0x594   : > { %7001 = vmatpush1.bf16.msra.mxu0 %v9427_v17  ;;  %6740 = vmatprep.subr.bf16.mxu1 %v9432_v23  ;;  %v9502_v17 = vld [vmem:[#allocation13 + $0xcc0] ss:$8 sps:$4 sm:$0xff]   ;;  %v9505_v23 = vld [vmem:[#allocation13 + $0xcd0] ss:$8 sps:$4 sm:$0xff]  }
 0x595   : > { %7002 = vmatprep.subr.bf16.mxu0 %v9435_v21  ;;  %v9510_v21 = vld [vmem:[#allocation13 + $0xce4] ss:$8 sps:$4 sm:$0xff]  }
 0x597   : > { %6741 = vmatpush1.bf16.msra.mxu1 %v9430_v28  ;;  %v9508_v28 = vld [vmem:[#allocation13 + $0xce0] ss:$8 sps:$4 sm:$0xff]  }
 0x598   : > { %7003 = vmatpush1.bf16.msra.mxu0 %v9433_v52  ;;  %6742 = vmatprep.subr.bf16.mxu1 %v9438_v41  ;;  %v9513_v52 = vld [vmem:[#allocation13 + $0xcf4] ss:$8 sps:$4 sm:$0xff]   ;;  %v9511_v41 = vld [vmem:[#allocation13 + $0xcf0] ss:$8 sps:$4 sm:$0xff]  }
 0x599   : > { %7004 = vmatprep.subr.bf16.mxu0 %v9441_v53  ;;  %v3346_v53 = vrot.slane %v11404_v11, %v11318_v4  ;;  %v9523_v11 = vld [vmem:[#allocation13 + $0xd30] ss:$8 sps:$4 sm:$0xff]  }
 0x59b   : > { %6743 = vmatpush1.bf16.msra.mxu1 %v9436_v18  ;;  %v9516_v18 = vld [vmem:[#allocation13 + $0xd04] ss:$8 sps:$4 sm:$0xff]  }
 0x59c   : > { %7005 = vmatpush1.bf16.msra.mxu0 %v9439_v42  ;;  %6744 = vmatprep.subr.bf16.mxu1 %v9444_v39  ;;  %v9514_v42 = vld [vmem:[#allocation13 + $0xd00] ss:$8 sps:$4 sm:$0xff]   ;;  %v3431_v39 = vpack.c.bf16 %v3346_v53, %v3346_v53  ;;  %v9577_v53 = vld [vmem:[#allocation13 + $0xe50] ss:$8 sps:$4 sm:$0xff]  }
 0x59d   : > { %7015 = vmatprep.subr.bf16.mxu0 %v9447_v20  ;;  %v9519_v20 = vld [vmem:[#allocation13 + $0xd14] ss:$8 sps:$4 sm:$0xff]  }
 0x59f   : > { %7007 = vmatmul.mubr.bf16.vlgmr.msra.gmra.mrb[48].mxu0 %v3429_v8  ;;  %6745 = vmatpush1.bf16.msra.mxu1 %v9442_v38  ;;  %v9517_v38 = vld [vmem:[#allocation13 + $0xd10] ss:$8 sps:$4 sm:$0xff]   ;;  %v9520_v8 = vld [vmem:[#allocation13 + $0xd20] ss:$8 sps:$4 sm:$0xff]  }
 0x5a0   : > { %7016 = vmatpush1.bf16.msra.mxu0 %v9445_v57  ;;  %7047 = vmatprep.mubr.bf16.mxu0 %v3432_v34  ;;  %v9522_v57 = vld [vmem:[#allocation13 + $0xd24] ss:$8 sps:$4 sm:$0xff]   ;;  %v9526_v34 = vld [vmem:[#allocation13 + $0xd40] ss:$8 sps:$4 sm:$0xff]  }
 0x5a1   : > { %6746 = vmatprep.subr.bf16.mxu1 %v9450_v26  ;;  %7017 = vmatprep.subr.bf16.mxu0 %v9453_v56  ;;  %v9525_v26 = vld [vmem:[#allocation13 + $0xd34] ss:$8 sps:$4 sm:$0xff]   ;;  %v9528_v56 = vld [vmem:[#allocation13 + $0xd44] ss:$8 sps:$4 sm:$0xff]  }
 0x5a3   : > { %6747 = vmatpush1.bf16.msra.mxu1 %v9448_v36  ;;  %v9531_v36 = vld [vmem:[#allocation13 + $0xd54] ss:$8 sps:$4 sm:$0xff]  }
 0x5a4   : > { %7018 = vmatpush1.bf16.msra.mxu0 %v9451_v61  ;;  %6748 = vmatprep.subr.bf16.mxu1 %v9456_v54  ;;  %v9534_v61 = vld [vmem:[#allocation13 + $0xd64] ss:$8 sps:$4 sm:$0xff]   ;;  %v9532_v54 = vld [vmem:[#allocation13 + $0xd60] ss:$8 sps:$4 sm:$0xff]  }
 0x5a5   : > { %7019 = vmatprep.subr.bf16.mxu0 %v9459_v55  ;;  %v9537_v55 = vld [vmem:[#allocation13 + $0xd74] ss:$8 sps:$4 sm:$0xff]  }
 0x5a7   : > { %6749 = vmatpush1.bf16.msra.mxu1 %v9454_v58  ;;  %v9535_v58 = vld [vmem:[#allocation13 + $0xd70] ss:$8 sps:$4 sm:$0xff]  }
 0x5a8   : > { %7020 = vmatpush1.bf16.msra.mxu0 %v9457_v27  ;;  %6750 = vmatprep.subr.bf16.mxu1 %v9462_v1  ;;  %v9540_v27 = vld [vmem:[#allocation13 + $0xd84] ss:$8 sps:$4 sm:$0xff]   ;;  %v9538_v1 = vld [vmem:[#allocation13 + $0xd80] ss:$8 sps:$4 sm:$0xff]  }
 0x5a9   : > { %7021 = vmatprep.subr.bf16.mxu0 %v9465_v43  ;;  %v9543_v43 = vld [vmem:[#allocation13 + $0xd94] ss:$8 sps:$4 sm:$0xff]  }
 0x5ab   : > { %6751 = vmatpush1.bf16.msra.mxu1 %v9460_v48  ;;  %v9541_v48 = vld [vmem:[#allocation13 + $0xd90] ss:$8 sps:$4 sm:$0xff]  }
 0x5ac   : > { %7022 = vmatpush1.bf16.msra.mxu0 %v9463_v46  ;;  %6752 = vmatprep.subr.bf16.mxu1 %v9468_v32  ;;  %v9546_v46 = vld [vmem:[#allocation13 + $0xda4] ss:$8 sps:$4 sm:$0xff]   ;;  %v9544_v32 = vld [vmem:[#allocation13 + $0xda0] ss:$8 sps:$4 sm:$0xff]  }
 0x5ad   : > { %7023 = vmatprep.subr.bf16.mxu0 %v9471_v40  ;;  %v9549_v40 = vld [vmem:[#allocation13 + $0xdb4] ss:$8 sps:$4 sm:$0xff]  }
 0x5af   : > { %6753 = vmatpush1.bf16.msra.mxu1 %v9466_v5  ;;  %v9547_v5 = vld [vmem:[#allocation13 + $0xdb0] ss:$8 sps:$4 sm:$0xff]  }
 0x5b0   : > { %7024 = vmatpush1.bf16.msra.mxu0 %v9469_v63  ;;  %6754 = vmatprep.subr.bf16.mxu1 %v9474_v12  ;;  %v9552_v63 = vld [vmem:[#allocation13 + $0xdc4] ss:$8 sps:$4 sm:$0xff]   ;;  %v9550_v12 = vld [vmem:[#allocation13 + $0xdc0] ss:$8 sps:$4 sm:$0xff]  }
 0x5b1   : > { %7025 = vmatprep.subr.bf16.mxu0 %v9477_v13  ;;  %v9555_v13 = vld [vmem:[#allocation13 + $0xdd4] ss:$8 sps:$4 sm:$0xff]  }
 0x5b3   : > { %6755 = vmatpush1.bf16.msra.mxu1 %v9472_v24  ;;  %v9553_v24 = vld [vmem:[#allocation13 + $0xdd0] ss:$8 sps:$4 sm:$0xff]  }
 0x5b4   : > { %7026 = vmatpush1.bf16.msra.mxu0 %v9475_v31  ;;  %6756 = vmatprep.subr.bf16.mxu1 %v9480_v44  ;;  %v9558_v31 = vld [vmem:[#allocation13 + $0xde4] ss:$8 sps:$4 sm:$0xff]   ;;  %v9556_v44 = vld [vmem:[#allocation13 + $0xde0] ss:$8 sps:$4 sm:$0xff]  }
 0x5b5   : > { %7027 = vmatprep.subr.bf16.mxu0 %v9483_v29  ;;  %v9561_v29 = vld [vmem:[#allocation13 + $0xdf4] ss:$8 sps:$4 sm:$0xff]  }
 0x5b7   : > { %6757 = vmatpush1.bf16.msra.mxu1 %v9478_v14  ;;  %v9559_v14 = vld [vmem:[#allocation13 + $0xdf0] ss:$8 sps:$4 sm:$0xff]  }
 0x5b8   : > { %7028 = vmatpush1.bf16.msra.mxu0 %v9481_v60  ;;  %6758 = vmatprep.subr.bf16.mxu1 %v9486_v45  ;;  %v9564_v60 = vld [vmem:[#allocation13 + $0xe04] ss:$8 sps:$4 sm:$0xff]   ;;  %v9562_v45 = vld [vmem:[#allocation13 + $0xe00] ss:$8 sps:$4 sm:$0xff]  }
 0x5b9   : > { %7029 = vmatprep.subr.bf16.mxu0 %v9489_v30  ;;  %v3433_v30 = vpack.c.bf16 %v11356_v19, %v11356_v19  ;;  %v9568_v19 = vld [vmem:[#allocation13 + $0xe20] ss:$8 sps:$4 sm:$0xff]  }
 0x5bb   : > { %6759 = vmatpush1.bf16.msra.mxu1 %v9484_v9  ;;  %v9567_v9 = vld [vmem:[#allocation13 + $0xe14] ss:$8 sps:$4 sm:$0xff]  }
 0x5bc   : > { %7030 = vmatpush1.bf16.msra.mxu0 %v9487_v3  ;;  %v3436_v3 = vpack.c.bf16 %v11359_v33, %v11359_v33  ;;  %v9663_v33 = vld [vmem:[#allocation16 + $0x10] sm:$0xff]  }
 0x5bd   : > { %7031 = vmatprep.subr.bf16.mxu0 %v9492_v49  ;;  %v9658_v49 = vld [vmem:[#allocation16 + $0x40] sm:$0xff]  }
 0x5be   : > { %6761 = vmatmul.mubr.bf16.vlgmr.msra.gmra.mrb[12].mxu1 %v3417_v10  ;;  %v9659_v10 = vld [vmem:[#allocation16] sm:$0xff]   ;;  %8275 = vmatprep.subr.bf16.mxu1 %v9658_v49  ;;  %v9639_v49 = vld [vmem:[#allocation13 + $0xf94] ss:$8 sps:$4 sm:$0xff]  }
 0x5bf   : > { %8276 = vmatpush3.bf16.msra.mxu1 %v9659_v10  ;;  %v9637_v10 = vld [vmem:[#allocation13 + $0xf90] ss:$8 sps:$4 sm:$0xff]  }
 0x5c0   : > { %7032 = vmatpush1.bf16.msra.mxu0 %v9490_v59  ;;  %v9660_v59 = vld [vmem:[#allocation16 + $0x48] sm:$0xff]  }
 0x5c1   : > { %7033 = vmatprep.subr.bf16.mxu0 %v9495_v6  ;;  %v9565_v6 = vld [vmem:[#allocation13 + $0xe10] ss:$8 sps:$4 sm:$0xff]   ;;  %8277 = vmatprep.subr.bf16.mxu1 %v9660_v59  ;;  %v9642_v59 = vld [vmem:[#allocation13 + $0xfa4] ss:$8 sps:$4 sm:$0xff]  }
 0x5c4   : > { %7034 = vmatpush1.bf16.msra.mxu0 %v9493_v50  ;;  %v9570_v50 = vld [vmem:[#allocation13 + $0xe24] ss:$8 sps:$4 sm:$0xff]  }
 0x5c5   : > { %7035 = vmatprep.subr.bf16.mxu0 %v9498_v51  ;;  %v9661_v51 = vld [vmem:[#allocation16 + $0x8] sm:$0xff]  }
 0x5c6   : > { %8278 = vmatpush3.bf16.msra.mxu1 %v9661_v51  ;;  %v9643_v51 = vld [vmem:[#allocation13 + $0xfb0] ss:$8 sps:$4 sm:$0xff]  }
 0x5c8   : > { %7036 = vmatpush1.bf16.msra.mxu0 %v9496_v0  ;;  %v9662_v0 = vld [vmem:[#allocation16 + $0x50] sm:$0xff]  }
 0x5c9   : > { %7037 = vmatprep.subr.bf16.mxu0 %v9501_v15  ;;  %v9573_v15 = vld [vmem:[#allocation13 + $0xe34] ss:$8 sps:$4 sm:$0xff]   ;;  %8279 = vmatprep.subr.bf16.mxu1 %v9662_v0  ;;  %v9648_v0 = vld [vmem:[#allocation13 + $0xfc4] ss:$8 sps:$4 sm:$0xff]  }
 0x5ca   : > { %8280 = vmatpush3.bf16.msra.mxu1 %v9663_v33  ;;  %v9649_v33 = vld [vmem:[#allocation13 + $0xfd0] ss:$8 sps:$4 sm:$0xff]  }
 0x5cc   : > { %7038 = vmatpush1.bf16.msra.mxu0 %v9499_v2  ;;  %v9664_v2 = vld [vmem:[#allocation16 + $0x58] sm:$0xff]  }
 0x5cd   : > { %7039 = vmatprep.subr.bf16.mxu0 %v9504_v16  ;;  %v9571_v16 = vld [vmem:[#allocation13 + $0xe30] ss:$8 sps:$4 sm:$0xff]   ;;  %8281 = vmatprep.subr.bf16.mxu1 %v9664_v2 }
 0x5d0   : > { %7040 = vmatpush1.bf16.msra.mxu0 %v9502_v17  ;;  %v9576_v17 = vld [vmem:[#allocation13 + $0xe44] ss:$8 sps:$4 sm:$0xff]  }
 0x5d1   : > { %7041 = vmatprep.subr.bf16.mxu0 %v9507_v62  ;;  %v9665_v62 = vld [vmem:[#allocation16 + $0x18] sm:$0xff]  }
 0x5d2   : > { %8282 = vmatpush3.bf16.msra.mxu1 %v9665_v62 }
 0x5d4   : > { %7042 = vmatpush1.bf16.msra.mxu0 %v9505_v23  ;;  %v9666_v23 = vld [vmem:[#allocation16 + $0x60] sm:$0xff]  }
 0x5d5   : > { %7043 = vmatprep.subr.bf16.mxu0 %v9510_v21  ;;  %v9574_v21 = vld [vmem:[#allocation13 + $0xe40] ss:$8 sps:$4 sm:$0xff]   ;;  %8283 = vmatprep.subr.bf16.mxu1 %v9666_v23 }
 0x5d8   : > { %7044 = vmatpush1.bf16.msra.mxu0 %v9508_v28  ;;  %v9579_v28 = vld [vmem:[#allocation13 + $0xe54] ss:$8 sps:$4 sm:$0xff]  }
 0x5d9   : > { %7045 = vmatprep.subr.bf16.mxu0 %v9513_v52  ;;  %v9667_v52 = vld [vmem:[#allocation16 + $0x20] sm:$0xff]  }
 0x5da   : > { %8284 = vmatpush3.bf16.msra.mxu1 %v9667_v52  ;;  %v9655_v52 = vld [vmem:[#allocation13 + $0xff0] ss:$8 sps:$4 sm:$0xff]  }
 0x5dc   : > { %7046 = vmatpush1.bf16.msra.mxu0 %v9511_v41  ;;  %v9668_v41 = vld [vmem:[#allocation16 + $0x68] sm:$0xff]  }
 0x5dd   : > { %7056 = vmatprep.subr.bf16.mxu0 %v9516_v18  ;;  %v9582_v18 = vld [vmem:[#allocation13 + $0xe64] ss:$8 sps:$4 sm:$0xff]   ;;  %8285 = vmatprep.subr.bf16.mxu1 %v9668_v41  ;;  %v3437_v41 = vpack.c.bf16 %v11368_v25, %v11368_v25 }
 0x5df   : > { %7048 = vmatmul.mubr.bf16.vlgmr.msra.gmra.mrb[48].mxu0 %v3431_v39  ;;  %v9580_v39 = vld [vmem:[#allocation13 + $0xe60] ss:$8 sps:$4 sm:$0xff]  }
 0x5e0   : > { %7057 = vmatpush1.bf16.msra.mxu0 %v9514_v42  ;;  %7088 = vmatprep.mubr.bf16.mxu0 %v3434_v22  ;;  %v9669_v42 = vld [vmem:[#allocation16 + $0x28] sm:$0xff]  }
 0x5e1   : > { %7058 = vmatprep.subr.bf16.mxu0 %v9519_v20  ;;  %v9585_v20 = vld [vmem:[#allocation13 + $0xe74] ss:$8 sps:$4 sm:$0xff]   ;;  %8286 = vmatpush3.bf16.msra.mxu1 %v9669_v42  ;;  %v9583_v22 = vld [vmem:[#allocation13 + $0xe70] ss:$8 sps:$4 sm:$0xff]  }
 0x5e2   : > { %v9672_v42 = vld [vmem:[#allocation16 + $0x78] sm:$0xff]  }
 0x5e4   : > { %7059 = vmatpush1.bf16.msra.mxu0 %v9517_v38  ;;  %v9588_v38 = vld [vmem:[#allocation13 + $0xe84] ss:$8 sps:$4 sm:$0xff]  }
 0x5e5   : > { %7060 = vmatprep.subr.bf16.mxu0 %v9522_v57  ;;  %v9586_v57 = vld [vmem:[#allocation13 + $0xe80] ss:$8 sps:$4 sm:$0xff]  }
 0x5e8   : > { %7061 = vmatpush1.bf16.msra.mxu0 %v9520_v8  ;;  %v9591_v8 = vld [vmem:[#allocation13 + $0xe94] ss:$8 sps:$4 sm:$0xff]  }
 0x5e9   : > { %7062 = vmatprep.subr.bf16.mxu0 %v9525_v26  ;;  %v9589_v26 = vld [vmem:[#allocation13 + $0xe90] ss:$8 sps:$4 sm:$0xff]  }
 0x5ec   : > { %7063 = vmatpush1.bf16.msra.mxu0 %v9523_v11  ;;  %v9594_v11 = vld [vmem:[#allocation13 + $0xea4] ss:$8 sps:$4 sm:$0xff]  }
 0x5ed   : > { %7064 = vmatprep.subr.bf16.mxu0 %v9528_v56  ;;  %v9592_v56 = vld [vmem:[#allocation13 + $0xea0] ss:$8 sps:$4 sm:$0xff]  }
 0x5f0   : > { %7065 = vmatpush1.bf16.msra.mxu0 %v9526_v34  ;;  %v9597_v34 = vld [vmem:[#allocation13 + $0xeb4] ss:$8 sps:$4 sm:$0xff]  }
 0x5f1   : > { %7066 = vmatprep.subr.bf16.mxu0 %v9531_v36  ;;  %v9595_v36 = vld [vmem:[#allocation13 + $0xeb0] ss:$8 sps:$4 sm:$0xff]  }
 0x5f4   : > { %7067 = vmatpush1.bf16.msra.mxu0 %v9529_v47  ;;  %v9600_v47 = vld [vmem:[#allocation13 + $0xec4] ss:$8 sps:$4 sm:$0xff]  }
 0x5f5   : > { %7068 = vmatprep.subr.bf16.mxu0 %v9534_v61  ;;  %v9598_v61 = vld [vmem:[#allocation13 + $0xec0] ss:$8 sps:$4 sm:$0xff]  }
 0x5f8   : > { %7069 = vmatpush1.bf16.msra.mxu0 %v9532_v54  ;;  %v9603_v54 = vld [vmem:[#allocation13 + $0xed4] ss:$8 sps:$4 sm:$0xff]  }
 0x5f9   : > { %7070 = vmatprep.subr.bf16.mxu0 %v9537_v55  ;;  %v9601_v55 = vld [vmem:[#allocation13 + $0xed0] ss:$8 sps:$4 sm:$0xff]  }
 0x5fc   : > { %7071 = vmatpush1.bf16.msra.mxu0 %v9535_v58  ;;  %v9606_v58 = vld [vmem:[#allocation13 + $0xee4] ss:$8 sps:$4 sm:$0xff]  }
 0x5fd   : > { %7072 = vmatprep.subr.bf16.mxu0 %v9540_v27  ;;  %v9604_v27 = vld [vmem:[#allocation13 + $0xee0] ss:$8 sps:$4 sm:$0xff]  }
 0x600   : > { %7073 = vmatpush1.bf16.msra.mxu0 %v9538_v1  ;;  %v9609_v1 = vld [vmem:[#allocation13 + $0xef4] ss:$8 sps:$4 sm:$0xff]  }
 0x601   : > { %7074 = vmatprep.subr.bf16.mxu0 %v9543_v43  ;;  %v9607_v43 = vld [vmem:[#allocation13 + $0xef0] ss:$8 sps:$4 sm:$0xff]  }
 0x604   : > { %7075 = vmatpush1.bf16.msra.mxu0 %v9541_v48  ;;  %v9612_v48 = vld [vmem:[#allocation13 + $0xf04] ss:$8 sps:$4 sm:$0xff]  }
 0x605   : > { %7076 = vmatprep.subr.bf16.mxu0 %v9546_v46  ;;  %v9610_v46 = vld [vmem:[#allocation13 + $0xf00] ss:$8 sps:$4 sm:$0xff]  }
 0x608   : > { %7077 = vmatpush1.bf16.msra.mxu0 %v9544_v32  ;;  %v3435_v32 = vpack.c.bf16 %v11362_v35, %v11362_v35  ;;  %v9622_v35 = vld [vmem:[#allocation13 + $0xf40] ss:$8 sps:$4 sm:$0xff]  }
 0x609   : > { %7078 = vmatprep.subr.bf16.mxu0 %v9549_v40  ;;  %v9615_v40 = vld [vmem:[#allocation13 + $0xf14] ss:$8 sps:$4 sm:$0xff]  }
 0x60c   : > { %7079 = vmatpush1.bf16.msra.mxu0 %v9547_v5  ;;  %v3438_v5 = vpack.c.bf16 %v11365_v7, %v11365_v7  ;;  %v9625_v7 = vld [vmem:[#allocation13 + $0xf50] ss:$8 sps:$4 sm:$0xff]  }
 0x60d   : > { %7080 = vmatprep.subr.bf16.mxu0 %v9552_v63  ;;  %v9613_v63 = vld [vmem:[#allocation13 + $0xf10] ss:$8 sps:$4 sm:$0xff]  }
 0x610   : > { %7081 = vmatpush1.bf16.msra.mxu0 %v9550_v12  ;;  %v9618_v12 = vld [vmem:[#allocation13 + $0xf24] ss:$8 sps:$4 sm:$0xff]  }
 0x611   : > { %7082 = vmatprep.subr.bf16.mxu0 %v9555_v13  ;;  %v9616_v13 = vld [vmem:[#allocation13 + $0xf20] ss:$8 sps:$4 sm:$0xff]  }
 0x614   : > { %7083 = vmatpush1.bf16.msra.mxu0 %v9553_v24  ;;  %v9621_v24 = vld [vmem:[#allocation13 + $0xf34] ss:$8 sps:$4 sm:$0xff]  }
 0x615   : > { %7084 = vmatprep.subr.bf16.mxu0 %v9558_v31  ;;  %v9619_v31 = vld [vmem:[#allocation13 + $0xf30] ss:$8 sps:$4 sm:$0xff]  }
 0x618   : > { %7085 = vmatpush1.bf16.msra.mxu0 %v9556_v44  ;;  %v9624_v44 = vld [vmem:[#allocation13 + $0xf44] ss:$8 sps:$4 sm:$0xff]  }
 0x619   : > { %7086 = vmatprep.subr.bf16.mxu0 %v9561_v29  ;;  %v9627_v29 = vld [vmem:[#allocation13 + $0xf54] ss:$8 sps:$4 sm:$0xff]  }
 0x61c   : > { %7087 = vmatpush1.bf16.msra.mxu0 %v9559_v14  ;;  %v9630_v14 = vld [vmem:[#allocation13 + $0xf64] ss:$8 sps:$4 sm:$0xff]  }
 0x61d   : > { %7097 = vmatprep.subr.bf16.mxu0 %v9564_v60  ;;  %v9628_v60 = vld [vmem:[#allocation13 + $0xf60] ss:$8 sps:$4 sm:$0xff]  }
 0x61f   : > { %7089 = vmatmul.mubr.bf16.vlgmr.msra.gmra.mrb[48].mxu0 %v3433_v30  ;;  %v9631_v30 = vld [vmem:[#allocation13 + $0xf70] ss:$8 sps:$4 sm:$0xff]  }
 0x620   : > { %7098 = vmatpush1.bf16.msra.mxu0 %v9562_v45  ;;  %7129 = vmatprep.mubr.bf16.mxu0 %v3436_v3  ;;  %v9633_v45 = vld [vmem:[#allocation13 + $0xf74] ss:$8 sps:$4 sm:$0xff]   ;;  %v9634_v3 = vld [vmem:[#allocation13 + $0xf80] ss:$8 sps:$4 sm:$0xff]  }
 0x621   : > { %7099 = vmatprep.subr.bf16.mxu0 %v9567_v9  ;;  %v9636_v9 = vld [vmem:[#allocation13 + $0xf84] ss:$8 sps:$4 sm:$0xff]  }
 0x624   : > { %7100 = vmatpush1.bf16.msra.mxu0 %v9565_v6  ;;  %v9640_v6 = vld [vmem:[#allocation13 + $0xfa0] ss:$8 sps:$4 sm:$0xff]  }
 0x625   : > { %7101 = vmatprep.subr.bf16.mxu0 %v9570_v50  ;;  %v9645_v50 = vld [vmem:[#allocation13 + $0xfb4] ss:$8 sps:$4 sm:$0xff]  }
 0x628   : > { %7102 = vmatpush1.bf16.msra.mxu0 %v9568_v19  ;;  %v9646_v19 = vld [vmem:[#allocation13 + $0xfc0] ss:$8 sps:$4 sm:$0xff]  }
 0x629   : > { %7103 = vmatprep.subr.bf16.mxu0 %v9573_v15  ;;  %v9651_v15 = vld [vmem:[#allocation13 + $0xfd4] ss:$8 sps:$4 sm:$0xff]  }
 0x62c   : > { %7104 = vmatpush1.bf16.msra.mxu0 %v9571_v16  ;;  %v9654_v16 = vld [vmem:[#allocation13 + $0xfe4] ss:$8 sps:$4 sm:$0xff]  }
 0x62d   : > { %7105 = vmatprep.subr.bf16.mxu0 %v9576_v17 }
 0x630   : > { %7106 = vmatpush1.bf16.msra.mxu0 %v9574_v21  ;;  %v9652_v21 = vld [vmem:[#allocation13 + $0xfe0] ss:$8 sps:$4 sm:$0xff]  }
 0x631   : > { %7107 = vmatprep.subr.bf16.mxu0 %v9579_v28  ;;  %v9657_v28 = vld [vmem:[#allocation13 + $0xff4] ss:$8 sps:$4 sm:$0xff]  }
 0x634   : > { %7108 = vmatpush1.bf16.msra.mxu0 %v9577_v53  ;;  %v9670_v53 = vld [vmem:[#allocation16 + $0x70] sm:$0xff]  }
 0x635   : > { %7109 = vmatprep.subr.bf16.mxu0 %v9582_v18  ;;  %v9671_v18 = vld [vmem:[#allocation16 + $0x30] sm:$0xff]   ;;  %8287 = vmatprep.subr.bf16.mxu1 %v9670_v53 }
 0x636   : > { %8288 = vmatpush3.bf16.msra.mxu1 %v9671_v18 }
 0x637   : > { %8289 = vmatprep.subr.bf16.mxu1 %v9672_v42 }
 0x638   : > { %7110 = vmatpush1.bf16.msra.mxu0 %v9580_v39  ;;  %v9673_v39 = vld [vmem:[#allocation16 + $0x38] sm:$0xff]  }
 0x639   : > { %7111 = vmatprep.subr.bf16.mxu0 %v9585_v20  ;;  %v3951_v20 = vld [vmem:[#allocation15] sm:$0x3] }
 0x63a   : > { %8290 = vmatpush3.bf16.msra.mxu1 %v9673_v39 }
 0x63c   : > { %7112 = vmatpush1.bf16.msra.mxu0 %v9583_v22  ;;  %v6516_v22 = vrot.slane %v3951_v20, %v11318_v4 }
 0x63d   : > { %7113 = vmatprep.subr.bf16.mxu0 %v9588_v38  ;;  %v6520_v38 = vrot.slane %v3951_v20, %v11315_v37 }
 0x640   : > { %7114 = vmatpush1.bf16.msra.mxu0 %v9586_v57 }
 0x641   : > { %7115 = vmatprep.subr.bf16.mxu0 %v9591_v8 }
 0x644   : > { %7116 = vmatpush1.bf16.msra.mxu0 %v9589_v26 }
 0x645   : > { %7117 = vmatprep.subr.bf16.mxu0 %v9594_v11 }
 0x648   : > { %7118 = vmatpush1.bf16.msra.mxu0 %v9592_v56 }
 0x649   : > { %7119 = vmatprep.subr.bf16.mxu0 %v9597_v34 }
 0x64c   : > { %7120 = vmatpush1.bf16.msra.mxu0 %v9595_v36 }
 0x64d   : > { %7121 = vmatprep.subr.bf16.mxu0 %v9600_v47 }
 0x650   : > { %7122 = vmatpush1.bf16.msra.mxu0 %v9598_v61 }
 0x651   : > { %7123 = vmatprep.subr.bf16.mxu0 %v9603_v54 }
 0x654   : > { %7124 = vmatpush1.bf16.msra.mxu0 %v9601_v55 }
 0x655   : > { %7125 = vmatprep.subr.bf16.mxu0 %v9606_v58  ;;  %v7215_v58 = vld [vmem:[#allocation18] sm:$0x1] }
 0x658   : > { %7126 = vmatpush1.bf16.msra.mxu0 %v9604_v27 }
 0x659   : > { %7127 = vmatprep.subr.bf16.mxu0 %v9609_v1 }
 0x65c   : > { %7128 = vmatpush1.bf16.msra.mxu0 %v9607_v43 }
 0x65d   : > { %7138 = vmatprep.subr.bf16.mxu0 %v9612_v48 }
 0x65f   : > { %7130 = vmatmul.mubr.bf16.vlgmr.msra.gmra.mrb[48].mxu0 %v3435_v32 }
 0x660   : > { %7139 = vmatpush1.bf16.msra.mxu0 %v9610_v46  ;;  %7170 = vmatprep.mubr.bf16.mxu0 %v3438_v5 }
 0x661   : > { %7140 = vmatprep.subr.bf16.mxu0 %v9615_v40 }
 0x664   : > { %7141 = vmatpush1.bf16.msra.mxu0 %v9613_v63 }
 0x665   : > { %7142 = vmatprep.subr.bf16.mxu0 %v9618_v12 }
 0x668   : > { %7143 = vmatpush1.bf16.msra.mxu0 %v9616_v13 }
 0x669   : > { %7144 = vmatprep.subr.bf16.mxu0 %v9621_v24 }
 0x66c   : > { %7145 = vmatpush1.bf16.msra.mxu0 %v9619_v31 }
 0x66d   : > { %7146 = vmatprep.subr.bf16.mxu0 %v9624_v44 }
 0x670   : > { %7147 = vmatpush1.bf16.msra.mxu0 %v9622_v35 }
 0x671   : > { %7148 = vmatprep.subr.bf16.mxu0 %v9627_v29 }
 0x674   : > { %7149 = vmatpush1.bf16.msra.mxu0 %v9625_v7 }
 0x675   : > { %7150 = vmatprep.subr.bf16.mxu0 %v9630_v14 }
 0x678   : > { %7151 = vmatpush1.bf16.msra.mxu0 %v9628_v60 }
 0x679   : > { %7152 = vmatprep.subr.bf16.mxu0 %v9633_v45 }
 0x67c   : > { %7153 = vmatpush1.bf16.msra.mxu0 %v9631_v30 }
 0x67d   : > { %7154 = vmatprep.subr.bf16.mxu0 %v9636_v9 }
 0x680   : > { %7155 = vmatpush1.bf16.msra.mxu0 %v9634_v3 }
 0x681   : > { %7156 = vmatprep.subr.bf16.mxu0 %v9639_v49 }
 0x684   : > { %7157 = vmatpush1.bf16.msra.mxu0 %v9637_v10 }
 0x685   : > { %7158 = vmatprep.subr.bf16.mxu0 %v9642_v59 }
 0x688   : > { %7159 = vmatpush1.bf16.msra.mxu0 %v9640_v6 }
 0x689   : > { %7160 = vmatprep.subr.bf16.mxu0 %v9645_v50 }
 0x68c   : > { %7161 = vmatpush1.bf16.msra.mxu0 %v9643_v51 }
 0x68d   : > { %7162 = vmatprep.subr.bf16.mxu0 %v9648_v0 }
 0x690   : > { %7163 = vmatpush1.bf16.msra.mxu0 %v9646_v19 }
 0x691   : > { %v6762_v2 = vpop.f32.mrb[12].mxu1  ;;  %7164 = vmatprep.subr.bf16.mxu0 %v9651_v15 }
 0x692   : > { %v6764_v17 = vpop.f32.mrb[13].mxu1  ;;  %v8545_v57 = vadd.f32 %v6762_v2, %v6516_v22 }
 0x693   : > { %v6766_v62 = vpop.f32.mrb[14].mxu1  ;;  %v8547_v8 = vadd.f32 %v6764_v17, %v6520_v38 }
 0x694   : > { %7165 = vmatpush1.bf16.msra.mxu0 %v9649_v33  ;;  %v6767_v23 = vpop.f32.mrb[15].mxu1 }
 0x695   : > { %7166 = vmatprep.subr.bf16.mxu0 %v9654_v16 }
 0x698   : > { %7167 = vmatpush1.bf16.msra.mxu0 %v9652_v21 }
 0x699   : > { %7168 = vmatprep.subr.bf16.mxu0 %v9657_v28 }
 0x69c   : > { %7169 = vmatpush1.bf16.msra.mxu0 %v9655_v52 }
 0x69f   : > { %7171 = vmatmul.mubr.bf16.vlgmr.msra.gmra.mrb[48].mxu0 %v3437_v41 }
 0x772   : > { %v7172_v26 = vpop.f32.mrb[48].mxu0 }
 0x773   : > { %v8546_v25 = vadd.f32 %v8545_v57, %v7172_v26  ;;  %v7174_v11 = vpop.f32.mrb[49].mxu0 }
 0x774   : > { %v8548_v56 = vadd.f32 %v8547_v8, %v7174_v11  ;;  %v7176_v34 = vpop.f32.mrb[50].mxu0 }
 0x775   : > { %v7179_v36 = vmax.f32 %v8546_v25, 0.0  ;;  %v7177_v47 = vpop.f32.mrb[51].mxu0 }
 0x776   : > { %v7180_v61 = vmax.f32 %v8548_v56, 0.0 }
 0x777   : > { %v7181_v55 = vpack.c.bf16 %v7179_v36, %v7179_v36 }
 0x778   : > { %v7182_v54 = vpack.c.bf16 %v7180_v61, %v7180_v61 }
 0x77a   : > { %7344 = vmatprep.mubr.bf16.mxu1 %v7182_v54 }
 0x77b   : > { %7345 = vmatmul.mubr.bf16.vlgmr.msra.gmra.mrb[16].mxu1 %v7181_v55 }
 0x84e   : > { %v8291_v4 = vpop.f32.mrb[16].mxu1 }
 0x84f   : > { %v8292_v37 = vpop.f32.mrb[17].mxu1 }
 0x850   : > { %v8293_v27 = vadd.f32 %v8292_v37, %v8291_v4  ;;  %v8294_v1 = vpop.f32.mrb[18].mxu1 }
 0x851   : > { %v8295_v43 = vpop.f32.mrb[19].mxu1 }
 0x852   : > { %v7347_v48 = vadd.f32 %v8293_v27, %v7215_v58 }
 0x854   : > { %7352 = vst [vmem:[%s418_s20] sm:$0x1] %v7347_v48 }
 0x855   : > { %9885 = shalt.err (!%p9882_p6)
}
 0x856   : > { %s9886_s24 = scalar_lea.hbm %s11433_s28, 16  ;;  %s9890_s27 = scalar_lea.hbm %s11484_s9, 32 }
 0x857   : > { %p9887_p5 = scmp.ne.s32.totalorder %s11433_s28, %s9886_s24  ;;  %p9891_p10 = scmp.lt.u32.totalorder %s11433_s28, %s11484_s9 }
 0x858   : > { %p9892_p2 = scmp.lt.u32.totalorder %s9890_s27, %s9886_s24  ;;  %p9894_p4 = scmp.lt.u32.totalorder %s9886_s24, %s11433_s28 }
 0x859   : > { %p9888_p9 = pnand %p9887_p5, %p11539_p7 }
 0x85a   : > { %p9893_p3 = por %p9892_p2, %p9891_p10 }
 0x85b   : > { %p9889_p12 = pneg %p9888_p9 }
 0x85c   : > { %p9895_p8 = por %p9894_p4, %p9893_p3 }
 0x85e   : > { %p9896_p11 = pnand %p9895_p8, %p9889_p12 }
 0x860   : > { %9899 = shalt.err (!%p9896_p11)
}
 0x861   : > { %8754 = dma.vmem_to_hbm [thread:$0]  (%p11539_p7), %s11435_s18, 16, %s11433_s28, %s7354_s23  }
 0x862 PF: > { %s11540_s17 = sld [smem:[#allocation28_spill]]  ;;  %p8796_p13 = scmp.ge.s32.totalorder %s9950_s12, 2 }
 0x863   : > { %s7378_s15 = sand.u32 1, %s9938_s30  }
 0x864   : > { %s7379_s20 = scalar_lea.sflag [#allocation9], %s7378_s15 }
 0x868   : > { %p11541_p1 = scmp.ne.s32.totalorder %s11540_s17, 0 }
 0x86a   : > { %p8779_p0 = pnand %p8796_p13, %p11541_p1 }
 0x86c   : > { %9933 = dma.done.wait (!%p8779_p0), %s7379_s20, 16  }
 0x86d   : > { %9935 = vsyncadd (!%p8779_p0), %s7379_s20, 4294967280  ;;  %s11542_s12 = sld [smem:[#allocation26_spill]]  ;;  %s11543_s2 = sld [smem:[#allocation25_spill]] }
 0x86e   : > { %s11544_s11 = sld [smem:[#allocation27_spill]]  ;;  %s11545_s30 = smov %s9942_s10 }
 0x873   : > { %p23_p6 = scmp.ge.s32.totalorder %s11542_s12, 4   ;;  %s11546_s10 = smov %s11543_s2 }
 0x875   :  { %25 = sbr.rel (!%p23_p6) target bundleno = 9 (0x9), region = 120 }
 0x87c   :  { %7383 = vsyncpa [#allocation8], 1 }
 0x87d   :  { %7385 = vsyncpa [#allocation8 + $0x1], 1 }
 0x87e   :  { %7386 = vsyncpa [#allocation11], 1 }
 0x87f   :  { %7387 = vsyncpa [#allocation14], 1 }
 0x880   :  { %7388 = vsyncpa [#allocation17], 1 }
 0x881   :  { %7389 = vsyncpa [#allocation9], 1 }
 0x882   :  { %7391 = vsyncpa [#allocation9 + $0x1], 1 }

</bundles_post_ra>
